<compile_context>
chip_gen: v5e
topology: v5e:2x2
jax: 0.10.0
libtpu: 0.0.40
codegen_flags: <defaults>
</compile_context>

<pallas_src>
import jax
import jax.numpy as jnp
from jax.experimental import pallas as pl
from jax.experimental.pallas import tpu as pltpu


# ---------------------------------------------------------------------------
# Helpers
# ---------------------------------------------------------------------------
def _round_up(x, m):
    return ((x + m - 1) // m) * m


def _ceil_div(a, b):
    return (a + b - 1) // b


def fold_bn(gamma, beta, mean, var, eps=1e-5):
    scale = gamma / jnp.sqrt(var + eps)
    shift = beta - mean * scale
    return scale, shift


# ---------------------------------------------------------------------------
# Pallas kernels
# ---------------------------------------------------------------------------
def _conv_pool_kernel(p0_ref, p1_ref, p2_ref, p3_ref, w_ref, b_ref, o_ref):
    """Fused conv (as matmul, BN folded) + 2x2 max-pool + bias + ReLU.

    p{0..3}: packed im2col patches for the 4 members of each 2x2 pool group,
             shape (block_m, pack*K) bf16.
    w:       block-diagonal packed folded weight, (pack*K, 128) bf16.
    b:       packed folded bias, (1, 128) f32.
    o:       lane-dense packed output, (block_m, 128) bf16.
    """
    w = w_ref[...]
    m0 = jnp.dot(p0_ref[...], w, preferred_element_type=jnp.float32)
    m1 = jnp.dot(p1_ref[...], w, preferred_element_type=jnp.float32)
    m2 = jnp.dot(p2_ref[...], w, preferred_element_type=jnp.float32)
    m3 = jnp.dot(p3_ref[...], w, preferred_element_type=jnp.float32)
    pooled = jnp.maximum(jnp.maximum(m0, m1), jnp.maximum(m2, m3))
    o_ref[...] = jnp.maximum(pooled + b_ref[...], 0.0).astype(o_ref.dtype)


def _mlp_kernel(x_ref, w1_ref, b1_ref, w2_ref, b2_ref, o_ref):
    """Fused fc1 + folded-BN + ReLU + fc2 (dropout is eval-mode identity)."""
    h = jnp.dot(x_ref[...], w1_ref[...], preferred_element_type=jnp.float32)
    h = jnp.maximum(h + b1_ref[...], 0.0)
    # TODO(synk): dropout uses eval-mode semantics (identity); training-mode RNG masking not implemented.
    logits = jnp.dot(h.astype(w2_ref.dtype), w2_ref[...],
                     preferred_element_type=jnp.float32)
    o_ref[...] = (logits + b2_ref[...]).astype(o_ref.dtype)


# ---------------------------------------------------------------------------
# Wrappers
# ---------------------------------------------------------------------------
def pooled_conv_patches(x, member):
    """im2col patches for 3x3 'same' conv, restricted to one 2x2 pool member.

    x: (N, H, W, C) NHWC.  member in {0,1,2,3} selects pixel (2*ph+a, 2*pw+b)
    of every pool group (a = member//2, b = member%2).
    Returns (N * (H//2) * (W//2), 9*C), rows ordered (n, ph, pw).
    """
    N, H, W, C = x.shape
    a, b = member // 2, member % 2
    xp = jnp.pad(x, ((0, 0), (1, 1), (1, 1), (0, 0)))
    cols = []
    for di in range(3):
        for dj in range(3):
            sl = xp[:, a + di:a + di + H - 1:2, b + dj:b + dj + W - 1:2, :]
            cols.append(sl)                       # (N, H//2, W//2, C)
    patches = jnp.stack(cols, axis=3)             # (N, H//2, W//2, 9, C)
    return patches.reshape(N * (H // 2) * (W // 2), 9 * C)


def fused_conv_bn_relu_pool(patches4, w_fold, b_fold, *, pack, block_m_cap=512):
    """conv (BN folded into w/b) + ReLU + 2x2 maxpool as one Pallas call.

    patches4: 4 arrays (NP, K), one per pool member (NP = pooled pixels).
    w_fold:   (K, C) folded conv weight, b_fold: (C,) folded bias.
    pack:     pixels packed per 128-lane output row (pack*C must be 128).
    Returns (NP, C) bf16.
    """
    NP, K = patches4[0].shape
    C = w_fold.shape[1]
    Kp, Cp = pack * K, pack * C
    assert Cp == 128, "packed output must be lane-dense (128)"

    rows = _ceil_div(NP, pack)
    block_m = min(block_m_cap, _round_up(rows, 16))
    rows_p = _round_up(rows, block_m)
    NP_p = rows_p * pack

    def prep(p):
        p = jnp.pad(p, ((0, NP_p - NP), (0, 0)))
        return p.reshape(rows_p, Kp).astype(jnp.bfloat16)

    slabs = [prep(p) for p in patches4]
    w_packed = jnp.kron(jnp.eye(pack, dtype=jnp.float32),
                        w_fold.astype(jnp.float32)).astype(jnp.bfloat16)
    b_packed = jnp.tile(b_fold.astype(jnp.float32), pack).reshape(1, Cp)

    out = pl.pallas_call(
        _conv_pool_kernel,
        out_shape=jax.ShapeDtypeStruct((rows_p, Cp), jnp.bfloat16),
        grid=(rows_p // block_m,),
        in_specs=[pl.BlockSpec((block_m, Kp), lambda i: (i, 0)) for _ in range(4)]
                 + [pl.BlockSpec((Kp, Cp), lambda i: (0, 0)),
                    pl.BlockSpec((1, Cp), lambda i: (0, 0))],
        out_specs=pl.BlockSpec((block_m, Cp), lambda i: (i, 0)),
        compiler_params=pltpu.CompilerParams(
            dimension_semantics=("parallel",),
            vmem_limit_bytes=32 * 1024 * 1024),
    )(*slabs, w_packed, b_packed)

    # unpack (pure metadata reshape: packed layout == row-major (pixel, C))
    return out.reshape(NP_p, C)[:NP]


def fused_mlp(x, w1, b1, w2, b2, *, block_m_cap=256):
    """relu((x @ w1 + b1)) @ w2 + b2 with lane-dense padded logits."""
    N, K = x.shape
    H = w1.shape[1]
    Cout = w2.shape[1]
    Cp = _round_up(Cout, 128)

    Mp = _round_up(N, 16)
    block_m = min(block_m_cap, Mp)
    Mp = _round_up(Mp, block_m)

    xp = jnp.pad(x, ((0, Mp - N), (0, 0))).astype(jnp.bfloat16)
    w1b = w1.astype(jnp.bfloat16)
    b1b = b1.reshape(1, H).astype(jnp.float32)
    w2p = jnp.pad(w2, ((0, 0), (0, Cp - Cout))).astype(jnp.bfloat16)
    b2p = jnp.pad(b2, (0, Cp - Cout)).reshape(1, Cp).astype(jnp.float32)

    out = pl.pallas_call(
        _mlp_kernel,
        out_shape=jax.ShapeDtypeStruct((Mp, Cp), jnp.float32),
        grid=(Mp // block_m,),
        in_specs=[pl.BlockSpec((block_m, K), lambda i: (i, 0)),
                  pl.BlockSpec((K, H), lambda i: (0, 0)),
                  pl.BlockSpec((1, H), lambda i: (0, 0)),
                  pl.BlockSpec((H, Cp), lambda i: (0, 0)),
                  pl.BlockSpec((1, Cp), lambda i: (0, 0))],
        out_specs=pl.BlockSpec((block_m, Cp), lambda i: (i, 0)),
        compiler_params=pltpu.CompilerParams(
            dimension_semantics=("parallel",),
            vmem_limit_bytes=32 * 1024 * 1024),
    )(xp, w1b, b1b, w2p, b2p)
    return out[:N, :Cout]


# ---------------------------------------------------------------------------
# Parameters
# ---------------------------------------------------------------------------
def make_params(key):
    ks = jax.random.split(key, 20)
    p = {}
    # conv weights stored HWIO (kh, kw, Cin, Cout); fc weights stored (K, N).
    # fc1_w rows use PyTorch's (C, H, W) flatten convention.
    p["conv1_w"] = 0.1 * jax.random.normal(ks[0], (3, 3, 1, 32), jnp.float32)
    p["conv1_b"] = 0.1 * jax.random.normal(ks[1], (32,), jnp.float32)
    p["bn1"] = (1.0 + 0.1 * jax.random.normal(ks[2], (32,), jnp.float32),
                0.1 * jax.random.normal(ks[3], (32,), jnp.float32),
                0.1 * jax.random.normal(ks[4], (32,), jnp.float32),
                1.0 + 0.1 * jnp.abs(jax.random.normal(ks[5], (32,), jnp.float32)))
    p["conv2_w"] = 0.05 * jax.random.normal(ks[6], (3, 3, 32, 64), jnp.float32)
    p["conv2_b"] = 0.1 * jax.random.normal(ks[7], (64,), jnp.float32)
    p["bn2"] = (1.0 + 0.1 * jax.random.normal(ks[8], (64,), jnp.float32),
                0.1 * jax.random.normal(ks[9], (64,), jnp.float32),
                0.1 * jax.random.normal(ks[10], (64,), jnp.float32),
                1.0 + 0.1 * jnp.abs(jax.random.normal(ks[11], (64,), jnp.float32)))
    p["fc1_w"] = 0.02 * jax.random.normal(ks[12], (7 * 7 * 64, 128), jnp.float32)
    p["fc1_b"] = 0.1 * jax.random.normal(ks[13], (128,), jnp.float32)
    p["bn3"] = (1.0 + 0.1 * jax.random.normal(ks[14], (128,), jnp.float32),
                0.1 * jax.random.normal(ks[15], (128,), jnp.float32),
                0.1 * jax.random.normal(ks[16], (128,), jnp.float32),
                1.0 + 0.1 * jnp.abs(jax.random.normal(ks[17], (128,), jnp.float32)))
    p["fc2_w"] = 0.1 * jax.random.normal(ks[18], (128, 10), jnp.float32)
    p["fc2_b"] = 0.1 * jax.random.normal(ks[19], (10,), jnp.float32)
    return p


# ---------------------------------------------------------------------------
# Forward pass (Pallas)
# ---------------------------------------------------------------------------
def digit_classifier_forward(params, x_nchw):
    N = x_nchw.shape[0]
    x = jnp.transpose(x_nchw, (0, 2, 3, 1))                  # NCHW -> NHWC

    # conv1 + bn1 + relu + 2x2 pool (single fused Pallas call)
    s1, t1 = fold_bn(*params["bn1"])
    w1f = params["conv1_w"].reshape(9 * 1, 32) * s1[None, :]
    b1f = params["conv1_b"] * s1 + t1
    patches1 = [pooled_conv_patches(x, s) for s in range(4)]
    y1 = fused_conv_bn_relu_pool(patches1, w1f, b1f, pack=4)  # (N*196, 32) bf16
    y1 = y1.reshape(N, 14, 14, 32)

    # conv2 + bn2 + relu + 2x2 pool (single fused Pallas call)
    s2, t2 = fold_bn(*params["bn2"])
    w2f = params["conv2_w"].reshape(9 * 32, 64) * s2[None, :]
    b2f = params["conv2_b"] * s2 + t2
    patches2 = [pooled_conv_patches(y1, s) for s in range(4)]
    y2 = fused_conv_bn_relu_pool(patches2, w2f, b2f, pack=2)  # (N*49, 64) bf16

    # NHWC flatten (no transpose): fc1 weight rows are permuted to NHWC order.
    flat = y2.reshape(N, 7 * 7 * 64)
    s3, t3 = fold_bn(*params["bn3"])
    w_fc1 = params["fc1_w"].reshape(64, 7, 7, 128).transpose(1, 2, 0, 3)
    w_fc1 = w_fc1.reshape(7 * 7 * 64, 128) * s3[None, :]
    b_fc1 = params["fc1_b"] * s3 + t3

    # fc1 + bn3 + relu + (eval dropout) + fc2 in one fused Pallas call
    logits = fused_mlp(flat, w_fc1, b_fc1, params["fc2_w"], params["fc2_b"])
    return logits                                             # (N, 10) f32


# ---------------------------------------------------------------------------
# Pure-JAX reference (faithful to the PyTorch module, f32 HIGHEST precision)
# ---------------------------------------------------------------------------
def reference_forward(params, x_nchw):
    hp = jax.lax.Precision.HIGHEST
    x = jnp.transpose(x_nchw, (0, 2, 3, 1))
    dn = ("NHWC", "HWIO", "NHWC")

    def pool(z):
        n, h, w, c = z.shape
        return z.reshape(n, h // 2, 2, w // 2, 2, c).max(axis=(2, 4))

    s1, t1 = fold_bn(*params["bn1"])
    y = jax.lax.conv_general_dilated(x, params["conv1_w"], (1, 1), "SAME",
                                     dimension_numbers=dn, precision=hp)
    y = jnp.maximum((y + params["conv1_b"]) * s1 + t1, 0.0)
    y = pool(y)

    s2, t2 = fold_bn(*params["bn2"])
    y = jax.lax.conv_general_dilated(y, params["conv2_w"], (1, 1), "SAME",
                                     dimension_numbers=dn, precision=hp)
    y = jnp.maximum((y + params["conv2_b"]) * s2 + t2, 0.0)
    y = pool(y)

    flat = jnp.transpose(y, (0, 3, 1, 2)).reshape(x.shape[0], 7 * 7 * 64)
    s3, t3 = fold_bn(*params["bn3"])
    h = jnp.maximum((jnp.dot(flat, params["fc1_w"], precision=hp)
                     + params["fc1_b"]) * s3 + t3, 0.0)
    return jnp.dot(h, params["fc2_w"], precision=hp) + params["fc2_b"]


# ---------------------------------------------------------------------------
if __name__ == "__main__":
    key = jax.random.PRNGKey(0)
    k_x, k_p = jax.random.split(key)
    # MNIST-like input: fc1 expects 7*7*64, so spatial must be 28x28; batch=2.
    x = jax.random.normal(k_x, (2, 1, 28, 28), jnp.float32)
    params = make_params(k_p)

    fwd = jax.jit(digit_classifier_forward)
    logits = jax.block_until_ready(fwd(params, x))
    ref = jax.block_until_ready(reference_forward(params, x))

    assert logits.shape == (2, 10)
    assert bool(jnp.all(jnp.isfinite(logits)))
    # Tolerance accounts for intentional bf16 MXU operands (f32 accumulation).
    assert jnp.allclose(logits, ref, rtol=3e-2, atol=3e-2), (
        f"max abs err {float(jnp.max(jnp.abs(logits - ref)))}")

    print("KERNEL_OK")
</pallas_src>

<mosaic_0001>
module attributes {stable_mosaic.version = 11 : i64} {
  func.func @_conv_pool_kernel(%arg0: i32, %arg1: memref<112x36xbf16, #tpu.memory_space<vmem>>, %arg2: memref<112x36xbf16, #tpu.memory_space<vmem>>, %arg3: memref<112x36xbf16, #tpu.memory_space<vmem>>, %arg4: memref<112x36xbf16, #tpu.memory_space<vmem>>, %arg5: memref<36x128xbf16, #tpu.memory_space<vmem>>, %arg6: memref<1x128xf32, #tpu.memory_space<vmem>>, %arg7: memref<112x128xbf16, #tpu.memory_space<vmem>>) attributes {dimension_semantics = [#tpu.dimension_semantics<parallel>], iteration_bounds = array<i64: 1>, scalar_prefetch = 0 : i64, scratch_operands = 0 : i64, tpu.core_type = #tpu.core_type<tc>, window_params = [{transform_indices = @transform_0, window_bounds = array<i64: 112, 36>}, {transform_indices = @transform_1, window_bounds = array<i64: 112, 36>}, {transform_indices = @transform_2, window_bounds = array<i64: 112, 36>}, {transform_indices = @transform_3, window_bounds = array<i64: 112, 36>}, {pipeline_mode = #tpu.pipeline_mode<synchronous>, transform_indices = @transform_4, window_bounds = array<i64: 36, 128>}, {pipeline_mode = #tpu.pipeline_mode<synchronous>, transform_indices = @transform_5, window_bounds = array<i64: 1, 128>}, {transform_indices = @transform_6, window_bounds = array<i64: 112, 128>}]} {
    %c0 = arith.constant 0 : index
    %c0_0 = arith.constant 0 : index
    %0 = vector.load %arg5[%c0, %c0_0] : memref<36x128xbf16, #tpu.memory_space<vmem>>, vector<36x128xbf16>
    %c0_1 = arith.constant 0 : index
    %c0_2 = arith.constant 0 : index
    %1 = vector.load %arg1[%c0_1, %c0_2] : memref<112x36xbf16, #tpu.memory_space<vmem>>, vector<112x36xbf16>
    %cst = arith.constant dense<0.000000e+00> : vector<112x128xf32>
    %2 = tpu.matmul %1, %0, %cst {dimension_numbers = #tpu.dot_dimension_numbers<[1], [0], [0], [1], [0, 0, 1, 1], [], []>} : vector<112x36xbf16>, vector<36x128xbf16>, vector<112x128xf32> -> vector<112x128xf32>
    %c0_3 = arith.constant 0 : index
    %c0_4 = arith.constant 0 : index
    %3 = vector.load %arg2[%c0_3, %c0_4] : memref<112x36xbf16, #tpu.memory_space<vmem>>, vector<112x36xbf16>
    %cst_5 = arith.constant dense<0.000000e+00> : vector<112x128xf32>
    %4 = tpu.matmul %3, %0, %cst_5 {dimension_numbers = #tpu.dot_dimension_numbers<[1], [0], [0], [1], [0, 0, 1, 1], [], []>} : vector<112x36xbf16>, vector<36x128xbf16>, vector<112x128xf32> -> vector<112x128xf32>
    %c0_6 = arith.constant 0 : index
    %c0_7 = arith.constant 0 : index
    %5 = vector.load %arg3[%c0_6, %c0_7] : memref<112x36xbf16, #tpu.memory_space<vmem>>, vector<112x36xbf16>
    %cst_8 = arith.constant dense<0.000000e+00> : vector<112x128xf32>
    %6 = tpu.matmul %5, %0, %cst_8 {dimension_numbers = #tpu.dot_dimension_numbers<[1], [0], [0], [1], [0, 0, 1, 1], [], []>} : vector<112x36xbf16>, vector<36x128xbf16>, vector<112x128xf32> -> vector<112x128xf32>
    %c0_9 = arith.constant 0 : index
    %c0_10 = arith.constant 0 : index
    %7 = vector.load %arg4[%c0_9, %c0_10] : memref<112x36xbf16, #tpu.memory_space<vmem>>, vector<112x36xbf16>
    %cst_11 = arith.constant dense<0.000000e+00> : vector<112x128xf32>
    %8 = tpu.matmul %7, %0, %cst_11 {dimension_numbers = #tpu.dot_dimension_numbers<[1], [0], [0], [1], [0, 0, 1, 1], [], []>} : vector<112x36xbf16>, vector<36x128xbf16>, vector<112x128xf32> -> vector<112x128xf32>
    %9 = arith.maximumf %2, %4 : vector<112x128xf32>
    %10 = arith.maximumf %6, %8 : vector<112x128xf32>
    %11 = arith.maximumf %9, %10 : vector<112x128xf32>
    %c0_12 = arith.constant 0 : index
    %c0_13 = arith.constant 0 : index
    %12 = vector.load %arg6[%c0_12, %c0_13] : memref<1x128xf32, #tpu.memory_space<vmem>>, vector<1x128xf32>
    %13 = vector.broadcast %12 : vector<1x128xf32> to vector<112x128xf32>
    %14 = arith.addf %11, %13 : vector<112x128xf32>
    %cst_14 = arith.constant 0.000000e+00 : f32
    %15 = vector.broadcast %cst_14 : f32 to vector<112x128xf32>
    %16 = arith.maximumf %14, %15 : vector<112x128xf32>
    %17 = arith.truncf %16 : vector<112x128xf32> to vector<112x128xbf16>
    %c0_15 = arith.constant 0 : index
    %c0_16 = arith.constant 0 : index
    %18 = vector.load %arg7[%c0_15, %c0_16] : memref<112x128xbf16, #tpu.memory_space<vmem>>, vector<112x128xbf16>
    tpu.vector_store %arg7[%c0_15, %c0_16], %17 {strides = array<i32>} : memref<112x128xbf16, #tpu.memory_space<vmem>>, vector<112x128xbf16>,
    return
  }
  func.func @transform_0(%arg0: i32) -> (i32, i32) {
    %c0_i32 = arith.constant 0 : i32
    %c0_i32_0 = arith.constant 0 : i32
    return %arg0, %c0_i32 : i32, i32
  }
  func.func @transform_1(%arg0: i32) -> (i32, i32) {
    %c0_i32 = arith.constant 0 : i32
    %c0_i32_0 = arith.constant 0 : i32
    return %arg0, %c0_i32 : i32, i32
  }
  func.func @transform_2(%arg0: i32) -> (i32, i32) {
    %c0_i32 = arith.constant 0 : i32
    %c0_i32_0 = arith.constant 0 : i32
    return %arg0, %c0_i32 : i32, i32
  }
  func.func @transform_3(%arg0: i32) -> (i32, i32) {
    %c0_i32 = arith.constant 0 : i32
    %c0_i32_0 = arith.constant 0 : i32
    return %arg0, %c0_i32 : i32, i32
  }
  func.func @transform_4(%arg0: i32) -> (i32, i32) {
    %c0_i32 = arith.constant 0 : i32
    %c0_i32_0 = arith.constant 0 : i32
    %c0_i32_1 = arith.constant 0 : i32
    return %c0_i32, %c0_i32_0 : i32, i32
  }
  func.func @transform_5(%arg0: i32) -> (i32, i32) {
    %c0_i32 = arith.constant 0 : i32
    %c0_i32_0 = arith.constant 0 : i32
    %c0_i32_1 = arith.constant 0 : i32
    return %c0_i32, %c0_i32_0 : i32, i32
  }
  func.func @transform_6(%arg0: i32) -> (i32, i32) {
    %c0_i32 = arith.constant 0 : i32
    %c0_i32_0 = arith.constant 0 : i32
    return %arg0, %c0_i32 : i32, i32
  }
}

module attributes {stable_mosaic.version = 11 : i64} {
  func.func @_conv_pool_kernel(%arg0: i32, %arg1: memref<64x576xbf16, #tpu.memory_space<vmem>>, %arg2: memref<64x576xbf16, #tpu.memory_space<vmem>>, %arg3: memref<64x576xbf16, #tpu.memory_space<vmem>>, %arg4: memref<64x576xbf16, #tpu.memory_space<vmem>>, %arg5: memref<576x128xbf16, #tpu.memory_space<vmem>>, %arg6: memref<1x128xf32, #tpu.memory_space<vmem>>, %arg7: memref<64x128xbf16, #tpu.memory_space<vmem>>) attributes {dimension_semantics = [#tpu.dimension_semantics<parallel>], iteration_bounds = array<i64: 1>, scalar_prefetch = 0 : i64, scratch_operands = 0 : i64, tpu.core_type = #tpu.core_type<tc>, window_params = [{transform_indices = @transform_0, window_bounds = array<i64: 64, 576>}, {transform_indices = @transform_1, window_bounds = array<i64: 64, 576>}, {transform_indices = @transform_2, window_bounds = array<i64: 64, 576>}, {transform_indices = @transform_3, window_bounds = array<i64: 64, 576>}, {pipeline_mode = #tpu.pipeline_mode<synchronous>, transform_indices = @transform_4, window_bounds = array<i64: 576, 128>}, {pipeline_mode = #tpu.pipeline_mode<synchronous>, transform_indices = @transform_5, window_bounds = array<i64: 1, 128>}, {transform_indices = @transform_6, window_bounds = array<i64: 64, 128>}]} {
    %c0 = arith.constant 0 : index
    %c0_0 = arith.constant 0 : index
    %0 = vector.load %arg5[%c0, %c0_0] : memref<576x128xbf16, #tpu.memory_space<vmem>>, vector<576x128xbf16>
    %c0_1 = arith.constant 0 : index
    %c0_2 = arith.constant 0 : index
    %1 = vector.load %arg1[%c0_1, %c0_2] : memref<64x576xbf16, #tpu.memory_space<vmem>>, vector<64x576xbf16>
    %cst = arith.constant dense<0.000000e+00> : vector<64x128xf32>
    %2 = tpu.matmul %1, %0, %cst {dimension_numbers = #tpu.dot_dimension_numbers<[1], [0], [0], [1], [0, 0, 1, 1], [], []>} : vector<64x576xbf16>, vector<576x128xbf16>, vector<64x128xf32> -> vector<64x128xf32>
    %c0_3 = arith.constant 0 : index
    %c0_4 = arith.constant 0 : index
    %3 = vector.load %arg2[%c0_3, %c0_4] : memref<64x576xbf16, #tpu.memory_space<vmem>>, vector<64x576xbf16>
    %cst_5 = arith.constant dense<0.000000e+00> : vector<64x128xf32>
    %4 = tpu.matmul %3, %0, %cst_5 {dimension_numbers = #tpu.dot_dimension_numbers<[1], [0], [0], [1], [0, 0, 1, 1], [], []>} : vector<64x576xbf16>, vector<576x128xbf16>, vector<64x128xf32> -> vector<64x128xf32>
    %c0_6 = arith.constant 0 : index
    %c0_7 = arith.constant 0 : index
    %5 = vector.load %arg3[%c0_6, %c0_7] : memref<64x576xbf16, #tpu.memory_space<vmem>>, vector<64x576xbf16>
    %cst_8 = arith.constant dense<0.000000e+00> : vector<64x128xf32>
    %6 = tpu.matmul %5, %0, %cst_8 {dimension_numbers = #tpu.dot_dimension_numbers<[1], [0], [0], [1], [0, 0, 1, 1], [], []>} : vector<64x576xbf16>, vector<576x128xbf16>, vector<64x128xf32> -> vector<64x128xf32>
    %c0_9 = arith.constant 0 : index
    %c0_10 = arith.constant 0 : index
    %7 = vector.load %arg4[%c0_9, %c0_10] : memref<64x576xbf16, #tpu.memory_space<vmem>>, vector<64x576xbf16>
    %cst_11 = arith.constant dense<0.000000e+00> : vector<64x128xf32>
    %8 = tpu.matmul %7, %0, %cst_11 {dimension_numbers = #tpu.dot_dimension_numbers<[1], [0], [0], [1], [0, 0, 1, 1], [], []>} : vector<64x576xbf16>, vector<576x128xbf16>, vector<64x128xf32> -> vector<64x128xf32>
    %9 = arith.maximumf %2, %4 : vector<64x128xf32>
    %10 = arith.maximumf %6, %8 : vector<64x128xf32>
    %11 = arith.maximumf %9, %10 : vector<64x128xf32>
    %c0_12 = arith.constant 0 : index
    %c0_13 = arith.constant 0 : index
    %12 = vector.load %arg6[%c0_12, %c0_13] : memref<1x128xf32, #tpu.memory_space<vmem>>, vector<1x128xf32>
    %13 = vector.broadcast %12 : vector<1x128xf32> to vector<64x128xf32>
    %14 = arith.addf %11, %13 : vector<64x128xf32>
    %cst_14 = arith.constant 0.000000e+00 : f32
    %15 = vector.broadcast %cst_14 : f32 to vector<64x128xf32>
    %16 = arith.maximumf %14, %15 : vector<64x128xf32>
    %17 = arith.truncf %16 : vector<64x128xf32> to vector<64x128xbf16>
    %c0_15 = arith.constant 0 : index
    %c0_16 = arith.constant 0 : index
    %18 = vector.load %arg7[%c0_15, %c0_16] : memref<64x128xbf16, #tpu.memory_space<vmem>>, vector<64x128xbf16>
    tpu.vector_store %arg7[%c0_15, %c0_16], %17 {strides = array<i32>} : memref<64x128xbf16, #tpu.memory_space<vmem>>, vector<64x128xbf16>,
    return
  }
  func.func @transform_0(%arg0: i32) -> (i32, i32) {
    %c0_i32 = arith.constant 0 : i32
    %c0_i32_0 = arith.constant 0 : i32
    return %arg0, %c0_i32 : i32, i32
  }
  func.func @transform_1(%arg0: i32) -> (i32, i32) {
    %c0_i32 = arith.constant 0 : i32
    %c0_i32_0 = arith.constant 0 : i32
    return %arg0, %c0_i32 : i32, i32
  }
  func.func @transform_2(%arg0: i32) -> (i32, i32) {
    %c0_i32 = arith.constant 0 : i32
    %c0_i32_0 = arith.constant 0 : i32
    return %arg0, %c0_i32 : i32, i32
  }
  func.func @transform_3(%arg0: i32) -> (i32, i32) {
    %c0_i32 = arith.constant 0 : i32
    %c0_i32_0 = arith.constant 0 : i32
    return %arg0, %c0_i32 : i32, i32
  }
  func.func @transform_4(%arg0: i32) -> (i32, i32) {
    %c0_i32 = arith.constant 0 : i32
    %c0_i32_0 = arith.constant 0 : i32
    %c0_i32_1 = arith.constant 0 : i32
    return %c0_i32, %c0_i32_0 : i32, i32
  }
  func.func @transform_5(%arg0: i32) -> (i32, i32) {
    %c0_i32 = arith.constant 0 : i32
    %c0_i32_0 = arith.constant 0 : i32
    %c0_i32_1 = arith.constant 0 : i32
    return %c0_i32, %c0_i32_0 : i32, i32
  }
  func.func @transform_6(%arg0: i32) -> (i32, i32) {
    %c0_i32 = arith.constant 0 : i32
    %c0_i32_0 = arith.constant 0 : i32
    return %arg0, %c0_i32 : i32, i32
  }
}

module attributes {stable_mosaic.version = 11 : i64} {
  func.func @_mlp_kernel(%arg0: i32, %arg1: memref<16x3136xbf16, #tpu.memory_space<vmem>>, %arg2: memref<3136x128xbf16, #tpu.memory_space<vmem>>, %arg3: memref<1x128xf32, #tpu.memory_space<vmem>>, %arg4: memref<128x128xbf16, #tpu.memory_space<vmem>>, %arg5: memref<1x128xf32, #tpu.memory_space<vmem>>, %arg6: memref<16x128xf32, #tpu.memory_space<vmem>>) attributes {dimension_semantics = [#tpu.dimension_semantics<parallel>], iteration_bounds = array<i64: 1>, scalar_prefetch = 0 : i64, scratch_operands = 0 : i64, tpu.core_type = #tpu.core_type<tc>, window_params = [{transform_indices = @transform_0, window_bounds = array<i64: 16, 3136>}, {pipeline_mode = #tpu.pipeline_mode<synchronous>, transform_indices = @transform_1, window_bounds = array<i64: 3136, 128>}, {pipeline_mode = #tpu.pipeline_mode<synchronous>, transform_indices = @transform_2, window_bounds = array<i64: 1, 128>}, {pipeline_mode = #tpu.pipeline_mode<synchronous>, transform_indices = @transform_3, window_bounds = array<i64: 128, 128>}, {pipeline_mode = #tpu.pipeline_mode<synchronous>, transform_indices = @transform_4, window_bounds = array<i64: 1, 128>}, {transform_indices = @transform_5, window_bounds = array<i64: 16, 128>}]} {
    %c0 = arith.constant 0 : index
    %c0_0 = arith.constant 0 : index
    %0 = vector.load %arg1[%c0, %c0_0] : memref<16x3136xbf16, #tpu.memory_space<vmem>>, vector<16x3136xbf16>
    %c0_1 = arith.constant 0 : index
    %c0_2 = arith.constant 0 : index
    %1 = vector.load %arg2[%c0_1, %c0_2] : memref<3136x128xbf16, #tpu.memory_space<vmem>>, vector<3136x128xbf16>
    %cst = arith.constant dense<0.000000e+00> : vector<16x128xf32>
    %2 = tpu.matmul %0, %1, %cst {dimension_numbers = #tpu.dot_dimension_numbers<[1], [0], [0], [1], [0, 0, 1, 1], [], []>} : vector<16x3136xbf16>, vector<3136x128xbf16>, vector<16x128xf32> -> vector<16x128xf32>
    %c0_3 = arith.constant 0 : index
    %c0_4 = arith.constant 0 : index
    %3 = vector.load %arg3[%c0_3, %c0_4] : memref<1x128xf32, #tpu.memory_space<vmem>>, vector<1x128xf32>
    %4 = vector.broadcast %3 : vector<1x128xf32> to vector<16x128xf32>
    %5 = arith.addf %2, %4 : vector<16x128xf32>
    %cst_5 = arith.constant 0.000000e+00 : f32
    %6 = vector.broadcast %cst_5 : f32 to vector<16x128xf32>
    %7 = arith.maximumf %5, %6 : vector<16x128xf32>
    %8 = arith.truncf %7 : vector<16x128xf32> to vector<16x128xbf16>
    %c0_6 = arith.constant 0 : index
    %c0_7 = arith.constant 0 : index
    %9 = vector.load %arg4[%c0_6, %c0_7] : memref<128x128xbf16, #tpu.memory_space<vmem>>, vector<128x128xbf16>
    %cst_8 = arith.constant dense<0.000000e+00> : vector<16x128xf32>
    %10 = tpu.matmul %8, %9, %cst_8 {dimension_numbers = #tpu.dot_dimension_numbers<[1], [0], [0], [1], [0, 0, 1, 1], [], []>} : vector<16x128xbf16>, vector<128x128xbf16>, vector<16x128xf32> -> vector<16x128xf32>
    %c0_9 = arith.constant 0 : index
    %c0_10 = arith.constant 0 : index
    %11 = vector.load %arg5[%c0_9, %c0_10] : memref<1x128xf32, #tpu.memory_space<vmem>>, vector<1x128xf32>
    %12 = vector.broadcast %11 : vector<1x128xf32> to vector<16x128xf32>
    %13 = arith.addf %10, %12 : vector<16x128xf32>
    %c0_11 = arith.constant 0 : index
    %c0_12 = arith.constant 0 : index
    %14 = vector.load %arg6[%c0_11, %c0_12] : memref<16x128xf32, #tpu.memory_space<vmem>>, vector<16x128xf32>
    tpu.vector_store %arg6[%c0_11, %c0_12], %13 {strides = array<i32>} : memref<16x128xf32, #tpu.memory_space<vmem>>, vector<16x128xf32>,
    return
  }
  func.func @transform_0(%arg0: i32) -> (i32, i32) {
    %c0_i32 = arith.constant 0 : i32
    %c0_i32_0 = arith.constant 0 : i32
    return %arg0, %c0_i32 : i32, i32
  }
  func.func @transform_1(%arg0: i32) -> (i32, i32) {
    %c0_i32 = arith.constant 0 : i32
    %c0_i32_0 = arith.constant 0 : i32
    %c0_i32_1 = arith.constant 0 : i32
    return %c0_i32, %c0_i32_0 : i32, i32
  }
  func.func @transform_2(%arg0: i32) -> (i32, i32) {
    %c0_i32 = arith.constant 0 : i32
    %c0_i32_0 = arith.constant 0 : i32
    %c0_i32_1 = arith.constant 0 : i32
    return %c0_i32, %c0_i32_0 : i32, i32
  }
  func.func @transform_3(%arg0: i32) -> (i32, i32) {
    %c0_i32 = arith.constant 0 : i32
    %c0_i32_0 = arith.constant 0 : i32
    %c0_i32_1 = arith.constant 0 : i32
    return %c0_i32, %c0_i32_0 : i32, i32
  }
  func.func @transform_4(%arg0: i32) -> (i32, i32) {
    %c0_i32 = arith.constant 0 : i32
    %c0_i32_0 = arith.constant 0 : i32
    %c0_i32_1 = arith.constant 0 : i32
    return %c0_i32, %c0_i32_0 : i32, i32
  }
  func.func @transform_5(%arg0: i32) -> (i32, i32) {
    %c0_i32 = arith.constant 0 : i32
    %c0_i32_0 = arith.constant 0 : i32
    return %arg0, %c0_i32 : i32, i32
  }
}

</mosaic_0001>

<bundles_post_ra>
// kernel: tile.13
= control target key start
LH: loop header
LB: loop body
LE: loop exit
PB: predicated region body
PF: predicated region fallthrough
CT: control target
= control target key end

     0   :  { %s22_s0 = inlined_call_operand.vmem [shape: f32[32], index: 0, kind: input, shape index: {}]   ;;  %s23_s1 = inlined_call_operand.vmem [shape: f32[4,32], index: 1, kind: output, shape index: {}]  }
   0x1   :  { %v4_v0 = vld [vmem:[%s22_s0] ss:$0 sm:$0xff] }
   0x2   :  { %5 = vst [vmem:[%s23_s1] sm:$0xf] %v4_v0 }

// kernel: tile.14
= control target key start
LH: loop header
LB: loop body
LE: loop exit
PB: predicated region body
PF: predicated region fallthrough
CT: control target
= control target key end

     0   :  { %s37_s8 = smov 32   ;;  %s38_s9 = smov 64   ;;  %vm7_vm0 = vcmask 261120   ;;  %vm13_vm1 = vcmask 1048320   ;;  %vm19_vm2 = vcmask 785920   ;;  %vm25_vm3 = vcmask 523520   ;;  %s55_s0 = inlined_call_operand.vmem [shape: f32[4,32], index: 0, kind: input, shape index: {}]   ;;  %s56_s1 = inlined_call_operand.vmem [shape: f32[1,128], index: 1, kind: output, shape index: {}]  }
   0x1   :  { %v4_v0 = vld [vmem:[%s55_s0] sm:$0xf]  ;;  %s36_s0 = smov 96  }
   0x2   :  { %5 = vst [vmem:[#allocation1] sm:$0xf] %v4_v0 }
   0x9   :  { %v10_v1 = vld [vmem:[#allocation1 + $0x3] sm:$0x1]   ;;  %v22_v2 = vld [vmem:[#allocation1 + $0x1] sm:$0x1]   ;;  %v16_v3 = vld [vmem:[#allocation1 + $0x2] sm:$0x1]  }
   0xa   :  { %11 = vrot.lane.b32.xlu0 %v10_v1, %s36_s0  ;;  %23 = vrot.lane.b32.xlu1 %v22_v2, %s37_s8  ;;  %v6_v4 = vld [vmem:[#allocation1] sm:$0x1]  }
   0xb   :  { %8 = vst.msk [vmem:[#allocation0] sm:$0x1] %vm7_vm0, %v6_v4  }
  0x12   :  { %17 = vrot.lane.b32.xlu0 %v16_v3, %s38_s9 }
  0x7c   :  { %v12_v5 = vpop.permute.xlu0 %11   ;;  %v24_v6 = vpop.permute.xlu1 %23  }
  0x7d   :  { %14 = vst.msk [vmem:[#allocation0] sm:$0x1] %vm13_vm1, %v12_v5  }
  0x84   :  { %v18_v7 = vpop.permute.xlu0 %17  }
  0x85   :  { %20 = vst.msk [vmem:[#allocation0] sm:$0x1] %vm19_vm2, %v18_v7  }
  0x86   :  { %26 = vst.msk [vmem:[#allocation0] sm:$0x1] %vm25_vm3, %v24_v6  }
  0x8d   :  { %v29_v8 = vld [vmem:[#allocation0] sm:$0x1] }
  0x8e   :  { %32 = vst [vmem:[%s56_s1] sm:$0x1] %v29_v8 }

// kernel: digit_classifier_forward.3
= control target key start
LH: loop header
LB: loop body
LE: loop exit
PB: predicated region body
PF: predicated region fallthrough
CT: control target
= control target key end

     0   :  { %vm115_vm0 = vcmask 1041408   ;;  %vm93_vm1 = vcmask 293888   ;;  %s1027_s4 = inlined_call_operand.vmem [shape: bf16[36,128], index: 4, kind: input, shape index: {}]   ;;  %s1028_s0 = inlined_call_operand.vmem [shape: bf16[112,36], index: 0, kind: input, shape index: {}]   ;;  %s1029_s1 = inlined_call_operand.vmem [shape: bf16[112,36], index: 1, kind: input, shape index: {}]   ;;  %s1030_s2 = inlined_call_operand.vmem [shape: bf16[112,36], index: 2, kind: input, shape index: {}]   ;;  %s1031_s3 = inlined_call_operand.vmem [shape: bf16[112,36], index: 3, kind: input, shape index: {}]   ;;  %s1032_s5 = inlined_call_operand.vmem [shape: f32[1,128], index: 5, kind: input, shape index: {}]   ;;  %s1033_s6 = inlined_call_operand.vmem [shape: bf16[112,128], index: 6, kind: output, shape index: {}]  }
   0x1   :  { %v28_v0 = vld [vmem:[%s1027_s4 + $0x10] sm:$0x3]  ;;  %v760_v4 = vld [vmem:[%s1027_s4 + $0x8] sm:$0xff]  ;;  %v759_v5 = vld [vmem:[%s1027_s4] sm:$0xff] }
   0x2   :  { %v87_v1 = vunpack.c.l.b16 %v28_v0  ;;  %v761_v6 = vld [vmem:[%s1028_s0] sm:$0xff]  ;;  %v762_v10 = vld [vmem:[%s1028_s0 + $0x8] sm:$0xff]  ;;  %v763_v14 = vld [vmem:[%s1028_s0 + $0x10] sm:$0xff] }
   0x3   :  { %v768_v7 = vld [vmem:[%s1029_s1] sm:$0xff]  ;;  %v769_v11 = vld [vmem:[%s1029_s1 + $0x8] sm:$0xff]  ;;  %v770_v15 = vld [vmem:[%s1029_s1 + $0x10] sm:$0xff] }
   0x4   :  { %v90_v2 = vpack.c.b16 %v87_v1, %v87_v1  ;;  %v775_v8 = vld [vmem:[%s1030_s2] sm:$0xff]  ;;  %v776_v12 = vld [vmem:[%s1030_s2 + $0x8] sm:$0xff]  ;;  %v777_v16 = vld [vmem:[%s1030_s2 + $0x10] sm:$0xff] }
   0x5   :  { %v782_v9 = vld [vmem:[%s1031_s3] sm:$0xff]  ;;  %v783_v13 = vld [vmem:[%s1031_s3 + $0x8] sm:$0xff]  ;;  %v784_v17 = vld [vmem:[%s1031_s3 + $0x10] sm:$0xff] }
   0x6   :  { %v117_v3 = vsel %vm115_vm0, %v90_v2, 0  ;;  %v764_v18 = vld [vmem:[%s1028_s0 + $0x18] sm:$0xff]  ;;  %v765_v22 = vld [vmem:[%s1028_s0 + $0x20] sm:$0xff]  ;;  %v766_v26 = vld [vmem:[%s1028_s0 + $0x28] sm:$0xff] }
   0x7   :  { %124 = vmatpush.bf16.msra.mxu0 %v117_v3  ;;  %238 = vmatpush.bf16.msra.mxu1 %v117_v3  ;;  %v771_v19 = vld [vmem:[%s1029_s1 + $0x18] sm:$0xff]  ;;  %v772_v23 = vld [vmem:[%s1029_s1 + $0x20] sm:$0xff]  ;;  %v773_v27 = vld [vmem:[%s1029_s1 + $0x28] sm:$0xff] }
   0x8   :  { %352 = vmatpush.bf16.msra.mxu2 %v117_v3  ;;  %466 = vmatpush.bf16.msra.mxu3 %v117_v3  ;;  %v778_v20 = vld [vmem:[%s1030_s2 + $0x18] sm:$0xff]  ;;  %v779_v24 = vld [vmem:[%s1030_s2 + $0x20] sm:$0xff]  ;;  %v780_v28 = vld [vmem:[%s1030_s2 + $0x28] sm:$0xff] }
   0x9   :  { %v785_v21 = vld [vmem:[%s1031_s3 + $0x18] sm:$0xff]  ;;  %v786_v25 = vld [vmem:[%s1031_s3 + $0x20] sm:$0xff]  ;;  %v787_v29 = vld [vmem:[%s1031_s3 + $0x28] sm:$0xff] }
   0xa   :  { %v767_v30 = vld [vmem:[%s1028_s0 + $0x30] sm:$0xff]  ;;  %v990_v43 = vld [vmem:[%s1032_s5] ss:$0 sm:$0xff] }
   0xb   :  { %125 = vmatpush.bf16.msra.mxu0 %v760_v4  ;;  %239 = vmatpush.bf16.msra.mxu1 %v760_v4  ;;  %v774_v31 = vld [vmem:[%s1029_s1 + $0x30] sm:$0xff] }
   0xc   :  { %353 = vmatpush.bf16.msra.mxu2 %v760_v4  ;;  %467 = vmatpush.bf16.msra.mxu3 %v760_v4  ;;  %v781_v32 = vld [vmem:[%s1030_s2 + $0x30] sm:$0xff] }
   0xd   :  { %v788_v33 = vld [vmem:[%s1031_s3 + $0x30] sm:$0xff] }
   0xf   :  { %126 = vmatpush.bf16.msra.mxu0 %v759_v5  ;;  %240 = vmatpush.bf16.msra.mxu1 %v759_v5 }
  0x10   :  { %354 = vmatpush.bf16.msra.mxu2 %v759_v5  ;;  %468 = vmatpush.bf16.msra.mxu3 %v759_v5 }
  0x12   :  { %647 = vmatmul.msk.bf16.vlgmr.msra.gmra.mxu0 %vm93_vm1, %v761_v6  ;;  %682 = vmatmul.msk.bf16.vlgmr.msra.gmra.mxu1 %vm93_vm1, %v768_v7 }
  0x13   :  { %717 = vmatmul.msk.bf16.vlgmr.msra.gmra.mxu2 %vm93_vm1, %v775_v8  ;;  %752 = vmatmul.msk.bf16.vlgmr.msra.gmra.mxu3 %vm93_vm1, %v782_v9 }
  0x22   :  { %648 = vmatmul.msk.bf16.gmra.mxu0 %vm93_vm1, %v762_v10  ;;  %683 = vmatmul.msk.bf16.gmra.mxu1 %vm93_vm1, %v769_v11 }
  0x23   :  { %718 = vmatmul.msk.bf16.gmra.mxu2 %vm93_vm1, %v776_v12  ;;  %753 = vmatmul.msk.bf16.gmra.mxu3 %vm93_vm1, %v783_v13 }
  0x32   :  { %649 = vmatmul.msk.bf16.gmra.mxu0 %vm93_vm1, %v763_v14  ;;  %684 = vmatmul.msk.bf16.gmra.mxu1 %vm93_vm1, %v770_v15 }
  0x33   :  { %719 = vmatmul.msk.bf16.gmra.mxu2 %vm93_vm1, %v777_v16  ;;  %754 = vmatmul.msk.bf16.gmra.mxu3 %vm93_vm1, %v784_v17 }
  0x42   :  { %650 = vmatmul.msk.bf16.gmra.mxu0 %vm93_vm1, %v764_v18  ;;  %685 = vmatmul.msk.bf16.gmra.mxu1 %vm93_vm1, %v771_v19 }
  0x43   :  { %720 = vmatmul.msk.bf16.gmra.mxu2 %vm93_vm1, %v778_v20  ;;  %755 = vmatmul.msk.bf16.gmra.mxu3 %vm93_vm1, %v785_v21 }
  0x52   :  { %651 = vmatmul.msk.bf16.gmra.mxu0 %vm93_vm1, %v765_v22  ;;  %686 = vmatmul.msk.bf16.gmra.mxu1 %vm93_vm1, %v772_v23 }
  0x53   :  { %721 = vmatmul.msk.bf16.gmra.mxu2 %vm93_vm1, %v779_v24  ;;  %756 = vmatmul.msk.bf16.gmra.mxu3 %vm93_vm1, %v786_v25 }
  0x62   :  { %652 = vmatmul.msk.bf16.gmra.mxu0 %vm93_vm1, %v766_v26  ;;  %687 = vmatmul.msk.bf16.gmra.mxu1 %vm93_vm1, %v773_v27 }
  0x63   :  { %722 = vmatmul.msk.bf16.gmra.mxu2 %vm93_vm1, %v780_v28  ;;  %757 = vmatmul.msk.bf16.gmra.mxu3 %vm93_vm1, %v787_v29 }
  0x72   :  { %653 = vmatmul.msk.bf16.gmra.mxu0 %vm93_vm1, %v767_v30  ;;  %688 = vmatmul.msk.bf16.gmra.mxu1 %vm93_vm1, %v774_v31 }
  0x73   :  { %723 = vmatmul.msk.bf16.gmra.mxu2 %vm93_vm1, %v781_v32  ;;  %758 = vmatmul.msk.bf16.gmra.mxu3 %vm93_vm1, %v788_v33 }
  0x8f   :  { %v128_v34 = vpop.f32.mrf.mxu0  ;;  %v242_v35 = vpop.f32.mrf.mxu1 }
  0x90   :  { %v505_v40 = vmax.f32 %v128_v34, %v242_v35 }
  0x96   :  { %v356_v36 = vpop.f32.mrf.mxu2  ;;  %v470_v37 = vpop.f32.mrf.mxu3 }
  0x97   :  { %v130_v38 = vpop.f32.mrf.mxu0  ;;  %v244_v39 = vpop.f32.mrf.mxu1  ;;  %v519_v41 = vmax.f32 %v356_v36, %v470_v37 }
  0x98   :  { %v506_v46 = vmax.f32 %v130_v38, %v244_v39 }
  0x99   :  { %v533_v42 = vmax.f32 %v505_v40, %v519_v41 }
  0x9b   :  { %v551_v50 = vadd.f32 %v990_v43, %v533_v42 }
  0x9d   :  { %v565_v53 = vmax.f32 %v551_v50, 0.0 }
  0x9e   :  { %v358_v44 = vpop.f32.mrf.mxu2  ;;  %v472_v45 = vpop.f32.mrf.mxu3 }
  0x9f   :  { %v520_v47 = vmax.f32 %v358_v44, %v472_v45  ;;  %v133_v48 = vpop.f32.mrf.mxu0  ;;  %v247_v49 = vpop.f32.mrf.mxu1 }
  0xa0   :  { %v507_v60 = vmax.f32 %v133_v48, %v247_v49 }
  0xa1   :  { %v534_v51 = vmax.f32 %v506_v46, %v520_v47 }
  0xa3   :  { %v552_v52 = vadd.f32 %v990_v43, %v534_v51 }
  0xa5   :  { %v566_v54 = vmax.f32 %v552_v52, 0.0 }
  0xa6   :  { %v361_v55 = vpop.f32.mrf.mxu2  ;;  %v475_v56 = vpop.f32.mrf.mxu3 }
  0xa7   :  { %v792_v57 = vpack.c.bf16 %v566_v54, %v565_v53  ;;  %v135_v58 = vpop.f32.mrf.mxu0  ;;  %v249_v59 = vpop.f32.mrf.mxu1  ;;  %v521_v61 = vmax.f32 %v361_v55, %v475_v56 }
  0xa8   :  { %v508_v1 = vmax.f32 %v135_v58, %v249_v59 }
  0xa9   :  { %793 = vst [vmem:[%s1033_s6] sm:$0xff] %v792_v57   ;;  %v535_v62 = vmax.f32 %v507_v60, %v521_v61 }
  0xab   :  { %v553_v5 = vadd.f32 %v990_v43, %v535_v62 }
  0xad   :  { %v567_v8 = vmax.f32 %v553_v5, 0.0 }
  0xae   :  { %v363_v63 = vpop.f32.mrf.mxu2  ;;  %v477_v0 = vpop.f32.mrf.mxu3 }
  0xaf   :  { %v522_v2 = vmax.f32 %v363_v63, %v477_v0  ;;  %v138_v3 = vpop.f32.mrf.mxu0  ;;  %v252_v4 = vpop.f32.mrf.mxu1 }
  0xb0   :  { %v509_v15 = vmax.f32 %v138_v3, %v252_v4 }
  0xb1   :  { %v536_v6 = vmax.f32 %v508_v1, %v522_v2 }
  0xb3   :  { %v554_v7 = vadd.f32 %v990_v43, %v536_v6 }
  0xb5   :  { %v568_v9 = vmax.f32 %v554_v7, 0.0 }
  0xb6   :  { %v366_v10 = vpop.f32.mrf.mxu2  ;;  %v480_v11 = vpop.f32.mrf.mxu3 }
  0xb7   :  { %v797_v12 = vpack.c.bf16 %v568_v9, %v567_v8  ;;  %v140_v13 = vpop.f32.mrf.mxu0  ;;  %v254_v14 = vpop.f32.mrf.mxu1  ;;  %v523_v16 = vmax.f32 %v366_v10, %v480_v11 }
  0xb8   :  { %v510_v20 = vmax.f32 %v140_v13, %v254_v14 }
  0xb9   :  { %824 = vst [vmem:[%s1033_s6 + $0x8] sm:$0xff] %v797_v12   ;;  %v537_v17 = vmax.f32 %v509_v15, %v523_v16 }
  0xbb   :  { %v555_v24 = vadd.f32 %v990_v43, %v537_v17 }
  0xbd   :  { %v569_v27 = vmax.f32 %v555_v24, 0.0 }
  0xbe   :  { %v368_v18 = vpop.f32.mrf.mxu2  ;;  %v482_v19 = vpop.f32.mrf.mxu3 }
  0xbf   :  { %v524_v21 = vmax.f32 %v368_v18, %v482_v19  ;;  %v143_v22 = vpop.f32.mrf.mxu0  ;;  %v257_v23 = vpop.f32.mrf.mxu1 }
  0xc0   :  { %v511_v34 = vmax.f32 %v143_v22, %v257_v23 }
  0xc1   :  { %v538_v25 = vmax.f32 %v510_v20, %v524_v21 }
  0xc3   :  { %v556_v26 = vadd.f32 %v990_v43, %v538_v25 }
  0xc5   :  { %v570_v28 = vmax.f32 %v556_v26, 0.0 }
  0xc6   :  { %v371_v29 = vpop.f32.mrf.mxu2  ;;  %v485_v30 = vpop.f32.mrf.mxu3 }
  0xc7   :  { %v802_v31 = vpack.c.bf16 %v570_v28, %v569_v27  ;;  %v145_v32 = vpop.f32.mrf.mxu0  ;;  %v259_v33 = vpop.f32.mrf.mxu1  ;;  %v525_v35 = vmax.f32 %v371_v29, %v485_v30 }
  0xc8   :  { %v512_v39 = vmax.f32 %v145_v32, %v259_v33 }
  0xc9   :  { %825 = vst [vmem:[%s1033_s6 + $0x10] sm:$0xff] %v802_v31   ;;  %v539_v36 = vmax.f32 %v511_v34, %v525_v35 }
  0xcb   :  { %v557_v44 = vadd.f32 %v990_v43, %v539_v36 }
  0xcd   :  { %v571_v47 = vmax.f32 %v557_v44, 0.0 }
  0xce   :  { %v373_v37 = vpop.f32.mrf.mxu2  ;;  %v487_v38 = vpop.f32.mrf.mxu3 }
  0xcf   :  { %v526_v40 = vmax.f32 %v373_v37, %v487_v38  ;;  %v148_v41 = vpop.f32.mrf.mxu0  ;;  %v262_v42 = vpop.f32.mrf.mxu1 }
  0xd0   :  { %v513_v54 = vmax.f32 %v148_v41, %v262_v42 }
  0xd1   :  { %v540_v45 = vmax.f32 %v512_v39, %v526_v40 }
  0xd3   :  { %v558_v46 = vadd.f32 %v990_v43, %v540_v45 }
  0xd5   :  { %v572_v48 = vmax.f32 %v558_v46, 0.0 }
  0xd6   :  { %v376_v49 = vpop.f32.mrf.mxu2  ;;  %v490_v50 = vpop.f32.mrf.mxu3 }
  0xd7   :  { %v807_v51 = vpack.c.bf16 %v572_v48, %v571_v47  ;;  %v150_v52 = vpop.f32.mrf.mxu0  ;;  %v264_v53 = vpop.f32.mrf.mxu1  ;;  %v527_v55 = vmax.f32 %v376_v49, %v490_v50 }
  0xd8   :  { %v514_v59 = vmax.f32 %v150_v52, %v264_v53 }
  0xd9   :  { %826 = vst [vmem:[%s1033_s6 + $0x18] sm:$0xff] %v807_v51   ;;  %v541_v56 = vmax.f32 %v513_v54, %v527_v55 }
  0xdb   :  { %v559_v63 = vadd.f32 %v990_v43, %v541_v56 }
  0xdd   :  { %v573_v2 = vmax.f32 %v559_v63, 0.0 }
  0xde   :  { %v378_v57 = vpop.f32.mrf.mxu2  ;;  %v492_v58 = vpop.f32.mrf.mxu3 }
  0xdf   :  { %v528_v60 = vmax.f32 %v378_v57, %v492_v58  ;;  %v153_v61 = vpop.f32.mrf.mxu0  ;;  %v267_v62 = vpop.f32.mrf.mxu1 }
  0xe0   :  { %v515_v9 = vmax.f32 %v153_v61, %v267_v62 }
  0xe1   :  { %v542_v0 = vmax.f32 %v514_v59, %v528_v60 }
  0xe3   :  { %v560_v1 = vadd.f32 %v990_v43, %v542_v0 }
  0xe5   :  { %v574_v3 = vmax.f32 %v560_v1, 0.0 }
  0xe6   :  { %v381_v4 = vpop.f32.mrf.mxu2  ;;  %v495_v5 = vpop.f32.mrf.mxu3 }
  0xe7   :  { %v812_v6 = vpack.c.bf16 %v574_v3, %v573_v2  ;;  %v155_v7 = vpop.f32.mrf.mxu0  ;;  %v269_v8 = vpop.f32.mrf.mxu1  ;;  %v529_v10 = vmax.f32 %v381_v4, %v495_v5 }
  0xe8   :  { %v516_v14 = vmax.f32 %v155_v7, %v269_v8 }
  0xe9   :  { %827 = vst [vmem:[%s1033_s6 + $0x20] sm:$0xff] %v812_v6   ;;  %v543_v11 = vmax.f32 %v515_v9, %v529_v10 }
  0xeb   :  { %v561_v16 = vadd.f32 %v990_v43, %v543_v11 }
  0xed   :  { %v575_v21 = vmax.f32 %v561_v16, 0.0 }
  0xee   :  { %v383_v12 = vpop.f32.mrf.mxu2  ;;  %v497_v13 = vpop.f32.mrf.mxu3 }
  0xef   :  { %v530_v15 = vmax.f32 %v383_v12, %v497_v13  ;;  %v158_v18 = vpop.f32.mrf.mxu0  ;;  %v272_v19 = vpop.f32.mrf.mxu1 }
  0xf0   :  { %v517_v26 = vmax.f32 %v158_v18, %v272_v19 }
  0xf1   :  { %v544_v17 = vmax.f32 %v516_v14, %v530_v15 }
  0xf3   :  { %v562_v20 = vadd.f32 %v990_v43, %v544_v17 }
  0xf5   :  { %v576_v22 = vmax.f32 %v562_v20, 0.0 }
  0xf6   :  { %v386_v23 = vpop.f32.mrf.mxu2  ;;  %v500_v24 = vpop.f32.mrf.mxu3 }
  0xf7   :  { %v817_v25 = vpack.c.bf16 %v576_v22, %v575_v21  ;;  %v531_v27 = vmax.f32 %v386_v23, %v500_v24  ;;  %v160_v28 = vpop.f32.mrf.mxu0  ;;  %v274_v29 = vpop.f32.mrf.mxu1 }
  0xf8   :  { %v518_v33 = vmax.f32 %v160_v28, %v274_v29 }
  0xf9   :  { %828 = vst [vmem:[%s1033_s6 + $0x28] sm:$0xff] %v817_v25   ;;  %v545_v30 = vmax.f32 %v517_v26, %v531_v27 }
  0xfb   :  { %v563_v35 = vadd.f32 %v990_v43, %v545_v30 }
  0xfd   :  { %v577_v38 = vmax.f32 %v563_v35, 0.0 }
  0xfe   :  { %v388_v31 = vpop.f32.mrf.mxu2  ;;  %v502_v32 = vpop.f32.mrf.mxu3 }
  0xff   :  { %v532_v34 = vmax.f32 %v388_v31, %v502_v32 }
 0x101   :  { %v546_v36 = vmax.f32 %v518_v33, %v532_v34 }
 0x103   :  { %v564_v37 = vadd.f32 %v990_v43, %v546_v36 }
 0x105   :  { %v578_v39 = vmax.f32 %v564_v37, 0.0 }
 0x107   :  { %v822_v40 = vpack.c.bf16 %v578_v39, %v577_v38 }
 0x109   :  { %829 = vst [vmem:[%s1033_s6 + $0x30] sm:$0xff] %v822_v40  }

// kernel: tile.18
= control target key start
LH: loop header
LB: loop body
LE: loop exit
PB: predicated region body
PF: predicated region fallthrough
CT: control target
= control target key end

     0   :  { %s22_s0 = inlined_call_operand.vmem [shape: f32[64], index: 0, kind: input, shape index: {}]   ;;  %s23_s1 = inlined_call_operand.vmem [shape: f32[2,64], index: 1, kind: output, shape index: {}]  }
   0x1   :  { %v4_v0 = vld [vmem:[%s22_s0] ss:$0 sm:$0xff] }
   0x2   :  { %5 = vst [vmem:[%s23_s1] sm:$0x3] %v4_v0 }

// kernel: tile.19
= control target key start
LH: loop header
LB: loop body
LE: loop exit
PB: predicated region body
PF: predicated region fallthrough
CT: control target
= control target key end

     0   :  { %vm7_vm0 = vcmask 523264   ;;  %vm13_vm1 = vcmask 1048064   ;;  %s39_s0 = inlined_call_operand.vmem [shape: f32[2,64], index: 0, kind: input, shape index: {}]   ;;  %s40_s1 = inlined_call_operand.vmem [shape: f32[1,128], index: 1, kind: output, shape index: {}]  }
   0x1   :  { %v4_v0 = vld [vmem:[%s39_s0] sm:$0x3]  ;;  %s22_s0 = smov 64  }
   0x2   :  { %5 = vst [vmem:[#allocation1] sm:$0x3] %v4_v0 }
   0x9   :  { %v10_v1 = vld [vmem:[#allocation1 + $0x1] sm:$0x1]   ;;  %v6_v2 = vld [vmem:[#allocation1] sm:$0x1]  }
   0xa   :  { %11 = vrot.lane.b32.xlu0 %v10_v1, %s22_s0  ;;  %8 = vst.msk [vmem:[#allocation0] sm:$0x1] %vm7_vm0, %v6_v2  }
  0x7c   :  { %v12_v3 = vpop.permute.xlu0 %11  }
  0x7d   :  { %14 = vst.msk [vmem:[#allocation0] sm:$0x1] %vm13_vm1, %v12_v3  }
  0x84   :  { %v17_v4 = vld [vmem:[#allocation0] sm:$0x1] }
  0x85   :  { %20 = vst [vmem:[%s40_s1] sm:$0x1] %v17_v4 }

// kernel: digit_classifier_forward.4
= control target key start
LH: loop header
LB: loop body
LE: loop exit
PB: predicated region body
PF: predicated region fallthrough
CT: control target
= control target key end

     0   :  { %vm436_vm0 = vcmask 523264   ;;  %s3175_s4 = inlined_call_operand.vmem [shape: bf16[576,128], index: 4, kind: input, shape index: {}]   ;;  %s3176_s0 = inlined_call_operand.vmem [shape: bf16[64,576], index: 0, kind: input, shape index: {}]   ;;  %s3177_s1 = inlined_call_operand.vmem [shape: bf16[64,576], index: 1, kind: input, shape index: {}]   ;;  %s3178_s2 = inlined_call_operand.vmem [shape: bf16[64,576], index: 2, kind: input, shape index: {}]   ;;  %s3179_s3 = inlined_call_operand.vmem [shape: bf16[64,576], index: 3, kind: input, shape index: {}]   ;;  %s3180_s5 = inlined_call_operand.vmem [shape: f32[1,128], index: 5, kind: input, shape index: {}]   ;;  %s3181_s6 = inlined_call_operand.vmem [shape: bf16[64,128], index: 6, kind: output, shape index: {}]  }
   0x1   :  { %v2159_v0 = vld [vmem:[%s3175_s4 + $0x38] sm:$0xff]  ;;  %v2181_v4 = vld [vmem:[%s3175_s4 + $0x30] sm:$0xff]  ;;  %v2205_v8 = vld [vmem:[%s3175_s4 + $0x28] sm:$0xff] }
   0x2   :  { %v2164_v1 = vld [vmem:[%s3175_s4 + $0x78] sm:$0xff]  ;;  %449 = vmatpush.bf16.msra.mxu0 %v2159_v0  ;;  %v2186_v5 = vld [vmem:[%s3175_s4 + $0x70] sm:$0xff]  ;;  %v2210_v9 = vld [vmem:[%s3175_s4 + $0x68] sm:$0xff] }
   0x3   :  { %v2169_v2 = vld [vmem:[%s3175_s4 + $0xb8] sm:$0xff]  ;;  %478 = vmatpush.bf16.msra.mxu1 %v2164_v1  ;;  %v2193_v6 = vld [vmem:[%s3175_s4 + $0xb0] sm:$0xff]  ;;  %v2217_v10 = vld [vmem:[%s3175_s4 + $0xa8] sm:$0xff] }
   0x4   :  { %v2174_v3 = vld [vmem:[%s3175_s4 + $0xf8] sm:$0xff]  ;;  %507 = vmatpush.bf16.msra.mxu2 %v2169_v2  ;;  %v2198_v7 = vld [vmem:[%s3175_s4 + $0xf0] sm:$0xff]  ;;  %v2222_v11 = vld [vmem:[%s3175_s4 + $0xe8] sm:$0xff] }
   0x5   :  { %536 = vmatpush.bf16.msra.mxu3 %v2174_v3  ;;  %v2229_v12 = vld [vmem:[%s3175_s4 + $0x20] sm:$0xff]  ;;  %v2253_v16 = vld [vmem:[%s3175_s4 + $0x18] sm:$0xff]  ;;  %v2277_v20 = vld [vmem:[%s3175_s4 + $0x10] sm:$0xff] }
   0x6   :  { %450 = vmatpush.bf16.msra.mxu0 %v2181_v4  ;;  %v2234_v13 = vld [vmem:[%s3175_s4 + $0x60] sm:$0xff]  ;;  %v2258_v17 = vld [vmem:[%s3175_s4 + $0x58] sm:$0xff]  ;;  %v2282_v21 = vld [vmem:[%s3175_s4 + $0x50] sm:$0xff] }
   0x7   :  { %479 = vmatpush.bf16.msra.mxu1 %v2186_v5  ;;  %v2241_v14 = vld [vmem:[%s3175_s4 + $0xa0] sm:$0xff]  ;;  %v2265_v18 = vld [vmem:[%s3175_s4 + $0x98] sm:$0xff]  ;;  %v2289_v22 = vld [vmem:[%s3175_s4 + $0x90] sm:$0xff] }
   0x8   :  { %508 = vmatpush.bf16.msra.mxu2 %v2193_v6  ;;  %v2246_v15 = vld [vmem:[%s3175_s4 + $0xe0] sm:$0xff]  ;;  %v2270_v19 = vld [vmem:[%s3175_s4 + $0xd8] sm:$0xff]  ;;  %v2294_v23 = vld [vmem:[%s3175_s4 + $0xd0] sm:$0xff] }
   0x9   :  { %537 = vmatpush.bf16.msra.mxu3 %v2198_v7  ;;  %v2301_v24 = vld [vmem:[%s3175_s4 + $0x8] sm:$0xff]  ;;  %v2323_v28 = vld [vmem:[%s3175_s4] sm:$0xff]  ;;  %v2019_v33 = vld [vmem:[%s3176_s0 + $0x10] sm:$0xf0] }
   0xa   :  { %451 = vmatpush.bf16.msra.mxu0 %v2205_v8  ;;  %v2306_v25 = vld [vmem:[%s3175_s4 + $0x48] sm:$0xff]  ;;  %v2328_v29 = vld [vmem:[%s3175_s4 + $0x40] sm:$0xff]  ;;  %v1505_v35 = vld [vmem:[%s3176_s0 + $0x14] sm:$0xf0] }
   0xb   :  { %480 = vmatpush.bf16.msra.mxu1 %v2210_v9  ;;  %v2313_v26 = vld [vmem:[%s3175_s4 + $0x88] sm:$0xff]  ;;  %v2333_v30 = vld [vmem:[%s3175_s4 + $0x80] sm:$0xff]  ;;  %v2020_v37 = vld [vmem:[%s3176_s0 + $0x18] sm:$0xf0] }
   0xc   :  { %509 = vmatpush.bf16.msra.mxu2 %v2217_v10  ;;  %v2318_v27 = vld [vmem:[%s3175_s4 + $0xc8] sm:$0xff]  ;;  %v2338_v31 = vld [vmem:[%s3175_s4 + $0xc0] sm:$0xff]  ;;  %v2371_v40 = vld [vmem:[%s3175_s4 + $0x118] sm:$0xff] }
   0xd   :  { %538 = vmatpush.bf16.msra.mxu3 %v2222_v11  ;;  %v1503_v32 = vld [vmem:[%s3176_s0] sm:$0xf]  ;;  %v2017_v34 = vld [vmem:[%s3176_s0 + $0x4] sm:$0xf]  ;;  %v1511_v36 = vld [vmem:[%s3176_s0 + $0x8] sm:$0xf] }
   0xe   :  { %452 = vmatpush.bf16.msra.mxu0 %v2229_v12  ;;  %v2018_v38 = vld [vmem:[%s3176_s0 + $0xc] sm:$0xf]  ;;  %v1513_v39 = vld [vmem:[%s3176_s0 + $0x1c] sm:$0xf0]  ;;  %v1504_v41 = vor.u32 %v2019_v33, %v1503_v32  ;;  %v1508_v42 = vor.u32 %v2017_v34, %v1505_v35  ;;  %v1512_v43 = vor.u32 %v2020_v37, %v1511_v36  ;;  %v2382_v45 = vld [vmem:[%s3175_s4 + $0x110] sm:$0xff] }
   0xf   :  { %481 = vmatpush.bf16.msra.mxu1 %v2234_v13  ;;  %v1516_v44 = vor.u32 %v2018_v38, %v1513_v39  ;;  %v2391_v46 = vld [vmem:[%s3175_s4 + $0x108] sm:$0xff]  ;;  %v2024_v48 = vld [vmem:[%s3176_s0 + $0x38] sm:$0xf0]  ;;  %v1525_v50 = vld [vmem:[%s3176_s0 + $0x3c] sm:$0xf0] }
  0x10   :  { %510 = vmatpush.bf16.msra.mxu2 %v2241_v14  ;;  %v1523_v47 = vld [vmem:[%s3176_s0 + $0x28] sm:$0xf]  ;;  %v2022_v49 = vld [vmem:[%s3176_s0 + $0x2c] sm:$0xf]  ;;  %v1531_v51 = vld [vmem:[%s3176_s0 + $0x30] sm:$0xf] }
  0x11   :  { %539 = vmatpush.bf16.msra.mxu3 %v2246_v15  ;;  %v2025_v52 = vld [vmem:[%s3176_s0 + $0x40] sm:$0xf0]  ;;  %v2023_v53 = vld [vmem:[%s3176_s0 + $0x34] sm:$0xf]  ;;  %v1533_v54 = vld [vmem:[%s3176_s0 + $0x44] sm:$0xf0]  ;;  %v1524_v55 = vor.u32 %v2024_v48, %v1523_v47  ;;  %v1528_v56 = vor.u32 %v2022_v49, %v1525_v50 }
  0x12   :  { %453 = vmatpush.bf16.msra.mxu0 %v2253_v16  ;;  %v1532_v57 = vor.u32 %v2025_v52, %v1531_v51  ;;  %v1536_v58 = vor.u32 %v2023_v53, %v1533_v54  ;;  %v2430_v59 = vld [vmem:[%s3175_s4 + $0x100] sm:$0xff]  ;;  %v1543_v60 = vld [vmem:[%s3176_s0 + $0x50] sm:$0xf]  ;;  %v2027_v62 = vld [vmem:[%s3176_s0 + $0x54] sm:$0xf] }
  0x13   :  { %482 = vmatpush.bf16.msra.mxu1 %v2258_v17  ;;  %v2029_v61 = vld [vmem:[%s3176_s0 + $0x60] sm:$0xf0]  ;;  %v1545_v63 = vld [vmem:[%s3176_s0 + $0x64] sm:$0xf0]  ;;  %v1551_v32 = vld [vmem:[%s3176_s0 + $0x58] sm:$0xf] }
  0x14   :  { %511 = vmatpush.bf16.msra.mxu2 %v2265_v18  ;;  %v2030_v33 = vld [vmem:[%s3176_s0 + $0x68] sm:$0xf0]  ;;  %v2028_v34 = vld [vmem:[%s3176_s0 + $0x5c] sm:$0xf]  ;;  %v1553_v35 = vld [vmem:[%s3176_s0 + $0x6c] sm:$0xf0]  ;;  %v1544_v36 = vor.u32 %v2029_v61, %v1543_v60  ;;  %v1548_v37 = vor.u32 %v2027_v62, %v1545_v63 }
  0x15   :  { %540 = vmatpush.bf16.msra.mxu3 %v2270_v19  ;;  %v1552_v38 = vor.u32 %v2030_v33, %v1551_v32  ;;  %v1556_v39 = vor.u32 %v2028_v34, %v1553_v35  ;;  %v1571_v47 = vld [vmem:[%s3176_s0 + $0x80] sm:$0xf]  ;;  %v2035_v48 = vld [vmem:[%s3176_s0 + $0x90] sm:$0xf0]  ;;  %v2033_v49 = vld [vmem:[%s3176_s0 + $0x84] sm:$0xf] }
  0x16   :  { %454 = vmatpush.bf16.msra.mxu0 %v2277_v20  ;;  %v1573_v50 = vld [vmem:[%s3176_s0 + $0x94] sm:$0xf0]  ;;  %v1572_v53 = vor.u32 %v2035_v48, %v1571_v47  ;;  %v2037_v60 = vld [vmem:[%s3177_s1 + $0x4] sm:$0xf]  ;;  %v1739_v62 = vld [vmem:[%s3177_s1 + $0x8] sm:$0xf] }
  0x17   :  { %483 = vmatpush.bf16.msra.mxu1 %v2282_v21  ;;  %v1576_v54 = vor.u32 %v2033_v49, %v1573_v50  ;;  %v1733_v61 = vld [vmem:[%s3177_s1 + $0x14] sm:$0xf0]  ;;  %v2040_v63 = vld [vmem:[%s3177_s1 + $0x18] sm:$0xf0]  ;;  %v2049_v49 = vld [vmem:[%s3177_s1 + $0x60] sm:$0xf0] }
  0x18   :  { %512 = vmatpush.bf16.msra.mxu2 %v2289_v22  ;;  %v1736_v34 = vor.u32 %v2037_v60, %v1733_v61  ;;  %v1740_v35 = vor.u32 %v2040_v63, %v1739_v62  ;;  %v1773_v50 = vld [vmem:[%s3177_s1 + $0x64] sm:$0xf0]  ;;  %v2052_v60 = vld [vmem:[%s3177_s1 + $0x7c] sm:$0xf]  ;;  %v1793_v61 = vld [vmem:[%s3177_s1 + $0x8c] sm:$0xf0] }
  0x19   :  { %541 = vmatpush.bf16.msra.mxu3 %v2294_v23  ;;  %v1799_v62 = vld [vmem:[%s3177_s1 + $0x80] sm:$0xf]  ;;  %v2055_v63 = vld [vmem:[%s3177_s1 + $0x90] sm:$0xf0] }
  0x1a   :  { %455 = vmatpush.bf16.msra.mxu0 %v2301_v24 }
  0x1b   :  { %484 = vmatpush.bf16.msra.mxu1 %v2306_v25 }
  0x1c   :  { %513 = vmatpush.bf16.msra.mxu2 %v2313_v26 }
  0x1d   :  { %542 = vmatpush.bf16.msra.mxu3 %v2318_v27 }
  0x1e   :  { %456 = vmatpush.bf16.msra.mxu0 %v2323_v28 }
  0x1f   :  { %485 = vmatpush.bf16.msra.mxu1 %v2328_v29 }
  0x20   :  { %514 = vmatpush.bf16.msra.mxu2 %v2333_v30 }
  0x21   :  { %543 = vmatpush.bf16.msra.mxu3 %v2338_v31  ;;  %457 = vmatmul.bf16.vlgmr.msra.gmra.mxu0 %v1504_v41  ;;  %v1563_v41 = vld [vmem:[%s3176_s0 + $0x78] sm:$0xf] }
  0x22   :  { %569 = vmatpush.bf16.msrb.mxu0 %v2371_v40  ;;  %486 = vmatmul.bf16.vlgmr.msra.gmra.mxu1 %v1508_v42  ;;  %v2034_v42 = vld [vmem:[%s3176_s0 + $0x88] sm:$0xf0] }
  0x23   :  { %515 = vmatmul.bf16.vlgmr.msra.gmra.mxu2 %v1512_v43  ;;  %730 = vmatpush.bf16.msrb.mxu1 %v2159_v0  ;;  %v2032_v43 = vld [vmem:[%s3176_s0 + $0x7c] sm:$0xf]  ;;  %v1564_v51 = vor.u32 %v2034_v42, %v1563_v41  ;;  %v1759_v41 = vld [vmem:[%s3177_s1 + $0x30] sm:$0xf]  ;;  %v2045_v42 = vld [vmem:[%s3177_s1 + $0x40] sm:$0xf0] }
  0x24   :  { %759 = vmatpush.bf16.msrb.mxu2 %v2164_v1  ;;  %544 = vmatmul.bf16.vlgmr.msra.gmra.mxu3 %v1516_v44  ;;  %v1565_v44 = vld [vmem:[%s3176_s0 + $0x8c] sm:$0xf0]  ;;  %v1760_v48 = vor.u32 %v2045_v42, %v1759_v41  ;;  %v2057_v41 = vld [vmem:[%s3178_s2 + $0x4] sm:$0xf]  ;;  %v1817_v42 = vld [vmem:[%s3178_s2 + $0x14] sm:$0xf0] }
  0x25   :  { %788 = vmatpush.bf16.msrb.mxu3 %v2169_v2  ;;  %v1568_v52 = vor.u32 %v2032_v43, %v1565_v44 }
  0x26   :  { %570 = vmatpush.bf16.msrb.mxu0 %v2382_v45 }
  0x27   :  { %731 = vmatpush.bf16.msrb.mxu1 %v2181_v4 }
  0x28   :  { %760 = vmatpush.bf16.msrb.mxu2 %v2186_v5 }
  0x29   :  { %789 = vmatpush.bf16.msrb.mxu3 %v2193_v6 }
  0x2a   :  { %571 = vmatpush.bf16.msrb.mxu0 %v2391_v46 }
  0x2b   :  { %732 = vmatpush.bf16.msrb.mxu1 %v2205_v8 }
  0x2c   :  { %761 = vmatpush.bf16.msrb.mxu2 %v2210_v9 }
  0x2d   :  { %790 = vmatpush.bf16.msrb.mxu3 %v2217_v10 }
  0x2e   :  { %572 = vmatpush.bf16.msrb.mxu0 %v2430_v59 }
  0x2f   :  { %733 = vmatpush.bf16.msrb.mxu1 %v2229_v12 }
  0x30   :  { %762 = vmatpush.bf16.msrb.mxu2 %v2234_v13 }
  0x31   :  { %791 = vmatpush.bf16.msrb.mxu3 %v2241_v14  ;;  %462 = vmatmul.bf16.gmra.mxu0 %v1524_v55  ;;  %v1519_v55 = vld [vmem:[%s3176_s0 + $0x10] sm:$0xf] }
  0x32   :  { %491 = vmatmul.bf16.gmra.mxu1 %v1528_v56  ;;  %817 = vmatpush.bf16.msra.mxu0 %v2174_v3  ;;  %v2021_v56 = vld [vmem:[%s3176_s0 + $0x20] sm:$0xf0] }
  0x33   :  { %520 = vmatmul.bf16.gmra.mxu2 %v1532_v57  ;;  %734 = vmatpush.bf16.msrb.mxu1 %v2253_v16  ;;  %v1731_v57 = vld [vmem:[%s3177_s1] sm:$0xf]  ;;  %v1520_v32 = vor.u32 %v2021_v56, %v1519_v55 }
  0x34   :  { %763 = vmatpush.bf16.msrb.mxu2 %v2258_v17  ;;  %549 = vmatmul.bf16.gmra.mxu3 %v1536_v58  ;;  %v2039_v58 = vld [vmem:[%s3177_s1 + $0x10] sm:$0xf0] }
  0x35   :  { %792 = vmatpush.bf16.msrb.mxu3 %v2265_v18  ;;  %v1732_v33 = vor.u32 %v2039_v58, %v1731_v57  ;;  %v2036_v57 = vld [vmem:[%s3176_s0 + $0x98] sm:$0xf0]  ;;  %v1791_v58 = vld [vmem:[%s3177_s1 + $0x78] sm:$0xf] }
  0x36   :  { %818 = vmatpush.bf16.msra.mxu0 %v2198_v7 }
  0x37   :  { %735 = vmatpush.bf16.msrb.mxu1 %v2277_v20 }
  0x38   :  { %764 = vmatpush.bf16.msrb.mxu2 %v2282_v21 }
  0x39   :  { %793 = vmatpush.bf16.msrb.mxu3 %v2289_v22 }
  0x3a   :  { %819 = vmatpush.bf16.msra.mxu0 %v2222_v11 }
  0x3b   :  { %736 = vmatpush.bf16.msrb.mxu1 %v2301_v24 }
  0x3c   :  { %765 = vmatpush.bf16.msrb.mxu2 %v2306_v25 }
  0x3d   :  { %794 = vmatpush.bf16.msrb.mxu3 %v2313_v26 }
  0x3e   :  { %820 = vmatpush.bf16.msra.mxu0 %v2246_v15 }
  0x3f   :  { %737 = vmatpush.bf16.msrb.mxu1 %v2323_v28 }
  0x40   :  { %766 = vmatpush.bf16.msrb.mxu2 %v2328_v29 }
  0x41   :  { %795 = vmatpush.bf16.msrb.mxu3 %v2333_v30  ;;  %467 = vmatmul.bf16.gmra.mxu0 %v1544_v36  ;;  %v1539_v36 = vld [vmem:[%s3176_s0 + $0x38] sm:$0xf] }
  0x42   :  { %496 = vmatmul.bf16.gmra.mxu1 %v1548_v37  ;;  %821 = vmatpush.bf16.msra.mxu0 %v2270_v19  ;;  %v2026_v37 = vld [vmem:[%s3176_s0 + $0x48] sm:$0xf0] }
  0x43   :  { %850 = vmatpush.bf16.msra.mxu1 %v2371_v40  ;;  %525 = vmatmul.bf16.gmra.mxu2 %v1552_v38  ;;  %v2044_v38 = vld [vmem:[%s3177_s1 + $0x38] sm:$0xf0]  ;;  %v1540_v43 = vor.u32 %v2026_v37, %v1539_v36  ;;  %v2038_v36 = vld [vmem:[%s3177_s1 + $0xc] sm:$0xf]  ;;  %v1741_v37 = vld [vmem:[%s3177_s1 + $0x1c] sm:$0xf0] }
  0x44   :  { %1011 = vmatpush.bf16.msra.mxu2 %v2159_v0  ;;  %554 = vmatmul.bf16.gmra.mxu3 %v1556_v39  ;;  %v1753_v39 = vld [vmem:[%s3177_s1 + $0x3c] sm:$0xf0] }
  0x45   :  { %1040 = vmatpush.bf16.msra.mxu3 %v2164_v1 }
  0x46   :  { %822 = vmatpush.bf16.msra.mxu0 %v2294_v23 }
  0x47   :  { %851 = vmatpush.bf16.msra.mxu1 %v2382_v45 }
  0x48   :  { %1012 = vmatpush.bf16.msra.mxu2 %v2181_v4 }
  0x49   :  { %1041 = vmatpush.bf16.msra.mxu3 %v2186_v5 }
  0x4a   :  { %823 = vmatpush.bf16.msra.mxu0 %v2318_v27 }
  0x4b   :  { %852 = vmatpush.bf16.msra.mxu1 %v2391_v46 }
  0x4c   :  { %1013 = vmatpush.bf16.msra.mxu2 %v2205_v8 }
  0x4d   :  { %1042 = vmatpush.bf16.msra.mxu3 %v2210_v9 }
  0x4e   :  { %824 = vmatpush.bf16.msra.mxu0 %v2338_v31 }
  0x4f   :  { %853 = vmatpush.bf16.msra.mxu1 %v2430_v59 }
  0x50   :  { %1014 = vmatpush.bf16.msra.mxu2 %v2229_v12 }
  0x51   :  { %1043 = vmatpush.bf16.msra.mxu3 %v2234_v13  ;;  %472 = vmatmul.bf16.gmra.mxu0 %v1564_v51  ;;  %v1779_v51 = vld [vmem:[%s3177_s1 + $0x58] sm:$0xf] }
  0x52   :  { %501 = vmatmul.bf16.gmra.mxu1 %v1568_v52  ;;  %v2050_v52 = vld [vmem:[%s3177_s1 + $0x68] sm:$0xf0] }
  0x53   :  { %530 = vmatmul.bf16.gmra.mxu2 %v1572_v53  ;;  %v1780_v56 = vor.u32 %v2050_v52, %v1779_v51 }
  0x54   :  { %1015 = vmatpush.bf16.msra.mxu2 %v2253_v16  ;;  %559 = vmatmul.bf16.gmra.mxu3 %v1576_v54 }
  0x55   :  { %1044 = vmatpush.bf16.msra.mxu3 %v2258_v17 }
  0x58   :  { %1016 = vmatpush.bf16.msra.mxu2 %v2277_v20 }
  0x59   :  { %1045 = vmatpush.bf16.msra.mxu3 %v2282_v21 }
  0x5c   :  { %1017 = vmatpush.bf16.msra.mxu2 %v2301_v24 }
  0x5d   :  { %1046 = vmatpush.bf16.msra.mxu3 %v2306_v25 }
  0x60   :  { %1018 = vmatpush.bf16.msra.mxu2 %v2323_v28 }
  0x61   :  { %1047 = vmatpush.bf16.msra.mxu3 %v2328_v29  ;;  %1725 = vmatmul.msk.bf16.vlgmr.msrb.gmra.mxu0 %vm436_vm0, %v1520_v32 }
  0x62   :  { %738 = vmatmul.bf16.vlgmr.msrb.gmra.mxu1 %v1732_v33  ;;  %1069 = vmatpush.bf16.msrb.mxu0 %v2169_v2 }
  0x63   :  { %767 = vmatmul.bf16.vlgmr.msrb.gmra.mxu2 %v1736_v34  ;;  %1098 = vmatpush.bf16.msrb.mxu1 %v2174_v3  ;;  %v1796_v34 = vor.u32 %v2052_v60, %v1793_v61 }
  0x64   :  { %796 = vmatmul.bf16.vlgmr.msrb.gmra.mxu3 %v1740_v35  ;;  %1131 = vmatpush.bf16.msrb.mxu2 %v2371_v40  ;;  %v1800_v35 = vor.u32 %v2055_v63, %v1799_v62 }
  0x65   :  { %1292 = vmatpush.bf16.msrb.mxu3 %v2159_v0  ;;  %v1751_v0 = vld [vmem:[%s3177_s1 + $0x28] sm:$0xf] }
  0x66   :  { %1070 = vmatpush.bf16.msrb.mxu0 %v2193_v6  ;;  %v1752_v44 = vor.u32 %v2044_v38, %v1751_v0  ;;  %v1747_v0 = vld [vmem:[%s3177_s1 + $0x10] sm:$0xf]  ;;  %v2041_v38 = vld [vmem:[%s3177_s1 + $0x20] sm:$0xf0] }
  0x67   :  { %1099 = vmatpush.bf16.msrb.mxu1 %v2198_v7 }
  0x68   :  { %1132 = vmatpush.bf16.msrb.mxu2 %v2382_v45 }
  0x69   :  { %1293 = vmatpush.bf16.msrb.mxu3 %v2181_v4  ;;  %v2042_v4 = vld [vmem:[%s3177_s1 + $0x2c] sm:$0xf] }
  0x6a   :  { %1071 = vmatpush.bf16.msrb.mxu0 %v2217_v10  ;;  %v1756_v47 = vor.u32 %v2042_v4, %v1753_v39  ;;  %v1815_v4 = vld [vmem:[%s3178_s2] sm:$0xf]  ;;  %v2059_v39 = vld [vmem:[%s3178_s2 + $0x10] sm:$0xf0] }
  0x6b   :  { %1100 = vmatpush.bf16.msrb.mxu1 %v2222_v11 }
  0x6c   :  { %1133 = vmatpush.bf16.msrb.mxu2 %v2391_v46 }
  0x6d   :  { %1294 = vmatpush.bf16.msrb.mxu3 %v2205_v8  ;;  %v1559_v8 = vld [vmem:[%s3176_s0 + $0x60] sm:$0xf] }
  0x6e   :  { %1072 = vmatpush.bf16.msrb.mxu0 %v2241_v14 }
  0x6f   :  { %1101 = vmatpush.bf16.msrb.mxu1 %v2246_v15 }
  0x70   :  { %1134 = vmatpush.bf16.msrb.mxu2 %v2430_v59 }
  0x71   :  { %1295 = vmatpush.bf16.msrb.mxu3 %v2229_v12  ;;  %1726 = vmatmul.msk.bf16.gmra.mxu0 %vm436_vm0, %v1540_v43  ;;  %v2031_v12 = vld [vmem:[%s3176_s0 + $0x70] sm:$0xf0]  ;;  %v1744_v43 = vor.u32 %v2038_v36, %v1741_v37 }
  0x72   :  { %743 = vmatmul.bf16.gmra.mxu1 %v1752_v44  ;;  %1073 = vmatpush.bf16.msrb.mxu0 %v2265_v18  ;;  %v1560_v53 = vor.u32 %v2031_v12, %v1559_v8  ;;  %v1748_v44 = vor.u32 %v2041_v38, %v1747_v0  ;;  %v1816_v8 = vor.u32 %v2059_v39, %v1815_v4 }
  0x73   :  { %772 = vmatmul.bf16.gmra.mxu2 %v1756_v47  ;;  %1102 = vmatpush.bf16.msrb.mxu1 %v2270_v19  ;;  %v1820_v12 = vor.u32 %v2057_v41, %v1817_v42 }
  0x74   :  { %801 = vmatmul.bf16.gmra.mxu3 %v1760_v48 }
  0x75   :  { %1296 = vmatpush.bf16.msrb.mxu3 %v2253_v16  ;;  %v1771_v16 = vld [vmem:[%s3177_s1 + $0x50] sm:$0xf] }
  0x76   :  { %1074 = vmatpush.bf16.msrb.mxu0 %v2289_v22  ;;  %v1772_v54 = vor.u32 %v2049_v49, %v1771_v16 }
  0x77   :  { %1103 = vmatpush.bf16.msrb.mxu1 %v2294_v23 }
  0x79   :  { %1297 = vmatpush.bf16.msrb.mxu3 %v2277_v20  ;;  %v2047_v20 = vld [vmem:[%s3177_s1 + $0x54] sm:$0xf] }
  0x7a   :  { %1075 = vmatpush.bf16.msrb.mxu0 %v2313_v26  ;;  %v1776_v55 = vor.u32 %v2047_v20, %v1773_v50 }
  0x7b   :  { %1104 = vmatpush.bf16.msrb.mxu1 %v2318_v27 }
  0x7d   :  { %1298 = vmatpush.bf16.msrb.mxu3 %v2301_v24  ;;  %v1579_v24 = vld [vmem:[%s3176_s0 + $0x88] sm:$0xf] }
  0x7e   :  { %1076 = vmatpush.bf16.msrb.mxu0 %v2333_v30  ;;  %v1580_v32 = vor.u32 %v2036_v57, %v1579_v24 }
  0x7f   :  { %1105 = vmatpush.bf16.msrb.mxu1 %v2338_v31 }
  0x81   :  { %1299 = vmatpush.bf16.msrb.mxu3 %v2323_v28  ;;  %1727 = vmatmul.msk.bf16.gmra.mxu0 %vm436_vm0, %v1560_v53  ;;  %v2054_v28 = vld [vmem:[%s3177_s1 + $0x88] sm:$0xf0] }
  0x82   :  { %748 = vmatmul.bf16.gmra.mxu1 %v1772_v54  ;;  %v1792_v33 = vor.u32 %v2054_v28, %v1791_v58 }
  0x83   :  { %777 = vmatmul.bf16.gmra.mxu2 %v1776_v55 }
  0x84   :  { %806 = vmatmul.bf16.gmra.mxu3 %v1780_v56 }
  0x91   :  { %1728 = vmatmul.msk.bf16.gmra.mxu0 %vm436_vm0, %v1580_v32 }
  0x92   :  { %753 = vmatmul.bf16.gmra.mxu1 %v1792_v33  ;;  %v1857_v33 = vld [vmem:[%s3178_s2 + $0x64] sm:$0xf0] }
  0x93   :  { %782 = vmatmul.bf16.gmra.mxu2 %v1796_v34 }
  0x94   :  { %811 = vmatmul.bf16.gmra.mxu3 %v1800_v35 }
  0x9e   :  { %v458_v47 = vpop.f32.mrf.mxu0 }
  0x9f   :  { %v487_v48 = vpop.f32.mrf.mxu1 }
  0xa0   :  { %v488_v16 = vadd.f32 %v487_v48, %v458_v47 }
  0xa1   :  { %825 = vmatmul.bf16.vlgmr.msra.gmra.mxu0 %v1744_v43 }
  0xa2   :  { %1809 = vmatmul.msk.bf16.vlgmr.msra.gmra.mxu1 %vm436_vm0, %v1748_v44  ;;  %1321 = vmatpush.bf16.msra.mxu0 %v2164_v1  ;;  %v2043_v1 = vld [vmem:[%s3177_s1 + $0x34] sm:$0xf] }
  0xa3   :  { %1019 = vmatmul.bf16.vlgmr.msra.gmra.mxu2 %v1816_v8  ;;  %1350 = vmatpush.bf16.msra.mxu1 %v2169_v2  ;;  %v1761_v2 = vld [vmem:[%s3177_s1 + $0x44] sm:$0xf0] }
  0xa4   :  { %1048 = vmatmul.bf16.vlgmr.msra.gmra.mxu3 %v1820_v12  ;;  %1379 = vmatpush.bf16.msra.mxu2 %v2174_v3  ;;  %v1767_v3 = vld [vmem:[%s3177_s1 + $0x38] sm:$0xf]  ;;  %v1764_v24 = vor.u32 %v2043_v1, %v1761_v2  ;;  %v2056_v12 = vld [vmem:[%s3177_s1 + $0x98] sm:$0xf0] }
  0xa5   :  { %1412 = vmatpush.bf16.msra.mxu3 %v2371_v40  ;;  %v2062_v40 = vld [vmem:[%s3178_s2 + $0x2c] sm:$0xf] }
  0xa6   :  { %v516_v49 = vpop.f32.mrf.mxu2  ;;  %v460_v51 = vpop.f32.mrf.mxu0  ;;  %1322 = vmatpush.bf16.msra.mxu0 %v2186_v5  ;;  %v2046_v5 = vld [vmem:[%s3177_s1 + $0x48] sm:$0xf0] }
  0xa7   :  { %v545_v20 = vpop.f32.mrf.mxu3  ;;  %v517_v50 = vadd.f32 %v516_v49, %v488_v16  ;;  %v489_v52 = vpop.f32.mrf.mxu1  ;;  %1351 = vmatpush.bf16.msra.mxu1 %v2193_v6  ;;  %v1835_v6 = vld [vmem:[%s3178_s2 + $0x28] sm:$0xf]  ;;  %v1768_v57 = vor.u32 %v2046_v5, %v1767_v3  ;;  %v1875_v16 = vld [vmem:[%s3178_s2 + $0x78] sm:$0xf]  ;;  %v2074_v49 = vld [vmem:[%s3178_s2 + $0x88] sm:$0xf0] }
  0xa8   :  { %v490_v53 = vadd.f32 %v489_v52, %v460_v51  ;;  %1380 = vmatpush.bf16.msra.mxu2 %v2198_v7  ;;  %v2064_v7 = vld [vmem:[%s3178_s2 + $0x38] sm:$0xf0] }
  0xa9   :  { %v2679_v54 = vadd.f32 %v545_v20, %v517_v50  ;;  %1413 = vmatpush.bf16.msra.mxu3 %v2382_v45  ;;  %v1837_v45 = vld [vmem:[%s3178_s2 + $0x3c] sm:$0xf0]  ;;  %v1836_v61 = vor.u32 %v2064_v7, %v1835_v6  ;;  %v2072_v20 = vld [vmem:[%s3178_s2 + $0x7c] sm:$0xf]  ;;  %v1877_v50 = vld [vmem:[%s3178_s2 + $0x8c] sm:$0xf0]  ;;  %v1876_v6 = vor.u32 %v2074_v49, %v1875_v16 }
  0xaa   :  { %1323 = vmatpush.bf16.msra.mxu0 %v2210_v9  ;;  %v1840_v62 = vor.u32 %v2062_v40, %v1837_v45  ;;  %v1880_v7 = vor.u32 %v2072_v20, %v1877_v50 }
  0xab   :  { %1352 = vmatpush.bf16.msra.mxu1 %v2217_v10 }
  0xac   :  { %1381 = vmatpush.bf16.msra.mxu2 %v2222_v11 }
  0xad   :  { %1414 = vmatpush.bf16.msra.mxu3 %v2391_v46 }
  0xae   :  { %v518_v55 = vpop.f32.mrf.mxu2  ;;  %v463_v28 = vpop.f32.mrf.mxu0  ;;  %1324 = vmatpush.bf16.msra.mxu0 %v2234_v13 }
  0xaf   :  { %v547_v56 = vpop.f32.mrf.mxu3  ;;  %v519_v58 = vadd.f32 %v518_v55, %v490_v53  ;;  %v492_v60 = vpop.f32.mrf.mxu1  ;;  %1353 = vmatpush.bf16.msra.mxu1 %v2241_v14 }
  0xb0   :  { %v493_v63 = vadd.f32 %v492_v60, %v463_v28  ;;  %1382 = vmatpush.bf16.msra.mxu2 %v2246_v15 }
  0xb1   :  { %v2713_v11 = vadd.f32 %v547_v56, %v519_v58  ;;  %1415 = vmatpush.bf16.msra.mxu3 %v2430_v59  ;;  %830 = vmatmul.bf16.gmra.mxu0 %v1764_v24  ;;  %v2067_v59 = vld [vmem:[%s3178_s2 + $0x54] sm:$0xf] }
  0xb2   :  { %1810 = vmatmul.msk.bf16.gmra.mxu1 %vm436_vm0, %v1768_v57  ;;  %1325 = vmatpush.bf16.msra.mxu0 %v2258_v17  ;;  %v2048_v17 = vld [vmem:[%s3177_s1 + $0x5c] sm:$0xf]  ;;  %v1860_v41 = vor.u32 %v2067_v59, %v1857_v33 }
  0xb3   :  { %1024 = vmatmul.bf16.gmra.mxu2 %v1836_v61  ;;  %1354 = vmatpush.bf16.msra.mxu1 %v2265_v18  ;;  %v1781_v18 = vld [vmem:[%s3177_s1 + $0x6c] sm:$0xf0]  ;;  %v1823_v61 = vld [vmem:[%s3178_s2 + $0x8] sm:$0xf] }
  0xb4   :  { %1053 = vmatmul.bf16.gmra.mxu3 %v1840_v62  ;;  %1383 = vmatpush.bf16.msra.mxu2 %v2270_v19  ;;  %v1787_v19 = vld [vmem:[%s3177_s1 + $0x60] sm:$0xf]  ;;  %v1784_v36 = vor.u32 %v2048_v17, %v1781_v18  ;;  %v2060_v62 = vld [vmem:[%s3178_s2 + $0x18] sm:$0xf0] }
  0xb5   :  { %v1824_v18 = vor.u32 %v2060_v62, %v1823_v61 }
  0xb6   :  { %v521_v9 = vpop.f32.mrf.mxu2  ;;  %v465_v15 = vpop.f32.mrf.mxu0  ;;  %1326 = vmatpush.bf16.msra.mxu0 %v2282_v21  ;;  %v2051_v21 = vld [vmem:[%s3177_s1 + $0x70] sm:$0xf0] }
  0xb7   :  { %v550_v10 = vpop.f32.mrf.mxu3  ;;  %v522_v13 = vadd.f32 %v521_v9, %v493_v63  ;;  %v494_v46 = vpop.f32.mrf.mxu1  ;;  %1355 = vmatpush.bf16.msra.mxu1 %v2289_v22  ;;  %v1855_v22 = vld [vmem:[%s3178_s2 + $0x50] sm:$0xf]  ;;  %v1788_v37 = vor.u32 %v2051_v21, %v1787_v19  ;;  %v2058_v63 = vld [vmem:[%s3178_s2 + $0xc] sm:$0xf]  ;;  %v1825_v9 = vld [vmem:[%s3178_s2 + $0x1c] sm:$0xf0] }
  0xb8   :  { %v495_v32 = vadd.f32 %v494_v46, %v465_v15  ;;  %1384 = vmatpush.bf16.msra.mxu2 %v2294_v23  ;;  %v2069_v23 = vld [vmem:[%s3178_s2 + $0x60] sm:$0xf0]  ;;  %v1899_v15 = vld [vmem:[%s3179_s3] sm:$0xf]  ;;  %v2079_v46 = vld [vmem:[%s3179_s3 + $0x10] sm:$0xf0]  ;;  %v1828_v19 = vor.u32 %v2058_v63, %v1825_v9 }
  0xb9   :  { %v2723_v14 = vadd.f32 %v550_v10, %v522_v13  ;;  %v1856_v39 = vor.u32 %v2069_v23, %v1855_v22  ;;  %v1831_v10 = vld [vmem:[%s3178_s2 + $0x10] sm:$0xf]  ;;  %v2061_v13 = vld [vmem:[%s3178_s2 + $0x20] sm:$0xf0]  ;;  %v1900_v33 = vor.u32 %v2079_v46, %v1899_v15 }
  0xba   :  { %1327 = vmatpush.bf16.msra.mxu0 %v2306_v25  ;;  %v1832_v59 = vor.u32 %v2061_v13, %v1831_v10 }
  0xbb   :  { %1356 = vmatpush.bf16.msra.mxu1 %v2313_v26 }
  0xbc   :  { %1385 = vmatpush.bf16.msra.mxu2 %v2318_v27 }
  0xbe   :  { %v523_v34 = vpop.f32.mrf.mxu2  ;;  %v468_v38 = vpop.f32.mrf.mxu0  ;;  %1328 = vmatpush.bf16.msra.mxu0 %v2328_v29  ;;  %v2053_v29 = vld [vmem:[%s3177_s1 + $0x84] sm:$0xf] }
  0xbf   :  { %v552_v35 = vpop.f32.mrf.mxu3  ;;  %v524_v0 = vadd.f32 %v523_v34, %v495_v32  ;;  %v497_v4 = vpop.f32.mrf.mxu1  ;;  %1357 = vmatpush.bf16.msra.mxu1 %v2333_v30  ;;  %v1801_v30 = vld [vmem:[%s3177_s1 + $0x94] sm:$0xf0] }
  0xc0   :  { %v498_v42 = vadd.f32 %v497_v4, %v468_v38  ;;  %1386 = vmatpush.bf16.msra.mxu2 %v2338_v31  ;;  %v1807_v31 = vld [vmem:[%s3177_s1 + $0x88] sm:$0xf]  ;;  %v1804_v53 = vor.u32 %v2053_v29, %v1801_v30 }
  0xc1   :  { %v2755_v43 = vadd.f32 %v552_v35, %v524_v0  ;;  %835 = vmatmul.bf16.gmra.mxu0 %v1784_v36  ;;  %v1808_v1 = vor.u32 %v2056_v12, %v1807_v31 }
  0xc2   :  { %1811 = vmatmul.msk.bf16.gmra.mxu1 %vm436_vm0, %v1788_v37 }
  0xc3   :  { %1029 = vmatmul.bf16.gmra.mxu2 %v1856_v39 }
  0xc4   :  { %1058 = vmatmul.bf16.gmra.mxu3 %v1860_v41 }
  0xc6   :  { %v526_v25 = vpop.f32.mrf.mxu2  ;;  %v470_v44 = vpop.f32.mrf.mxu0 }
  0xc7   :  { %v555_v26 = vpop.f32.mrf.mxu3  ;;  %v527_v27 = vadd.f32 %v526_v25, %v498_v42  ;;  %v499_v47 = vpop.f32.mrf.mxu1  ;;  %v2065_v42 = vld [vmem:[%s3178_s2 + $0x40] sm:$0xf0]  ;;  %v2063_v25 = vld [vmem:[%s3178_s2 + $0x34] sm:$0xf] }
  0xc8   :  { %v500_v48 = vadd.f32 %v499_v47, %v470_v44  ;;  %v1919_v44 = vld [vmem:[%s3179_s3 + $0x28] sm:$0xf]  ;;  %v2084_v47 = vld [vmem:[%s3179_s3 + $0x38] sm:$0xf0] }
  0xc9   :  { %v2759_v8 = vadd.f32 %v555_v26, %v527_v27  ;;  %v1845_v26 = vld [vmem:[%s3178_s2 + $0x44] sm:$0xf0]  ;;  %v2066_v27 = vld [vmem:[%s3178_s2 + $0x48] sm:$0xf0]  ;;  %v1920_v50 = vor.u32 %v2084_v47, %v1919_v44 }
  0xca   :  { %v1848_v31 = vor.u32 %v2063_v25, %v1845_v26 }
  0xce   :  { %v528_v51 = vpop.f32.mrf.mxu2  ;;  %v473_v3 = vpop.f32.mrf.mxu0 }
  0xcf   :  { %v557_v52 = vpop.f32.mrf.mxu3  ;;  %v529_v2 = vadd.f32 %v528_v51, %v500_v48  ;;  %v502_v5 = vpop.f32.mrf.mxu1 }
  0xd0   :  { %v503_v40 = vadd.f32 %v502_v5, %v473_v3 }
  0xd1   :  { %v2785_v45 = vadd.f32 %v557_v52, %v529_v2  ;;  %840 = vmatmul.bf16.gmra.mxu0 %v1804_v53 }
  0xd2   :  { %1812 = vmatmul.msk.bf16.gmra.mxu1 %vm436_vm0, %v1808_v1 }
  0xd3   :  { %1034 = vmatmul.bf16.gmra.mxu2 %v1876_v6 }
  0xd4   :  { %1063 = vmatmul.bf16.gmra.mxu3 %v1880_v7 }
  0xd6   :  { %v531_v55 = vpop.f32.mrf.mxu2  ;;  %v475_v57 = vpop.f32.mrf.mxu0 }
  0xd7   :  { %v560_v56 = vpop.f32.mrf.mxu3  ;;  %v532_v24 = vadd.f32 %v531_v55, %v503_v40  ;;  %v504_v58 = vpop.f32.mrf.mxu1  ;;  %v2070_v40 = vld [vmem:[%s3178_s2 + $0x68] sm:$0xf0]  ;;  %v2068_v55 = vld [vmem:[%s3178_s2 + $0x5c] sm:$0xf] }
  0xd8   :  { %v505_v28 = vadd.f32 %v504_v58, %v475_v57  ;;  %v1939_v57 = vld [vmem:[%s3179_s3 + $0x50] sm:$0xf]  ;;  %v2089_v58 = vld [vmem:[%s3179_s3 + $0x60] sm:$0xf0] }
  0xd9   :  { %v2788_v60 = vadd.f32 %v560_v56, %v532_v24  ;;  %v1865_v56 = vld [vmem:[%s3178_s2 + $0x6c] sm:$0xf0]  ;;  %v2071_v24 = vld [vmem:[%s3178_s2 + $0x70] sm:$0xf0]  ;;  %v1940_v46 = vor.u32 %v2089_v58, %v1939_v57 }
  0xda   :  { %v1868_v63 = vor.u32 %v2068_v55, %v1865_v56  ;;  %v2081_v55 = vld [vmem:[%s3179_s3 + $0x20] sm:$0xf0] }
  0xde   :  { %v533_v32 = vpop.f32.mrf.mxu2  ;;  %v574_v22 = vpop.f32.mrf.mxu0 }
  0xdf   :  { %v562_v17 = vpop.f32.mrf.mxu3  ;;  %v534_v21 = vadd.f32 %v533_v32, %v505_v28  ;;  %v739_v23 = vpop.f32.mrf.mxu1  ;;  %v2815_v34 = vadd.f32 %v574_v22, %v2679_v54  ;;  %v1843_v54 = vld [vmem:[%s3178_s2 + $0x30] sm:$0xf] }
  0xe0   :  { %v1844_v30 = vor.u32 %v2065_v42, %v1843_v54  ;;  %v2094_v54 = vld [vmem:[%s3179_s3 + $0x88] sm:$0xf0] }
  0xe1   :  { %v2817_v35 = vadd.f32 %v562_v17, %v534_v21  ;;  %1077 = vmatmul.bf16.vlgmr.msrb.gmra.mxu0 %v1824_v18 }
  0xe2   :  { %1106 = vmatmul.bf16.vlgmr.msrb.gmra.mxu1 %v1828_v19 }
  0xe3   :  { %1893 = vmatmul.msk.bf16.vlgmr.msrb.gmra.mxu2 %vm436_vm0, %v1832_v59 }
  0xe4   :  { %1300 = vmatmul.bf16.vlgmr.msrb.gmra.mxu3 %v1900_v33 }
  0xe6   :  { %v768_v36 = vpop.f32.mrf.mxu2  ;;  %v576_v38 = vpop.f32.mrf.mxu0 }
  0xe7   :  { %v797_v37 = vpop.f32.mrf.mxu3  ;;  %v769_v0 = vadd.f32 %v768_v36, %v739_v23  ;;  %v741_v4 = vpop.f32.mrf.mxu1  ;;  %v2821_v39 = vadd.f32 %v576_v38, %v2713_v11  ;;  %v1851_v11 = vld [vmem:[%s3178_s2 + $0x38] sm:$0xf]  ;;  %v2075_v36 = vld [vmem:[%s3178_s2 + $0x90] sm:$0xf0]  ;;  %v2076_v38 = vld [vmem:[%s3178_s2 + $0x98] sm:$0xf0] }
  0xe8   :  { %v1852_v20 = vor.u32 %v2066_v27, %v1851_v11 }
  0xe9   :  { %v2823_v41 = vadd.f32 %v797_v37, %v769_v0  ;;  %v2073_v37 = vld [vmem:[%s3178_s2 + $0x84] sm:$0xf]  ;;  %v1885_v0 = vld [vmem:[%s3178_s2 + $0x94] sm:$0xf0] }
  0xea   :  { %v1888_v11 = vor.u32 %v2073_v37, %v1885_v0  ;;  %v1927_v37 = vld [vmem:[%s3179_s3 + $0x30] sm:$0xf]  ;;  %v2085_v0 = vld [vmem:[%s3179_s3 + $0x40] sm:$0xf0] }
  0xee   :  { %v770_v48 = vpop.f32.mrf.mxu2  ;;  %v579_v16 = vpop.f32.mrf.mxu0 }
  0xef   :  { %v799_v29 = vpop.f32.mrf.mxu3  ;;  %v771_v12 = vadd.f32 %v770_v48, %v741_v4  ;;  %v744_v49 = vpop.f32.mrf.mxu1  ;;  %v2850_v51 = vadd.f32 %v579_v16, %v2723_v14  ;;  %v1863_v14 = vld [vmem:[%s3178_s2 + $0x58] sm:$0xf] }
  0xf0   :  { %v1864_v62 = vor.u32 %v2070_v40, %v1863_v14  ;;  %v1959_v4 = vld [vmem:[%s3179_s3 + $0x78] sm:$0xf]  ;;  %v1909_v14 = vld [vmem:[%s3179_s3 + $0x1c] sm:$0xf0]  ;;  %v1915_v40 = vld [vmem:[%s3179_s3 + $0x10] sm:$0xf] }
  0xf1   :  { %v2852_v52 = vadd.f32 %v799_v29, %v771_v12  ;;  %1082 = vmatmul.bf16.gmra.mxu0 %v1844_v30  ;;  %v1960_v29 = vor.u32 %v2094_v54, %v1959_v4  ;;  %v1935_v4 = vld [vmem:[%s3179_s3 + $0x38] sm:$0xf]  ;;  %v2086_v54 = vld [vmem:[%s3179_s3 + $0x48] sm:$0xf0] }
  0xf2   :  { %1111 = vmatmul.bf16.gmra.mxu1 %v1848_v31 }
  0xf3   :  { %1894 = vmatmul.msk.bf16.gmra.mxu2 %vm436_vm0, %v1852_v20 }
  0xf4   :  { %1305 = vmatmul.bf16.gmra.mxu3 %v1920_v50 }
  0xf6   :  { %v773_v53 = vpop.f32.mrf.mxu2  ;;  %v581_v3 = vpop.f32.mrf.mxu0 }
  0xf7   :  { %v802_v1 = vpop.f32.mrf.mxu3  ;;  %v774_v2 = vadd.f32 %v773_v53, %v744_v49  ;;  %v746_v5 = vpop.f32.mrf.mxu1  ;;  %v2856_v6 = vadd.f32 %v581_v3, %v2755_v43  ;;  %v1871_v43 = vld [vmem:[%s3178_s2 + $0x60] sm:$0xf]  ;;  %v1907_v3 = vld [vmem:[%s3179_s3 + $0x8] sm:$0xf] }
  0xf8   :  { %v1872_v15 = vor.u32 %v2071_v24, %v1871_v43 }
  0xf9   :  { %v2858_v7 = vadd.f32 %v802_v1, %v774_v2  ;;  %v1901_v2 = vld [vmem:[%s3179_s3 + $0x14] sm:$0xf0] }
  0xfe   :  { %v775_v28 = vpop.f32.mrf.mxu2  ;;  %v584_v10 = vpop.f32.mrf.mxu0 }
  0xff   :  { %v804_v61 = vpop.f32.mrf.mxu3  ;;  %v776_v9 = vadd.f32 %v775_v28, %v746_v5  ;;  %v749_v13 = vpop.f32.mrf.mxu1  ;;  %v2885_v32 = vadd.f32 %v584_v10, %v2759_v8  ;;  %v1883_v8 = vld [vmem:[%s3178_s2 + $0x80] sm:$0xf]  ;;  %v2080_v5 = vld [vmem:[%s3179_s3 + $0x18] sm:$0xf0] }
 0x100   :  { %v1884_v26 = vor.u32 %v2075_v36, %v1883_v8  ;;  %v1908_v57 = vor.u32 %v2080_v5, %v1907_v3  ;;  %v2082_v8 = vld [vmem:[%s3179_s3 + $0x2c] sm:$0xf]  ;;  %v1921_v36 = vld [vmem:[%s3179_s3 + $0x3c] sm:$0xf0] }
 0x101   :  { %v2887_v17 = vadd.f32 %v804_v61, %v776_v9  ;;  %1087 = vmatmul.bf16.gmra.mxu0 %v1864_v62 }
 0x102   :  { %1116 = vmatmul.bf16.gmra.mxu1 %v1868_v63  ;;  %v1916_v63 = vor.u32 %v2081_v55, %v1915_v40  ;;  %v1947_v40 = vld [vmem:[%s3179_s3 + $0x58] sm:$0xf]  ;;  %v2090_v55 = vld [vmem:[%s3179_s3 + $0x68] sm:$0xf0] }
 0x103   :  { %1895 = vmatmul.msk.bf16.gmra.mxu2 %vm436_vm0, %v1872_v15 }
 0x104   :  { %1310 = vmatmul.bf16.gmra.mxu3 %v1940_v46 }
 0x106   :  { %v778_v18 = vpop.f32.mrf.mxu2  ;;  %v586_v22 = vpop.f32.mrf.mxu0 }
 0x107   :  { %v807_v19 = vpop.f32.mrf.mxu3  ;;  %v779_v21 = vadd.f32 %v778_v18, %v749_v13  ;;  %v751_v23 = vpop.f32.mrf.mxu1  ;;  %v2891_v59 = vadd.f32 %v586_v22, %v2785_v45  ;;  %v1891_v45 = vld [vmem:[%s3178_s2 + $0x88] sm:$0xf] }
 0x108   :  { %v1892_v48 = vor.u32 %v2076_v38, %v1891_v45  ;;  %v1929_v38 = vld [vmem:[%s3179_s3 + $0x44] sm:$0xf0] }
 0x109   :  { %v2893_v33 = vadd.f32 %v807_v19, %v779_v21 }
 0x10e   :  { %v780_v42 = vpop.f32.mrf.mxu2  ;;  %v589_v44 = vpop.f32.mrf.mxu0 }
 0x10f   :  { %v809_v25 = vpop.f32.mrf.mxu3  ;;  %v781_v27 = vadd.f32 %v780_v42, %v751_v23  ;;  %v754_v47 = vpop.f32.mrf.mxu1  ;;  %v2920_v30 = vadd.f32 %v589_v44, %v2788_v60  ;;  %v2077_v60 = vld [vmem:[%s3179_s3 + $0x4] sm:$0xf] }
 0x110   :  { %v1904_v24 = vor.u32 %v2077_v60, %v1901_v2 }
 0x111   :  { %v2922_v31 = vadd.f32 %v809_v25, %v781_v27  ;;  %1092 = vmatmul.bf16.gmra.mxu0 %v1884_v26  ;;  %v1924_v26 = vor.u32 %v2082_v8, %v1921_v36 }
 0x112   :  { %1121 = vmatmul.bf16.gmra.mxu1 %v1888_v11  ;;  %v1928_v11 = vor.u32 %v2085_v0, %v1927_v37 }
 0x113   :  { %1896 = vmatmul.msk.bf16.gmra.mxu2 %vm436_vm0, %v1892_v48 }
 0x114   :  { %1315 = vmatmul.bf16.gmra.mxu3 %v1960_v29  ;;  %v1936_v29 = vor.u32 %v2086_v54, %v1935_v4 }
 0x116   :  { %v783_v12 = vpop.f32.mrf.mxu2  ;;  %v591_v20 = vpop.f32.mrf.mxu0 }
 0x117   :  { %v812_v16 = vpop.f32.mrf.mxu3  ;;  %v784_v49 = vadd.f32 %v783_v12, %v754_v47  ;;  %v756_v50 = vpop.f32.mrf.mxu1  ;;  %v2926_v53 = vadd.f32 %v591_v20, %v2817_v35  ;;  %v2078_v35 = vld [vmem:[%s3179_s3 + $0xc] sm:$0xf] }
 0x118   :  { %v1912_v62 = vor.u32 %v2078_v35, %v1909_v14  ;;  %v1941_v14 = vld [vmem:[%s3179_s3 + $0x64] sm:$0xf0] }
 0x119   :  { %v2928_v1 = vadd.f32 %v812_v16, %v784_v49 }
 0x11e   :  { %v785_v56 = vpop.f32.mrf.mxu2  ;;  %v826_v28 = vpop.f32.mrf.mxu0 }
 0x11f   :  { %v814_v43 = vpop.f32.mrf.mxu3  ;;  %v786_v58 = vadd.f32 %v785_v56, %v756_v50  ;;  %v855_v61 = vpop.f32.mrf.mxu1  ;;  %v827_v9 = vadd.f32 %v826_v28, %v2823_v41 }
 0x121   :  { %v2955_v10 = vadd.f32 %v814_v43, %v786_v58  ;;  %v2957_v13 = vadd.f32 %v855_v61, %v827_v9  ;;  %1329 = vmatmul.bf16.vlgmr.msra.gmra.mxu0 %v1904_v24  ;;  %v1949_v43 = vld [vmem:[%s3179_s3 + $0x6c] sm:$0xf0]  ;;  %v1955_v24 = vld [vmem:[%s3179_s3 + $0x60] sm:$0xf] }
 0x122   :  { %1358 = vmatmul.bf16.vlgmr.msra.gmra.mxu1 %v1908_v57  ;;  %v2091_v57 = vld [vmem:[%s3179_s3 + $0x70] sm:$0xf0] }
 0x123   :  { %1387 = vmatmul.bf16.vlgmr.msra.gmra.mxu2 %v1912_v62  ;;  %v1437_v15 = vmax.f32 %v2815_v34, %v2957_v13  ;;  %v1948_v62 = vor.u32 %v2090_v55, %v1947_v40 }
 0x124   :  { %1977 = vmatmul.msk.bf16.vlgmr.msra.gmra.mxu3 %vm436_vm0, %v1916_v63 }
 0x126   :  { %v1020_v46 = vpop.f32.mrf.mxu2  ;;  %v828_v21 = vpop.f32.mrf.mxu0 }
 0x127   :  { %v1049_v18 = vpop.f32.mrf.mxu3  ;;  %v857_v22 = vpop.f32.mrf.mxu1  ;;  %v829_v41 = vadd.f32 %v828_v21, %v2852_v52  ;;  %v2083_v52 = vld [vmem:[%s3179_s3 + $0x34] sm:$0xf]  ;;  %v1956_v21 = vor.u32 %v2091_v57, %v1955_v24 }
 0x128   :  { %v2962_v19 = vadd.f32 %v1049_v18, %v1020_v46  ;;  %v1932_v48 = vor.u32 %v2083_v52, %v1929_v38 }
 0x129   :  { %v2965_v23 = vadd.f32 %v857_v22, %v829_v41 }
 0x12b   :  { %v1438_v45 = vmax.f32 %v2821_v39, %v2965_v23 }
 0x12e   :  { %v1022_v42 = vpop.f32.mrf.mxu2  ;;  %v831_v44 = vpop.f32.mrf.mxu0 }
 0x12f   :  { %v1051_v25 = vpop.f32.mrf.mxu3  ;;  %v860_v47 = vpop.f32.mrf.mxu1  ;;  %v832_v12 = vadd.f32 %v831_v44, %v2858_v7  ;;  %v2087_v7 = vld [vmem:[%s3179_s3 + $0x54] sm:$0xf]  ;;  %v1969_v44 = vld [vmem:[%s3179_s3 + $0x94] sm:$0xf0] }
 0x130   :  { %v2993_v27 = vadd.f32 %v1051_v25, %v1022_v42  ;;  %v1944_v61 = vor.u32 %v2087_v7, %v1941_v14  ;;  %v1961_v42 = vld [vmem:[%s3179_s3 + $0x8c] sm:$0xf0]  ;;  %v1967_v25 = vld [vmem:[%s3179_s3 + $0x80] sm:$0xf] }
 0x131   :  { %v2996_v16 = vadd.f32 %v860_v47, %v832_v12  ;;  %1334 = vmatmul.bf16.gmra.mxu0 %v1924_v26  ;;  %v2095_v26 = vld [vmem:[%s3179_s3 + $0x90] sm:$0xf0]  ;;  %v1975_v47 = vld [vmem:[%s3179_s3 + $0x88] sm:$0xf] }
 0x132   :  { %1363 = vmatmul.bf16.gmra.mxu1 %v1928_v11 }
 0x133   :  { %1392 = vmatmul.bf16.gmra.mxu2 %v1932_v48  ;;  %v1439_v49 = vmax.f32 %v2850_v51, %v2996_v16  ;;  %v2096_v48 = vld [vmem:[%s3179_s3 + $0x98] sm:$0xf0] }
 0x134   :  { %1978 = vmatmul.msk.bf16.gmra.mxu3 %vm436_vm0, %v1936_v29  ;;  %v1976_v14 = vor.u32 %v2096_v48, %v1975_v47 }
 0x136   :  { %v1025_v20 = vpop.f32.mrf.mxu2  ;;  %v833_v2 = vpop.f32.mrf.mxu0 }
 0x137   :  { %v1054_v50 = vpop.f32.mrf.mxu3  ;;  %v862_v3 = vpop.f32.mrf.mxu1  ;;  %v834_v5 = vadd.f32 %v833_v2, %v2887_v17  ;;  %v2088_v17 = vld [vmem:[%s3179_s3 + $0x5c] sm:$0xf] }
 0x138   :  { %v3001_v60 = vadd.f32 %v1054_v50, %v1025_v20  ;;  %v1952_v18 = vor.u32 %v2088_v17, %v1949_v43  ;;  %v1968_v50 = vor.u32 %v2095_v26, %v1967_v25 }
 0x139   :  { %v3004_v35 = vadd.f32 %v862_v3, %v834_v5 }
 0x13b   :  { %v1440_v56 = vmax.f32 %v2856_v6, %v3004_v35 }
 0x13e   :  { %v1027_v58 = vpop.f32.mrf.mxu2  ;;  %v836_v9 = vpop.f32.mrf.mxu0 }
 0x13f   :  { %v1056_v28 = vpop.f32.mrf.mxu3  ;;  %v865_v46 = vpop.f32.mrf.mxu1  ;;  %v837_v22 = vadd.f32 %v836_v9, %v2893_v33  ;;  %v2092_v33 = vld [vmem:[%s3179_s3 + $0x7c] sm:$0xf] }
 0x140   :  { %v3032_v63 = vadd.f32 %v1056_v28, %v1027_v58  ;;  %v1964_v20 = vor.u32 %v2092_v33, %v1961_v42 }
 0x141   :  { %v3035_v41 = vadd.f32 %v865_v46, %v837_v22  ;;  %1339 = vmatmul.bf16.gmra.mxu0 %v1944_v61 }
 0x142   :  { %1368 = vmatmul.bf16.gmra.mxu1 %v1948_v62 }
 0x143   :  { %1397 = vmatmul.bf16.gmra.mxu2 %v1952_v18  ;;  %v1441_v8 = vmax.f32 %v2885_v32, %v3035_v41 }
 0x144   :  { %1979 = vmatmul.msk.bf16.gmra.mxu3 %vm436_vm0, %v1956_v21 }
 0x146   :  { %v1030_v36 = vpop.f32.mrf.mxu2  ;;  %v838_v52 = vpop.f32.mrf.mxu0 }
 0x147   :  { %v1059_v37 = vpop.f32.mrf.mxu3  ;;  %v867_v38 = vpop.f32.mrf.mxu1  ;;  %v839_v4 = vadd.f32 %v838_v52, %v2922_v31  ;;  %v2093_v31 = vld [vmem:[%s3179_s3 + $0x84] sm:$0xf] }
 0x148   :  { %v3040_v0 = vadd.f32 %v1059_v37, %v1030_v36  ;;  %v1972_v7 = vor.u32 %v2093_v31, %v1969_v44 }
 0x149   :  { %v3043_v54 = vadd.f32 %v867_v38, %v839_v4 }
 0x14b   :  { %v1442_v11 = vmax.f32 %v2891_v59, %v3043_v54 }
 0x14e   :  { %v1032_v29 = vpop.f32.mrf.mxu2  ;;  %v841_v3 = vpop.f32.mrf.mxu0 }
 0x14f   :  { %v1061_v12 = vpop.f32.mrf.mxu3  ;;  %v870_v5 = vpop.f32.mrf.mxu1  ;;  %v842_v40 = vadd.f32 %v841_v3, %v2928_v1 }
 0x150   :  { %v1062_v2 = vadd.f32 %v1061_v12, %v1032_v29 }
 0x151   :  { %v3072_v55 = vadd.f32 %v870_v5, %v842_v40  ;;  %1344 = vmatmul.bf16.gmra.mxu0 %v1964_v20 }
 0x152   :  { %1373 = vmatmul.bf16.gmra.mxu1 %v1968_v50 }
 0x153   :  { %1402 = vmatmul.bf16.gmra.mxu2 %v1972_v7  ;;  %v1443_v17 = vmax.f32 %v2920_v30, %v3072_v55 }
 0x154   :  { %1980 = vmatmul.msk.bf16.gmra.mxu3 %vm436_vm0, %v1976_v14 }
 0x156   :  { %v1035_v43 = vpop.f32.mrf.mxu2  ;;  %v843_v58 = vpop.f32.mrf.mxu0 }
 0x157   :  { %v1064_v24 = vpop.f32.mrf.mxu3  ;;  %v872_v28 = vpop.f32.mrf.mxu1  ;;  %v844_v61 = vadd.f32 %v843_v58, %v2955_v10 }
 0x158   :  { %v1065_v57 = vadd.f32 %v1064_v24, %v1035_v43 }
 0x159   :  { %v3078_v62 = vadd.f32 %v872_v28, %v844_v61 }
 0x15b   :  { %v1444_v1 = vmax.f32 %v2926_v53, %v3078_v62 }
 0x15e   :  { %v1037_v9 = vpop.f32.mrf.mxu2  ;;  %v1078_v21 = vpop.f32.mrf.mxu0 }
 0x15f   :  { %v1066_v46 = vpop.f32.mrf.mxu3  ;;  %v1107_v22 = vpop.f32.mrf.mxu1  ;;  %v1079_v36 = vadd.f32 %v1078_v21, %v2962_v19 }
 0x160   :  { %v1067_v18 = vadd.f32 %v1066_v46, %v1037_v9 }
 0x161   :  { %v1108_v37 = vadd.f32 %v1107_v22, %v1079_v36 }
 0x166   :  { %v1136_v52 = vpop.f32.mrf.mxu2  ;;  %v1080_v33 = vpop.f32.mrf.mxu0 }
 0x167   :  { %v1301_v38 = vpop.f32.mrf.mxu3  ;;  %v3083_v4 = vadd.f32 %v1136_v52, %v1108_v37  ;;  %v1109_v42 = vpop.f32.mrf.mxu1  ;;  %v1081_v10 = vadd.f32 %v1080_v33, %v2993_v27 }
 0x169   :  { %v1110_v25 = vadd.f32 %v1109_v42, %v1081_v10 }
 0x16e   :  { %v1138_v26 = vpop.f32.mrf.mxu2  ;;  %v1083_v47 = vpop.f32.mrf.mxu0 }
 0x16f   :  { %v1303_v31 = vpop.f32.mrf.mxu3  ;;  %v3086_v44 = vadd.f32 %v1138_v26, %v1110_v25  ;;  %v1112_v48 = vpop.f32.mrf.mxu1  ;;  %v1084_v29 = vadd.f32 %v1083_v47, %v3001_v60 }
 0x171   :  { %v1113_v12 = vadd.f32 %v1112_v48, %v1084_v29 }
 0x176   :  { %v1141_v19 = vpop.f32.mrf.mxu2  ;;  %v1085_v3 = vpop.f32.mrf.mxu0 }
 0x177   :  { %v1306_v20 = vpop.f32.mrf.mxu3  ;;  %v3089_v50 = vadd.f32 %v1141_v19, %v1113_v12  ;;  %v1114_v5 = vpop.f32.mrf.mxu1  ;;  %v1086_v7 = vadd.f32 %v1085_v3, %v3032_v63 }
 0x179   :  { %v1115_v14 = vadd.f32 %v1114_v5, %v1086_v7 }
 0x17e   :  { %v1143_v27 = vpop.f32.mrf.mxu2  ;;  %v1088_v24 = vpop.f32.mrf.mxu0 }
 0x17f   :  { %v3092_v40 = vpop.f32.mrf.mxu3  ;;  %v3094_v43 = vadd.f32 %v1143_v27, %v1115_v14  ;;  %v1117_v58 = vpop.f32.mrf.mxu1  ;;  %v1089_v28 = vadd.f32 %v1088_v24, %v3040_v0 }
 0x181   :  { %v1118_v60 = vadd.f32 %v1117_v58, %v1089_v28 }
 0x186   :  { %v1146_v61 = vpop.f32.mrf.mxu2  ;;  %v1090_v21 = vpop.f32.mrf.mxu0 }
 0x187   :  { %v3097_v9 = vpop.f32.mrf.mxu3  ;;  %v3099_v46 = vadd.f32 %v1146_v61, %v1118_v60  ;;  %v1119_v22 = vpop.f32.mrf.mxu1  ;;  %v1091_v36 = vadd.f32 %v1090_v21, %v1062_v2 }
 0x189   :  { %v1120_v63 = vadd.f32 %v1119_v22, %v1091_v36 }
 0x18e   :  { %v1148_v37 = vpop.f32.mrf.mxu2  ;;  %v1093_v42 = vpop.f32.mrf.mxu0 }
 0x18f   :  { %v3101_v52 = vpop.f32.mrf.mxu3  ;;  %v3103_v33 = vadd.f32 %v1148_v37, %v1120_v63  ;;  %v1122_v10 = vpop.f32.mrf.mxu1  ;;  %v1094_v25 = vadd.f32 %v1093_v42, %v1065_v57 }
 0x191   :  { %v1123_v26 = vadd.f32 %v1122_v10, %v1094_v25 }
 0x196   :  { %v1151_v0 = vpop.f32.mrf.mxu2  ;;  %v1095_v29 = vpop.f32.mrf.mxu0 }
 0x197   :  { %v3105_v47 = vpop.f32.mrf.mxu3  ;;  %v3107_v48 = vadd.f32 %v1151_v0, %v1123_v26  ;;  %v1124_v12 = vpop.f32.mrf.mxu1  ;;  %v1096_v19 = vadd.f32 %v1095_v29, %v1067_v18  ;;  %v3120_v0 = vld [vmem:[%s3180_s5] ss:$0 sm:$0xff] }
 0x199   :  { %v1125_v3 = vadd.f32 %v1124_v12, %v1096_v19 }
 0x19e   :  { %v1153_v2 = vpop.f32.mrf.mxu2  ;;  %v1330_v14 = vpop.f32.mrf.mxu0 }
 0x19f   :  { %v3109_v5 = vpop.f32.mrf.mxu3  ;;  %v3111_v7 = vadd.f32 %v1153_v2, %v1125_v3  ;;  %v1359_v27 = vpop.f32.mrf.mxu1  ;;  %v1331_v24 = vadd.f32 %v1330_v14, %v1301_v38 }
 0x1a1   :  { %v1360_v58 = vadd.f32 %v1359_v27, %v1331_v24 }
 0x1a6   :  { %v1388_v57 = vpop.f32.mrf.mxu2  ;;  %v1332_v61 = vpop.f32.mrf.mxu0 }
 0x1a7   :  { %v1417_v28 = vpop.f32.mrf.mxu3  ;;  %v1389_v60 = vadd.f32 %v1388_v57, %v1360_v58  ;;  %v1361_v21 = vpop.f32.mrf.mxu1  ;;  %v1333_v36 = vadd.f32 %v1332_v61, %v1303_v31 }
 0x1a9   :  { %v1418_v22 = vadd.f32 %v1417_v28, %v1389_v60  ;;  %v1362_v37 = vadd.f32 %v1361_v21, %v1333_v36 }
 0x1ab   :  { %v1445_v63 = vmax.f32 %v3083_v4, %v1418_v22 }
 0x1ad   :  { %v1453_v18 = vmax.f32 %v1437_v15, %v1445_v63 }
 0x1ae   :  { %v1390_v42 = vpop.f32.mrf.mxu2  ;;  %v1335_v26 = vpop.f32.mrf.mxu0 }
 0x1af   :  { %v1419_v10 = vpop.f32.mrf.mxu3  ;;  %v1391_v25 = vadd.f32 %v1390_v42, %v1362_v37  ;;  %v1364_v38 = vpop.f32.mrf.mxu1  ;;  %v1336_v12 = vadd.f32 %v1335_v26, %v1306_v20  ;;  %v1465_v4 = vadd.f32 %v3120_v0, %v1453_v18 }
 0x1b1   :  { %v1420_v29 = vadd.f32 %v1419_v10, %v1391_v25  ;;  %v1365_v13 = vadd.f32 %v1364_v38, %v1336_v12  ;;  %v1473_v24 = vmax.f32 %v1465_v4, 0.0 }
 0x1b3   :  { %v1446_v31 = vmax.f32 %v3086_v44, %v1420_v29 }
 0x1b5   :  { %v1454_v34 = vmax.f32 %v1438_v45, %v1446_v31 }
 0x1b6   :  { %v1393_v15 = vpop.f32.mrf.mxu2  ;;  %v1337_v14 = vpop.f32.mrf.mxu0 }
 0x1b7   :  { %v1422_v19 = vpop.f32.mrf.mxu3  ;;  %v1466_v3 = vadd.f32 %v3120_v0, %v1454_v34  ;;  %v1394_v2 = vadd.f32 %v1393_v15, %v1365_v13  ;;  %v1366_v27 = vpop.f32.mrf.mxu1  ;;  %v1338_v20 = vadd.f32 %v1337_v14, %v3092_v40 }
 0x1b9   :  { %v1474_v58 = vmax.f32 %v1466_v3, 0.0  ;;  %v1423_v57 = vadd.f32 %v1422_v19, %v1394_v2  ;;  %v1367_v23 = vadd.f32 %v1366_v27, %v1338_v20 }
 0x1bb   :  { %v2100_v44 = vpack.c.bf16 %v1474_v58, %v1473_v24  ;;  %v1447_v28 = vmax.f32 %v3089_v50, %v1423_v57 }
 0x1bd   :  { %2101 = vst [vmem:[%s3181_s6] sm:$0xff] %v2100_v44   ;;  %v1455_v39 = vmax.f32 %v1439_v49, %v1447_v28 }
 0x1be   :  { %v1395_v45 = vpop.f32.mrf.mxu2  ;;  %v1340_v21 = vpop.f32.mrf.mxu0 }
 0x1bf   :  { %v1424_v60 = vpop.f32.mrf.mxu3  ;;  %v1396_v61 = vadd.f32 %v1395_v45, %v1367_v23  ;;  %v1369_v22 = vpop.f32.mrf.mxu1  ;;  %v1341_v40 = vadd.f32 %v1340_v21, %v3097_v9  ;;  %v1467_v50 = vadd.f32 %v3120_v0, %v1455_v39 }
 0x1c1   :  { %v1425_v36 = vadd.f32 %v1424_v60, %v1396_v61  ;;  %v1370_v37 = vadd.f32 %v1369_v22, %v1341_v40  ;;  %v1475_v26 = vmax.f32 %v1467_v50, 0.0 }
 0x1c3   :  { %v1448_v63 = vmax.f32 %v3094_v43, %v1425_v36 }
 0x1c5   :  { %v1456_v18 = vmax.f32 %v1440_v56, %v1448_v63 }
 0x1c6   :  { %v1398_v51 = vpop.f32.mrf.mxu2  ;;  %v1342_v10 = vpop.f32.mrf.mxu0 }
 0x1c7   :  { %v1427_v16 = vpop.f32.mrf.mxu3  ;;  %v1468_v49 = vadd.f32 %v3120_v0, %v1456_v18  ;;  %v1399_v42 = vadd.f32 %v1398_v51, %v1370_v37  ;;  %v1371_v25 = vpop.f32.mrf.mxu1  ;;  %v1343_v9 = vadd.f32 %v1342_v10, %v3101_v52 }
 0x1c9   :  { %v1476_v38 = vmax.f32 %v1468_v49, 0.0  ;;  %v1428_v29 = vadd.f32 %v1427_v16, %v1399_v42  ;;  %v1372_v35 = vadd.f32 %v1371_v25, %v1343_v9 }
 0x1cb   :  { %v2105_v43 = vpack.c.bf16 %v1476_v38, %v1475_v26  ;;  %v1449_v12 = vmax.f32 %v3099_v46, %v1428_v29 }
 0x1cd   :  { %2117 = vst [vmem:[%s3181_s6 + $0x8] sm:$0xff] %v2105_v43   ;;  %v1457_v6 = vmax.f32 %v1441_v8, %v1449_v12 }
 0x1ce   :  { %v1400_v56 = vpop.f32.mrf.mxu2  ;;  %v1345_v34 = vpop.f32.mrf.mxu0 }
 0x1cf   :  { %v1429_v31 = vpop.f32.mrf.mxu3  ;;  %v1401_v4 = vadd.f32 %v1400_v56, %v1372_v35  ;;  %v1346_v15 = vadd.f32 %v1345_v34, %v3105_v47  ;;  %v1374_v52 = vpop.f32.mrf.mxu1  ;;  %v1469_v46 = vadd.f32 %v3120_v0, %v1457_v6 }
 0x1d1   :  { %v1430_v13 = vadd.f32 %v1429_v31, %v1401_v4  ;;  %v1375_v2 = vadd.f32 %v1374_v52, %v1346_v15  ;;  %v1477_v24 = vmax.f32 %v1469_v46, 0.0 }
 0x1d3   :  { %v1450_v19 = vmax.f32 %v3103_v33, %v1430_v13 }
 0x1d5   :  { %v1458_v3 = vmax.f32 %v1442_v11, %v1450_v19 }
 0x1d6   :  { %v1403_v32 = vpop.f32.mrf.mxu2  ;;  %v1347_v27 = vpop.f32.mrf.mxu0 }
 0x1d7   :  { %v1432_v41 = vpop.f32.mrf.mxu3  ;;  %v1470_v8 = vadd.f32 %v3120_v0, %v1458_v3  ;;  %v1404_v14 = vadd.f32 %v1403_v32, %v1375_v2  ;;  %v1348_v47 = vadd.f32 %v1347_v27, %v3109_v5  ;;  %v1376_v44 = vpop.f32.mrf.mxu1 }
 0x1d9   :  { %v1478_v58 = vmax.f32 %v1470_v8, 0.0  ;;  %v1433_v57 = vadd.f32 %v1432_v41, %v1404_v14  ;;  %v1377_v54 = vadd.f32 %v1376_v44, %v1348_v47 }
 0x1db   :  { %v2110_v20 = vpack.c.bf16 %v1478_v58, %v1477_v24  ;;  %v1451_v33 = vmax.f32 %v3107_v48, %v1433_v57 }
 0x1dd   :  { %2118 = vst [vmem:[%s3181_s6 + $0x10] sm:$0xff] %v2110_v20   ;;  %v1459_v59 = vmax.f32 %v1443_v17, %v1451_v33 }
 0x1de   :  { %v1405_v11 = vpop.f32.mrf.mxu2 }
 0x1df   :  { %v1406_v28 = vadd.f32 %v1405_v11, %v1377_v54  ;;  %v1434_v39 = vpop.f32.mrf.mxu3  ;;  %v1471_v5 = vadd.f32 %v3120_v0, %v1459_v59 }
 0x1e1   :  { %v1435_v23 = vadd.f32 %v1434_v39, %v1406_v28  ;;  %v1479_v61 = vmax.f32 %v1471_v5, 0.0 }
 0x1e3   :  { %v1452_v45 = vmax.f32 %v3111_v7, %v1435_v23 }
 0x1e5   :  { %v1460_v48 = vmax.f32 %v1444_v1, %v1452_v45 }
 0x1e7   :  { %v1472_v60 = vadd.f32 %v3120_v0, %v1460_v48 }
 0x1e9   :  { %v1480_v21 = vmax.f32 %v1472_v60, 0.0 }
 0x1eb   :  { %v2115_v22 = vpack.c.bf16 %v1480_v21, %v1479_v61 }
 0x1ed   :  { %2119 = vst [vmem:[%s3181_s6 + $0x18] sm:$0xff] %v2115_v22  }

// kernel: digit_classifier_forward.5
= control target key start
LH: loop header
LB: loop body
LE: loop exit
PB: predicated region body
PF: predicated region fallthrough
CT: control target
= control target key end

     0   :  { %vm1744_vm0 = vcmask 523264   ;;  %s4141_s1 = inlined_call_operand.vmem [shape: bf16[3136,128], index: 1, kind: input, shape index: {}]   ;;  %s4142_s0 = inlined_call_operand.vmem [shape: bf16[16,3136], index: 0, kind: input, shape index: {}]   ;;  %s4143_s2 = inlined_call_operand.vmem [shape: f32[1,128], index: 2, kind: input, shape index: {}]   ;;  %s4144_s4 = inlined_call_operand.vmem [shape: f32[1,128], index: 4, kind: input, shape index: {}]   ;;  %s4145_s3 = inlined_call_operand.vmem [shape: bf16[128,128], index: 3, kind: input, shape index: {}]   ;;  %s4146_s5 = inlined_call_operand.vmem [shape: f32[16,128], index: 5, kind: output, shape index: {}]  }
   0x1   :  { %v3138_v0 = vld [vmem:[%s4141_s1 + $0x38] sm:$0xff]  ;;  %v3137_v4 = vld [vmem:[%s4141_s1 + $0x30] sm:$0xff]  ;;  %v3136_v8 = vld [vmem:[%s4141_s1 + $0x28] sm:$0xff] }
   0x2   :  { %v3154_v1 = vld [vmem:[%s4141_s1 + $0xb8] sm:$0xff]  ;;  %1748 = vmatpush.bf16.msra.mxu0 %v3138_v0  ;;  %v3153_v5 = vld [vmem:[%s4141_s1 + $0xb0] sm:$0xff]  ;;  %v3152_v9 = vld [vmem:[%s4141_s1 + $0xa8] sm:$0xff] }
   0x3   :  { %v3162_v2 = vld [vmem:[%s4141_s1 + $0xf8] sm:$0xff]  ;;  %1776 = vmatpush.bf16.msra.mxu2 %v3154_v1  ;;  %v3161_v6 = vld [vmem:[%s4141_s1 + $0xf0] sm:$0xff]  ;;  %v3160_v10 = vld [vmem:[%s4141_s1 + $0xe8] sm:$0xff] }
   0x4   :  { %v3146_v3 = vld [vmem:[%s4141_s1 + $0x78] sm:$0xff]  ;;  %1790 = vmatpush.bf16.msra.mxu3 %v3162_v2  ;;  %v3145_v7 = vld [vmem:[%s4141_s1 + $0x70] sm:$0xff]  ;;  %v3144_v11 = vld [vmem:[%s4141_s1 + $0x68] sm:$0xff] }
   0x5   :  { %1762 = vmatpush.bf16.msra.mxu1 %v3146_v3  ;;  %v3135_v12 = vld [vmem:[%s4141_s1 + $0x20] sm:$0xff]  ;;  %v3134_v16 = vld [vmem:[%s4141_s1 + $0x18] sm:$0xff]  ;;  %v3133_v20 = vld [vmem:[%s4141_s1 + $0x10] sm:$0xff] }
   0x6   :  { %1749 = vmatpush.bf16.msra.mxu0 %v3137_v4  ;;  %v3151_v13 = vld [vmem:[%s4141_s1 + $0xa0] sm:$0xff]  ;;  %v3150_v17 = vld [vmem:[%s4141_s1 + $0x98] sm:$0xff]  ;;  %v3149_v21 = vld [vmem:[%s4141_s1 + $0x90] sm:$0xff] }
   0x7   :  { %1777 = vmatpush.bf16.msra.mxu2 %v3153_v5  ;;  %v3159_v14 = vld [vmem:[%s4141_s1 + $0xe0] sm:$0xff]  ;;  %v3158_v18 = vld [vmem:[%s4141_s1 + $0xd8] sm:$0xff]  ;;  %v3157_v22 = vld [vmem:[%s4141_s1 + $0xd0] sm:$0xff] }
   0x8   :  { %1791 = vmatpush.bf16.msra.mxu3 %v3161_v6  ;;  %v3143_v15 = vld [vmem:[%s4141_s1 + $0x60] sm:$0xff]  ;;  %v3142_v19 = vld [vmem:[%s4141_s1 + $0x58] sm:$0xff]  ;;  %v3141_v23 = vld [vmem:[%s4141_s1 + $0x50] sm:$0xff] }
   0x9   :  { %1763 = vmatpush.bf16.msra.mxu1 %v3145_v7  ;;  %v3132_v24 = vld [vmem:[%s4141_s1 + $0x8] sm:$0xff]  ;;  %v3131_v28 = vld [vmem:[%s4141_s1] sm:$0xff]  ;;  %v3170_v31 = vld [vmem:[%s4141_s1 + $0x138] sm:$0xff] }
   0xa   :  { %1750 = vmatpush.bf16.msra.mxu0 %v3136_v8  ;;  %v3148_v25 = vld [vmem:[%s4141_s1 + $0x88] sm:$0xff]  ;;  %v3147_v29 = vld [vmem:[%s4141_s1 + $0x80] sm:$0xff]  ;;  %v3186_v34 = vld [vmem:[%s4141_s1 + $0x1b8] sm:$0xff] }
   0xb   :  { %1778 = vmatpush.bf16.msra.mxu2 %v3152_v9  ;;  %v3156_v26 = vld [vmem:[%s4141_s1 + $0xc8] sm:$0xff]  ;;  %v3155_v30 = vld [vmem:[%s4141_s1 + $0xc0] sm:$0xff]  ;;  %v3194_v37 = vld [vmem:[%s4141_s1 + $0x1f8] sm:$0xff] }
   0xc   :  { %1792 = vmatpush.bf16.msra.mxu3 %v3160_v10  ;;  %v3140_v27 = vld [vmem:[%s4141_s1 + $0x48] sm:$0xff]  ;;  %v2191_v32 = vld [vmem:[%s4142_s0] sm:$0xf]  ;;  %v3118_v33 = vld [vmem:[%s4142_s0 + $0x60] sm:$0xf0] }
   0xd   :  { %1764 = vmatpush.bf16.msra.mxu1 %v3144_v11  ;;  %v2199_v35 = vld [vmem:[%s4142_s0 + $0x8] sm:$0xf]  ;;  %v3119_v36 = vld [vmem:[%s4142_s0 + $0x68] sm:$0xf0]  ;;  %v2201_v39 = vld [vmem:[%s4142_s0 + $0x6c] sm:$0xf0]  ;;  %v2192_v41 = vor.u32 %v3118_v33, %v2191_v32 }
   0xe   :  { %1751 = vmatpush.bf16.msra.mxu0 %v3135_v12  ;;  %v3107_v38 = vld [vmem:[%s4142_s0 + $0xc] sm:$0xf]  ;;  %v3139_v40 = vld [vmem:[%s4141_s1 + $0x40] sm:$0xff]  ;;  %v3178_v42 = vld [vmem:[%s4141_s1 + $0x178] sm:$0xff]  ;;  %v2200_v43 = vor.u32 %v3119_v36, %v2199_v35 }
   0xf   :  { %1779 = vmatpush.bf16.msra.mxu2 %v3151_v13  ;;  %v3106_v44 = vld [vmem:[%s4142_s0 + $0x4] sm:$0xf]  ;;  %v2193_v45 = vld [vmem:[%s4142_s0 + $0x64] sm:$0xf0]  ;;  %v3169_v46 = vld [vmem:[%s4141_s1 + $0x130] sm:$0xff]  ;;  %v2204_v47 = vor.u32 %v3107_v38, %v2201_v39 }
  0x10   :  { %1793 = vmatpush.bf16.msra.mxu3 %v3159_v14  ;;  %v3185_v48 = vld [vmem:[%s4141_s1 + $0x1b0] sm:$0xff]  ;;  %v2196_v50 = vor.u32 %v3106_v44, %v2193_v45  ;;  %v3168_v52 = vld [vmem:[%s4141_s1 + $0x128] sm:$0xff]  ;;  %v3167_v56 = vld [vmem:[%s4141_s1 + $0x120] sm:$0xff] }
  0x11   :  { %1765 = vmatpush.bf16.msra.mxu1 %v3143_v15  ;;  %v3193_v49 = vld [vmem:[%s4141_s1 + $0x1f0] sm:$0xff]  ;;  %v3184_v53 = vld [vmem:[%s4141_s1 + $0x1a8] sm:$0xff]  ;;  %v3183_v57 = vld [vmem:[%s4141_s1 + $0x1a0] sm:$0xff] }
  0x12   :  { %1752 = vmatpush.bf16.msra.mxu0 %v3134_v16  ;;  %v3177_v51 = vld [vmem:[%s4141_s1 + $0x170] sm:$0xff]  ;;  %v3192_v54 = vld [vmem:[%s4141_s1 + $0x1e8] sm:$0xff]  ;;  %v3191_v58 = vld [vmem:[%s4141_s1 + $0x1e0] sm:$0xff] }
  0x13   :  { %1780 = vmatpush.bf16.msra.mxu2 %v3150_v17  ;;  %v3176_v55 = vld [vmem:[%s4141_s1 + $0x168] sm:$0xff]  ;;  %v3175_v59 = vld [vmem:[%s4141_s1 + $0x160] sm:$0xff]  ;;  %v3166_v60 = vld [vmem:[%s4141_s1 + $0x118] sm:$0xff] }
  0x14   :  { %1794 = vmatpush.bf16.msra.mxu3 %v3158_v18  ;;  %v3182_v61 = vld [vmem:[%s4141_s1 + $0x198] sm:$0xff]  ;;  %v3165_v0 = vld [vmem:[%s4141_s1 + $0x110] sm:$0xff]  ;;  %v3164_v4 = vld [vmem:[%s4141_s1 + $0x108] sm:$0xff] }
  0x15   :  { %1766 = vmatpush.bf16.msra.mxu1 %v3142_v19  ;;  %v3190_v62 = vld [vmem:[%s4141_s1 + $0x1d8] sm:$0xff]  ;;  %v3181_v1 = vld [vmem:[%s4141_s1 + $0x190] sm:$0xff]  ;;  %v3180_v5 = vld [vmem:[%s4141_s1 + $0x188] sm:$0xff] }
  0x16   :  { %1753 = vmatpush.bf16.msra.mxu0 %v3133_v20  ;;  %v3174_v63 = vld [vmem:[%s4141_s1 + $0x158] sm:$0xff]  ;;  %v3189_v2 = vld [vmem:[%s4141_s1 + $0x1d0] sm:$0xff]  ;;  %v3188_v6 = vld [vmem:[%s4141_s1 + $0x1c8] sm:$0xff] }
  0x17   :  { %1781 = vmatpush.bf16.msra.mxu2 %v3149_v21  ;;  %v3173_v3 = vld [vmem:[%s4141_s1 + $0x150] sm:$0xff]  ;;  %v3172_v7 = vld [vmem:[%s4141_s1 + $0x148] sm:$0xff]  ;;  %v3163_v8 = vld [vmem:[%s4141_s1 + $0x100] sm:$0xff] }
  0x18   :  { %1795 = vmatpush.bf16.msra.mxu3 %v3157_v22  ;;  %v3179_v9 = vld [vmem:[%s4141_s1 + $0x180] sm:$0xff]  ;;  %v3202_v11 = vld [vmem:[%s4141_s1 + $0x238] sm:$0xff]  ;;  %v2207_v13 = vld [vmem:[%s4142_s0 + $0x10] sm:$0xf] }
  0x19   :  { %1767 = vmatpush.bf16.msra.mxu1 %v3141_v23  ;;  %v3187_v10 = vld [vmem:[%s4141_s1 + $0x1c0] sm:$0xff]  ;;  %v3218_v12 = vld [vmem:[%s4141_s1 + $0x2b8] sm:$0xff]  ;;  %v3120_v14 = vld [vmem:[%s4142_s0 + $0x70] sm:$0xf0] }
  0x1a   :  { %1754 = vmatpush.bf16.msra.mxu0 %v3132_v24  ;;  %v2215_v15 = vld [vmem:[%s4142_s0 + $0x18] sm:$0xf]  ;;  %v3121_v16 = vld [vmem:[%s4142_s0 + $0x78] sm:$0xf0]  ;;  %v2217_v19 = vld [vmem:[%s4142_s0 + $0x7c] sm:$0xf0]  ;;  %v2208_v23 = vor.u32 %v3120_v14, %v2207_v13 }
  0x1b   :  { %1782 = vmatpush.bf16.msra.mxu2 %v3148_v25  ;;  %v3226_v17 = vld [vmem:[%s4141_s1 + $0x2f8] sm:$0xff]  ;;  %v3171_v20 = vld [vmem:[%s4141_s1 + $0x140] sm:$0xff]  ;;  %v3108_v21 = vld [vmem:[%s4142_s0 + $0x14] sm:$0xf]  ;;  %v2216_v24 = vor.u32 %v3121_v16, %v2215_v15 }
  0x1c   :  { %1796 = vmatpush.bf16.msra.mxu3 %v3156_v26  ;;  %v3109_v18 = vld [vmem:[%s4142_s0 + $0x1c] sm:$0xf]  ;;  %v2209_v22 = vld [vmem:[%s4142_s0 + $0x74] sm:$0xf0]  ;;  %v3200_v32 = vld [vmem:[%s4141_s1 + $0x228] sm:$0xff] }
  0x1d   :  { %1768 = vmatpush.bf16.msra.mxu1 %v3140_v27  ;;  %v3210_v25 = vld [vmem:[%s4141_s1 + $0x278] sm:$0xff]  ;;  %v2220_v26 = vor.u32 %v3109_v18, %v2217_v19  ;;  %v2212_v27 = vor.u32 %v3108_v21, %v2209_v22  ;;  %v3216_v33 = vld [vmem:[%s4141_s1 + $0x2a8] sm:$0xff]  ;;  %v3199_v36 = vld [vmem:[%s4141_s1 + $0x220] sm:$0xff] }
  0x1e   :  { %1755 = vmatpush.bf16.msra.mxu0 %v3131_v28  ;;  %v3201_v28 = vld [vmem:[%s4141_s1 + $0x230] sm:$0xff]  ;;  %v3208_v35 = vld [vmem:[%s4141_s1 + $0x268] sm:$0xff]  ;;  %v3223_v38 = vld [vmem:[%s4141_s1 + $0x2e0] sm:$0xff] }
  0x1f   :  { %1783 = vmatpush.bf16.msra.mxu2 %v3147_v29  ;;  %v3217_v29 = vld [vmem:[%s4141_s1 + $0x2b0] sm:$0xff]  ;;  %v3207_v39 = vld [vmem:[%s4141_s1 + $0x260] sm:$0xff]  ;;  %v3248_v13 = vld [vmem:[%s4141_s1 + $0x3a8] sm:$0xff] }
  0x20   :  { %1797 = vmatpush.bf16.msra.mxu3 %v3155_v30  ;;  %v3225_v30 = vld [vmem:[%s4141_s1 + $0x2f0] sm:$0xff]  ;;  %v3256_v14 = vld [vmem:[%s4141_s1 + $0x3e8] sm:$0xff]  ;;  %v3231_v16 = vld [vmem:[%s4141_s1 + $0x320] sm:$0xff] }
  0x21   :  { %1769 = vmatpush.bf16.msra.mxu1 %v3139_v40  ;;  %1756 = vmatmul.bf16.vlgmr.msra.gmra.mxu0 %v2192_v41  ;;  %v3198_v40 = vld [vmem:[%s4141_s1 + $0x218] sm:$0xff]  ;;  %v3197_v44 = vld [vmem:[%s4141_s1 + $0x210] sm:$0xff]  ;;  %v3240_v15 = vld [vmem:[%s4141_s1 + $0x368] sm:$0xff] }
  0x22   :  { %1804 = vmatpush.bf16.msrb.mxu0 %v3170_v31  ;;  %1784 = vmatmul.bf16.vlgmr.msra.gmra.mxu2 %v2200_v43  ;;  %v3209_v31 = vld [vmem:[%s4141_s1 + $0x270] sm:$0xff]  ;;  %v3214_v41 = vld [vmem:[%s4141_s1 + $0x298] sm:$0xff]  ;;  %v3255_v18 = vld [vmem:[%s4141_s1 + $0x3e0] sm:$0xff] }
  0x23   :  { %1832 = vmatpush.bf16.msrb.mxu2 %v3186_v34  ;;  %1798 = vmatmul.bf16.vlgmr.msra.gmra.mxu3 %v2204_v47  ;;  %v3224_v34 = vld [vmem:[%s4141_s1 + $0x2e8] sm:$0xff]  ;;  %v3206_v43 = vld [vmem:[%s4141_s1 + $0x258] sm:$0xff]  ;;  %v3213_v45 = vld [vmem:[%s4141_s1 + $0x290] sm:$0xff] }
  0x24   :  { %1846 = vmatpush.bf16.msrb.mxu3 %v3194_v37  ;;  %1770 = vmatmul.bf16.vlgmr.msra.gmra.mxu1 %v2196_v50  ;;  %v3215_v37 = vld [vmem:[%s4141_s1 + $0x2a0] sm:$0xff]  ;;  %v3205_v47 = vld [vmem:[%s4141_s1 + $0x250] sm:$0xff]  ;;  %v3220_v50 = vld [vmem:[%s4141_s1 + $0x2c8] sm:$0xff] }
  0x25   :  { %1818 = vmatpush.bf16.msrb.mxu1 %v3178_v42  ;;  %v3222_v42 = vld [vmem:[%s4141_s1 + $0x2d8] sm:$0xff]  ;;  %v3239_v19 = vld [vmem:[%s4141_s1 + $0x360] sm:$0xff] }
  0x26   :  { %1805 = vmatpush.bf16.msrb.mxu0 %v3169_v46  ;;  %v3221_v46 = vld [vmem:[%s4141_s1 + $0x2d0] sm:$0xff]  ;;  %v3246_v21 = vld [vmem:[%s4141_s1 + $0x398] sm:$0xff] }
  0x27   :  { %1833 = vmatpush.bf16.msrb.mxu2 %v3185_v48  ;;  %v3196_v48 = vld [vmem:[%s4141_s1 + $0x208] sm:$0xff]  ;;  %v3254_v22 = vld [vmem:[%s4141_s1 + $0x3d8] sm:$0xff] }
  0x28   :  { %1847 = vmatpush.bf16.msrb.mxu3 %v3193_v49  ;;  %v3212_v49 = vld [vmem:[%s4141_s1 + $0x288] sm:$0xff] }
  0x29   :  { %1819 = vmatpush.bf16.msrb.mxu1 %v3177_v51  ;;  %v3204_v51 = vld [vmem:[%s4141_s1 + $0x248] sm:$0xff] }
  0x2a   :  { %1806 = vmatpush.bf16.msrb.mxu0 %v3168_v52  ;;  %v3195_v52 = vld [vmem:[%s4141_s1 + $0x200] sm:$0xff] }
  0x2b   :  { %1834 = vmatpush.bf16.msrb.mxu2 %v3184_v53  ;;  %v3211_v53 = vld [vmem:[%s4141_s1 + $0x280] sm:$0xff] }
  0x2c   :  { %1848 = vmatpush.bf16.msrb.mxu3 %v3192_v54  ;;  %v3219_v54 = vld [vmem:[%s4141_s1 + $0x2c0] sm:$0xff] }
  0x2d   :  { %1820 = vmatpush.bf16.msrb.mxu1 %v3176_v55  ;;  %v3234_v55 = vld [vmem:[%s4141_s1 + $0x338] sm:$0xff] }
  0x2e   :  { %1807 = vmatpush.bf16.msrb.mxu0 %v3167_v56  ;;  %v3250_v56 = vld [vmem:[%s4141_s1 + $0x3b8] sm:$0xff] }
  0x2f   :  { %1835 = vmatpush.bf16.msrb.mxu2 %v3183_v57  ;;  %v2223_v57 = vld [vmem:[%s4142_s0 + $0x20] sm:$0xf] }
  0x30   :  { %1849 = vmatpush.bf16.msrb.mxu3 %v3191_v58  ;;  %v3122_v58 = vld [vmem:[%s4142_s0 + $0x80] sm:$0xf0] }
  0x31   :  { %1821 = vmatpush.bf16.msrb.mxu1 %v3175_v59  ;;  %v2231_v59 = vld [vmem:[%s4142_s0 + $0x28] sm:$0xf] }
  0x32   :  { %1808 = vmatpush.bf16.msrb.mxu0 %v3166_v60  ;;  %v3123_v60 = vld [vmem:[%s4142_s0 + $0x88] sm:$0xf0] }
  0x33   :  { %1836 = vmatpush.bf16.msrb.mxu2 %v3182_v61  ;;  %v3258_v61 = vld [vmem:[%s4141_s1 + $0x3f8] sm:$0xff] }
  0x34   :  { %1850 = vmatpush.bf16.msrb.mxu3 %v3190_v62  ;;  %v3111_v62 = vld [vmem:[%s4142_s0 + $0x2c] sm:$0xf] }
  0x35   :  { %1822 = vmatpush.bf16.msrb.mxu1 %v3174_v63  ;;  %v2233_v63 = vld [vmem:[%s4142_s0 + $0x8c] sm:$0xf0] }
  0x36   :  { %1809 = vmatpush.bf16.msrb.mxu0 %v3165_v0  ;;  %v3203_v0 = vld [vmem:[%s4141_s1 + $0x240] sm:$0xff] }
  0x37   :  { %1837 = vmatpush.bf16.msrb.mxu2 %v3181_v1  ;;  %v3110_v1 = vld [vmem:[%s4142_s0 + $0x24] sm:$0xf] }
  0x38   :  { %1851 = vmatpush.bf16.msrb.mxu3 %v3189_v2  ;;  %v2225_v2 = vld [vmem:[%s4142_s0 + $0x84] sm:$0xf0] }
  0x39   :  { %1823 = vmatpush.bf16.msrb.mxu1 %v3173_v3  ;;  %v2224_v3 = vor.u32 %v3122_v58, %v2223_v57  ;;  %v3280_v57 = vld [vmem:[%s4141_s1 + $0x4a8] sm:$0xff] }
  0x3a   :  { %1810 = vmatpush.bf16.msrb.mxu0 %v3164_v4  ;;  %v2232_v4 = vor.u32 %v3123_v60, %v2231_v59  ;;  %v3288_v58 = vld [vmem:[%s4141_s1 + $0x4e8] sm:$0xff]  ;;  %v3263_v60 = vld [vmem:[%s4141_s1 + $0x420] sm:$0xff] }
  0x3b   :  { %1838 = vmatpush.bf16.msrb.mxu2 %v3180_v5  ;;  %v3242_v5 = vld [vmem:[%s4141_s1 + $0x378] sm:$0xff]  ;;  %v3272_v59 = vld [vmem:[%s4141_s1 + $0x468] sm:$0xff] }
  0x3c   :  { %1852 = vmatpush.bf16.msrb.mxu3 %v3188_v6  ;;  %v2236_v6 = vor.u32 %v3111_v62, %v2233_v63  ;;  %v3287_v62 = vld [vmem:[%s4141_s1 + $0x4e0] sm:$0xff] }
  0x3d   :  { %1824 = vmatpush.bf16.msrb.mxu1 %v3172_v7  ;;  %v2228_v7 = vor.u32 %v3110_v1, %v2225_v2  ;;  %v3271_v63 = vld [vmem:[%s4141_s1 + $0x460] sm:$0xff]  ;;  %v3278_v1 = vld [vmem:[%s4141_s1 + $0x498] sm:$0xff] }
  0x3e   :  { %1811 = vmatpush.bf16.msrb.mxu0 %v3163_v8  ;;  %v3233_v8 = vld [vmem:[%s4141_s1 + $0x330] sm:$0xff]  ;;  %v3286_v2 = vld [vmem:[%s4141_s1 + $0x4d8] sm:$0xff] }
  0x3f   :  { %1839 = vmatpush.bf16.msrb.mxu2 %v3179_v9  ;;  %v3249_v9 = vld [vmem:[%s4141_s1 + $0x3b0] sm:$0xff] }
  0x40   :  { %1853 = vmatpush.bf16.msrb.mxu3 %v3187_v10  ;;  %v3257_v10 = vld [vmem:[%s4141_s1 + $0x3f0] sm:$0xff] }
  0x41   :  { %1825 = vmatpush.bf16.msrb.mxu1 %v3171_v20  ;;  %1812 = vmatmul.bf16.vlgmr.msrb.gmra.mxu0 %v2208_v23  ;;  %v3230_v20 = vld [vmem:[%s4141_s1 + $0x318] sm:$0xff] }
  0x42   :  { %1860 = vmatpush.bf16.msra.mxu0 %v3202_v11  ;;  %1840 = vmatmul.bf16.vlgmr.msrb.gmra.mxu2 %v2216_v24  ;;  %v3241_v11 = vld [vmem:[%s4141_s1 + $0x370] sm:$0xff]  ;;  %v3238_v23 = vld [vmem:[%s4141_s1 + $0x358] sm:$0xff] }
  0x43   :  { %1888 = vmatpush.bf16.msra.mxu2 %v3218_v12  ;;  %1854 = vmatmul.bf16.vlgmr.msrb.gmra.mxu3 %v2220_v26  ;;  %v3232_v12 = vld [vmem:[%s4141_s1 + $0x328] sm:$0xff]  ;;  %v3229_v24 = vld [vmem:[%s4141_s1 + $0x310] sm:$0xff] }
  0x44   :  { %1902 = vmatpush.bf16.msra.mxu3 %v3226_v17  ;;  %1826 = vmatmul.bf16.vlgmr.msrb.gmra.mxu1 %v2212_v27  ;;  %v3247_v17 = vld [vmem:[%s4141_s1 + $0x3a0] sm:$0xff]  ;;  %v3253_v26 = vld [vmem:[%s4141_s1 + $0x3d0] sm:$0xff] }
  0x45   :  { %1874 = vmatpush.bf16.msra.mxu1 %v3210_v25  ;;  %v3245_v25 = vld [vmem:[%s4141_s1 + $0x390] sm:$0xff] }
  0x46   :  { %1861 = vmatpush.bf16.msra.mxu0 %v3201_v28  ;;  %v3237_v27 = vld [vmem:[%s4141_s1 + $0x350] sm:$0xff]  ;;  %v3228_v28 = vld [vmem:[%s4141_s1 + $0x308] sm:$0xff] }
  0x47   :  { %1889 = vmatpush.bf16.msra.mxu2 %v3217_v29  ;;  %v3244_v29 = vld [vmem:[%s4141_s1 + $0x388] sm:$0xff] }
  0x48   :  { %1903 = vmatpush.bf16.msra.mxu3 %v3225_v30  ;;  %v3252_v30 = vld [vmem:[%s4141_s1 + $0x3c8] sm:$0xff] }
  0x49   :  { %1875 = vmatpush.bf16.msra.mxu1 %v3209_v31  ;;  %v3236_v31 = vld [vmem:[%s4141_s1 + $0x348] sm:$0xff] }
  0x4a   :  { %1862 = vmatpush.bf16.msra.mxu0 %v3200_v32  ;;  %v3227_v32 = vld [vmem:[%s4141_s1 + $0x300] sm:$0xff] }
  0x4b   :  { %1890 = vmatpush.bf16.msra.mxu2 %v3216_v33  ;;  %v3243_v33 = vld [vmem:[%s4141_s1 + $0x380] sm:$0xff] }
  0x4c   :  { %1904 = vmatpush.bf16.msra.mxu3 %v3224_v34  ;;  %v3251_v34 = vld [vmem:[%s4141_s1 + $0x3c0] sm:$0xff] }
  0x4d   :  { %1876 = vmatpush.bf16.msra.mxu1 %v3208_v35  ;;  %v3266_v35 = vld [vmem:[%s4141_s1 + $0x438] sm:$0xff] }
  0x4e   :  { %1863 = vmatpush.bf16.msra.mxu0 %v3199_v36  ;;  %v3282_v36 = vld [vmem:[%s4141_s1 + $0x4b8] sm:$0xff] }
  0x4f   :  { %1891 = vmatpush.bf16.msra.mxu2 %v3215_v37  ;;  %v2239_v37 = vld [vmem:[%s4142_s0 + $0x30] sm:$0xf] }
  0x50   :  { %1905 = vmatpush.bf16.msra.mxu3 %v3223_v38  ;;  %v3124_v38 = vld [vmem:[%s4142_s0 + $0x90] sm:$0xf0] }
  0x51   :  { %1877 = vmatpush.bf16.msra.mxu1 %v3207_v39  ;;  %v2247_v39 = vld [vmem:[%s4142_s0 + $0x38] sm:$0xf] }
  0x52   :  { %1864 = vmatpush.bf16.msra.mxu0 %v3198_v40  ;;  %v3125_v40 = vld [vmem:[%s4142_s0 + $0x98] sm:$0xf0] }
  0x53   :  { %1892 = vmatpush.bf16.msra.mxu2 %v3214_v41  ;;  %v3290_v41 = vld [vmem:[%s4141_s1 + $0x4f8] sm:$0xff] }
  0x54   :  { %1906 = vmatpush.bf16.msra.mxu3 %v3222_v42  ;;  %v3113_v42 = vld [vmem:[%s4142_s0 + $0x3c] sm:$0xf] }
  0x55   :  { %1878 = vmatpush.bf16.msra.mxu1 %v3206_v43  ;;  %v2249_v43 = vld [vmem:[%s4142_s0 + $0x9c] sm:$0xf0] }
  0x56   :  { %1865 = vmatpush.bf16.msra.mxu0 %v3197_v44  ;;  %v3235_v44 = vld [vmem:[%s4141_s1 + $0x340] sm:$0xff] }
  0x57   :  { %1893 = vmatpush.bf16.msra.mxu2 %v3213_v45  ;;  %v3112_v45 = vld [vmem:[%s4142_s0 + $0x34] sm:$0xf] }
  0x58   :  { %1907 = vmatpush.bf16.msra.mxu3 %v3221_v46  ;;  %v2241_v46 = vld [vmem:[%s4142_s0 + $0x94] sm:$0xf0] }
  0x59   :  { %1879 = vmatpush.bf16.msra.mxu1 %v3205_v47  ;;  %v2240_v47 = vor.u32 %v3124_v38, %v2239_v37  ;;  %v3312_v37 = vld [vmem:[%s4141_s1 + $0x5a8] sm:$0xff] }
  0x5a   :  { %1866 = vmatpush.bf16.msra.mxu0 %v3196_v48  ;;  %v2248_v48 = vor.u32 %v3125_v40, %v2247_v39  ;;  %v3320_v38 = vld [vmem:[%s4141_s1 + $0x5e8] sm:$0xff]  ;;  %v3295_v40 = vld [vmem:[%s4141_s1 + $0x520] sm:$0xff] }
  0x5b   :  { %1894 = vmatpush.bf16.msra.mxu2 %v3212_v49  ;;  %v3274_v49 = vld [vmem:[%s4141_s1 + $0x478] sm:$0xff]  ;;  %v3304_v39 = vld [vmem:[%s4141_s1 + $0x568] sm:$0xff] }
  0x5c   :  { %1908 = vmatpush.bf16.msra.mxu3 %v3220_v50  ;;  %v2252_v50 = vor.u32 %v3113_v42, %v2249_v43  ;;  %v3319_v42 = vld [vmem:[%s4141_s1 + $0x5e0] sm:$0xff] }
  0x5d   :  { %1880 = vmatpush.bf16.msra.mxu1 %v3204_v51  ;;  %v2244_v51 = vor.u32 %v3112_v45, %v2241_v46  ;;  %v3303_v43 = vld [vmem:[%s4141_s1 + $0x560] sm:$0xff]  ;;  %v3310_v45 = vld [vmem:[%s4141_s1 + $0x598] sm:$0xff] }
  0x5e   :  { %1867 = vmatpush.bf16.msra.mxu0 %v3195_v52  ;;  %v3265_v52 = vld [vmem:[%s4141_s1 + $0x430] sm:$0xff]  ;;  %v3318_v46 = vld [vmem:[%s4141_s1 + $0x5d8] sm:$0xff] }
  0x5f   :  { %1895 = vmatpush.bf16.msra.mxu2 %v3211_v53  ;;  %v3281_v53 = vld [vmem:[%s4141_s1 + $0x4b0] sm:$0xff] }
  0x60   :  { %1909 = vmatpush.bf16.msra.mxu3 %v3219_v54  ;;  %v3289_v54 = vld [vmem:[%s4141_s1 + $0x4f0] sm:$0xff] }
  0x61   :  { %1881 = vmatpush.bf16.msra.mxu1 %v3203_v0  ;;  %1868 = vmatmul.bf16.vlgmr.msra.gmra.mxu0 %v2224_v3  ;;  %v3262_v0 = vld [vmem:[%s4141_s1 + $0x418] sm:$0xff] }
  0x62   :  { %1916 = vmatpush.bf16.msrb.mxu0 %v3234_v55  ;;  %1896 = vmatmul.bf16.vlgmr.msra.gmra.mxu2 %v2232_v4  ;;  %v3273_v55 = vld [vmem:[%s4141_s1 + $0x470] sm:$0xff]  ;;  %v3270_v3 = vld [vmem:[%s4141_s1 + $0x458] sm:$0xff] }
  0x63   :  { %1944 = vmatpush.bf16.msrb.mxu2 %v3250_v56  ;;  %1910 = vmatmul.bf16.vlgmr.msra.gmra.mxu3 %v2236_v6  ;;  %v3264_v56 = vld [vmem:[%s4141_s1 + $0x428] sm:$0xff]  ;;  %v3261_v4 = vld [vmem:[%s4141_s1 + $0x410] sm:$0xff] }
  0x64   :  { %1958 = vmatpush.bf16.msrb.mxu3 %v3258_v61  ;;  %1882 = vmatmul.bf16.vlgmr.msra.gmra.mxu1 %v2228_v7  ;;  %v3279_v61 = vld [vmem:[%s4141_s1 + $0x4a0] sm:$0xff]  ;;  %v3285_v6 = vld [vmem:[%s4141_s1 + $0x4d0] sm:$0xff] }
  0x65   :  { %1930 = vmatpush.bf16.msrb.mxu1 %v3242_v5  ;;  %v3277_v5 = vld [vmem:[%s4141_s1 + $0x490] sm:$0xff] }
  0x66   :  { %1917 = vmatpush.bf16.msrb.mxu0 %v3233_v8  ;;  %v3269_v7 = vld [vmem:[%s4141_s1 + $0x450] sm:$0xff]  ;;  %v3260_v8 = vld [vmem:[%s4141_s1 + $0x408] sm:$0xff] }
  0x67   :  { %1945 = vmatpush.bf16.msrb.mxu2 %v3249_v9  ;;  %v3276_v9 = vld [vmem:[%s4141_s1 + $0x488] sm:$0xff] }
  0x68   :  { %1959 = vmatpush.bf16.msrb.mxu3 %v3257_v10  ;;  %v3284_v10 = vld [vmem:[%s4141_s1 + $0x4c8] sm:$0xff] }
  0x69   :  { %1931 = vmatpush.bf16.msrb.mxu1 %v3241_v11  ;;  %v3268_v11 = vld [vmem:[%s4141_s1 + $0x448] sm:$0xff] }
  0x6a   :  { %1918 = vmatpush.bf16.msrb.mxu0 %v3232_v12  ;;  %v3259_v12 = vld [vmem:[%s4141_s1 + $0x400] sm:$0xff] }
  0x6b   :  { %1946 = vmatpush.bf16.msrb.mxu2 %v3248_v13  ;;  %v3275_v13 = vld [vmem:[%s4141_s1 + $0x480] sm:$0xff] }
  0x6c   :  { %1960 = vmatpush.bf16.msrb.mxu3 %v3256_v14  ;;  %v3283_v14 = vld [vmem:[%s4141_s1 + $0x4c0] sm:$0xff] }
  0x6d   :  { %1932 = vmatpush.bf16.msrb.mxu1 %v3240_v15  ;;  %v3298_v15 = vld [vmem:[%s4141_s1 + $0x538] sm:$0xff] }
  0x6e   :  { %1919 = vmatpush.bf16.msrb.mxu0 %v3231_v16  ;;  %v3314_v16 = vld [vmem:[%s4141_s1 + $0x5b8] sm:$0xff] }
  0x6f   :  { %1947 = vmatpush.bf16.msrb.mxu2 %v3247_v17  ;;  %v2255_v17 = vld [vmem:[%s4142_s0 + $0x40] sm:$0xf] }
  0x70   :  { %1961 = vmatpush.bf16.msrb.mxu3 %v3255_v18  ;;  %v3126_v18 = vld [vmem:[%s4142_s0 + $0xa0] sm:$0xf0] }
  0x71   :  { %1933 = vmatpush.bf16.msrb.mxu1 %v3239_v19  ;;  %v2263_v19 = vld [vmem:[%s4142_s0 + $0x48] sm:$0xf] }
  0x72   :  { %1920 = vmatpush.bf16.msrb.mxu0 %v3230_v20  ;;  %v3127_v20 = vld [vmem:[%s4142_s0 + $0xa8] sm:$0xf0] }
  0x73   :  { %1948 = vmatpush.bf16.msrb.mxu2 %v3246_v21  ;;  %v3322_v21 = vld [vmem:[%s4141_s1 + $0x5f8] sm:$0xff] }
  0x74   :  { %1962 = vmatpush.bf16.msrb.mxu3 %v3254_v22  ;;  %v3115_v22 = vld [vmem:[%s4142_s0 + $0x4c] sm:$0xf] }
  0x75   :  { %1934 = vmatpush.bf16.msrb.mxu1 %v3238_v23  ;;  %v2265_v23 = vld [vmem:[%s4142_s0 + $0xac] sm:$0xf0] }
  0x76   :  { %1921 = vmatpush.bf16.msrb.mxu0 %v3229_v24  ;;  %v3267_v24 = vld [vmem:[%s4141_s1 + $0x440] sm:$0xff] }
  0x77   :  { %1949 = vmatpush.bf16.msrb.mxu2 %v3245_v25  ;;  %v3114_v25 = vld [vmem:[%s4142_s0 + $0x44] sm:$0xf] }
  0x78   :  { %1963 = vmatpush.bf16.msrb.mxu3 %v3253_v26  ;;  %v2257_v26 = vld [vmem:[%s4142_s0 + $0xa4] sm:$0xf0] }
  0x79   :  { %1935 = vmatpush.bf16.msrb.mxu1 %v3237_v27  ;;  %v2256_v27 = vor.u32 %v3126_v18, %v2255_v17 }
  0x7a   :  { %1922 = vmatpush.bf16.msrb.mxu0 %v3228_v28  ;;  %v2264_v28 = vor.u32 %v3127_v20, %v2263_v19 }
  0x7b   :  { %1950 = vmatpush.bf16.msrb.mxu2 %v3244_v29  ;;  %v3306_v29 = vld [vmem:[%s4141_s1 + $0x578] sm:$0xff] }
  0x7c   :  { %1964 = vmatpush.bf16.msrb.mxu3 %v3252_v30  ;;  %v2268_v30 = vor.u32 %v3115_v22, %v2265_v23 }
  0x7d   :  { %1936 = vmatpush.bf16.msrb.mxu1 %v3236_v31  ;;  %v2260_v31 = vor.u32 %v3114_v25, %v2257_v26 }
  0x7e   :  { %1923 = vmatpush.bf16.msrb.mxu0 %v3227_v32  ;;  %v3297_v32 = vld [vmem:[%s4141_s1 + $0x530] sm:$0xff] }
  0x7f   :  { %1951 = vmatpush.bf16.msrb.mxu2 %v3243_v33  ;;  %v3313_v33 = vld [vmem:[%s4141_s1 + $0x5b0] sm:$0xff] }
  0x80   :  { %1965 = vmatpush.bf16.msrb.mxu3 %v3251_v34  ;;  %v3321_v34 = vld [vmem:[%s4141_s1 + $0x5f0] sm:$0xff] }
  0x81   :  { %1937 = vmatpush.bf16.msrb.mxu1 %v3235_v44  ;;  %1924 = vmatmul.bf16.vlgmr.msrb.gmra.mxu0 %v2240_v47  ;;  %v3294_v44 = vld [vmem:[%s4141_s1 + $0x518] sm:$0xff] }
  0x82   :  { %1972 = vmatpush.bf16.msra.mxu0 %v3266_v35  ;;  %1952 = vmatmul.bf16.vlgmr.msrb.gmra.mxu2 %v2248_v48  ;;  %v3305_v35 = vld [vmem:[%s4141_s1 + $0x570] sm:$0xff]  ;;  %v3302_v47 = vld [vmem:[%s4141_s1 + $0x558] sm:$0xff] }
  0x83   :  { %2000 = vmatpush.bf16.msra.mxu2 %v3282_v36  ;;  %1966 = vmatmul.bf16.vlgmr.msrb.gmra.mxu3 %v2252_v50  ;;  %v3296_v36 = vld [vmem:[%s4141_s1 + $0x528] sm:$0xff]  ;;  %v3293_v48 = vld [vmem:[%s4141_s1 + $0x510] sm:$0xff] }
  0x84   :  { %2014 = vmatpush.bf16.msra.mxu3 %v3290_v41  ;;  %1938 = vmatmul.bf16.vlgmr.msrb.gmra.mxu1 %v2244_v51  ;;  %v3311_v41 = vld [vmem:[%s4141_s1 + $0x5a0] sm:$0xff]  ;;  %v3317_v50 = vld [vmem:[%s4141_s1 + $0x5d0] sm:$0xff] }
  0x85   :  { %1986 = vmatpush.bf16.msra.mxu1 %v3274_v49  ;;  %v3309_v49 = vld [vmem:[%s4141_s1 + $0x590] sm:$0xff] }
  0x86   :  { %1973 = vmatpush.bf16.msra.mxu0 %v3265_v52  ;;  %v3301_v51 = vld [vmem:[%s4141_s1 + $0x550] sm:$0xff]  ;;  %v3292_v52 = vld [vmem:[%s4141_s1 + $0x508] sm:$0xff] }
  0x87   :  { %2001 = vmatpush.bf16.msra.mxu2 %v3281_v53  ;;  %v3308_v53 = vld [vmem:[%s4141_s1 + $0x588] sm:$0xff] }
  0x88   :  { %2015 = vmatpush.bf16.msra.mxu3 %v3289_v54  ;;  %v3316_v54 = vld [vmem:[%s4141_s1 + $0x5c8] sm:$0xff] }
  0x89   :  { %1987 = vmatpush.bf16.msra.mxu1 %v3273_v55  ;;  %v3300_v55 = vld [vmem:[%s4141_s1 + $0x548] sm:$0xff] }
  0x8a   :  { %1974 = vmatpush.bf16.msra.mxu0 %v3264_v56  ;;  %v3291_v56 = vld [vmem:[%s4141_s1 + $0x500] sm:$0xff] }
  0x8b   :  { %2002 = vmatpush.bf16.msra.mxu2 %v3280_v57  ;;  %v3307_v57 = vld [vmem:[%s4141_s1 + $0x580] sm:$0xff] }
  0x8c   :  { %2016 = vmatpush.bf16.msra.mxu3 %v3288_v58  ;;  %v3315_v58 = vld [vmem:[%s4141_s1 + $0x5c0] sm:$0xff] }
  0x8d   :  { %1988 = vmatpush.bf16.msra.mxu1 %v3272_v59  ;;  %v2271_v59 = vld [vmem:[%s4142_s0 + $0x50] sm:$0xf] }
  0x8e   :  { %1975 = vmatpush.bf16.msra.mxu0 %v3263_v60  ;;  %v3128_v60 = vld [vmem:[%s4142_s0 + $0xb0] sm:$0xf0] }
  0x8f   :  { %2003 = vmatpush.bf16.msra.mxu2 %v3279_v61  ;;  %v2279_v61 = vld [vmem:[%s4142_s0 + $0x58] sm:$0xf] }
  0x90   :  { %2017 = vmatpush.bf16.msra.mxu3 %v3287_v62  ;;  %v3129_v62 = vld [vmem:[%s4142_s0 + $0xb8] sm:$0xf0] }
  0x91   :  { %1989 = vmatpush.bf16.msra.mxu1 %v3271_v63  ;;  %v3117_v63 = vld [vmem:[%s4142_s0 + $0x5c] sm:$0xf] }
  0x92   :  { %1976 = vmatpush.bf16.msra.mxu0 %v3262_v0  ;;  %v2281_v0 = vld [vmem:[%s4142_s0 + $0xbc] sm:$0xf0] }
  0x93   :  { %2004 = vmatpush.bf16.msra.mxu2 %v3278_v1  ;;  %v3326_v1 = vld [vmem:[%s4141_s1 + $0x618] sm:$0xff] }
  0x94   :  { %2018 = vmatpush.bf16.msra.mxu3 %v3286_v2  ;;  %v3299_v2 = vld [vmem:[%s4141_s1 + $0x540] sm:$0xff] }
  0x95   :  { %1990 = vmatpush.bf16.msra.mxu1 %v3270_v3  ;;  %v2272_v3 = vor.u32 %v3128_v60, %v2271_v59 }
  0x96   :  { %1977 = vmatpush.bf16.msra.mxu0 %v3261_v4  ;;  %v3116_v4 = vld [vmem:[%s4142_s0 + $0x54] sm:$0xf] }
  0x97   :  { %2005 = vmatpush.bf16.msra.mxu2 %v3277_v5  ;;  %v2273_v5 = vld [vmem:[%s4142_s0 + $0xb4] sm:$0xf0] }
  0x98   :  { %2019 = vmatpush.bf16.msra.mxu3 %v3285_v6  ;;  %v2280_v6 = vor.u32 %v3129_v62, %v2279_v61 }
  0x99   :  { %1991 = vmatpush.bf16.msra.mxu1 %v3269_v7  ;;  %v2284_v7 = vor.u32 %v3117_v63, %v2281_v0  ;;  %v3332_v63 = vld [vmem:[%s4145_s3 + $0x28] sm:$0xff] }
  0x9a   :  { %1978 = vmatpush.bf16.msra.mxu0 %v3260_v8  ;;  %v2276_v8 = vor.u32 %v3116_v4, %v2273_v5  ;;  %v3331_v4 = vld [vmem:[%s4145_s3 + $0x20] sm:$0xff] }
  0x9b   :  { %2006 = vmatpush.bf16.msra.mxu2 %v3276_v9  ;;  %v3325_v9 = vld [vmem:[%s4141_s1 + $0x610] sm:$0xff] }
  0x9c   :  { %2020 = vmatpush.bf16.msra.mxu3 %v3284_v10  ;;  %v3324_v10 = vld [vmem:[%s4141_s1 + $0x608] sm:$0xff] }
  0x9d   :  { %1992 = vmatpush.bf16.msra.mxu1 %v3268_v11  ;;  %v3323_v11 = vld [vmem:[%s4141_s1 + $0x600] sm:$0xff] }
  0x9e   :  { %1979 = vmatpush.bf16.msra.mxu0 %v3259_v12  ;;  %v2287_v12 = vld [vmem:[%s4142_s0 + $0x60] sm:$0xf] }
  0x9f   :  { %2007 = vmatpush.bf16.msra.mxu2 %v3275_v13  ;;  %v3130_v13 = vld [vmem:[%s4142_s0 + $0xc0] sm:$0xf0] }
  0xa0   :  { %2021 = vmatpush.bf16.msra.mxu3 %v3283_v14  ;;  %v2288_v14 = vor.u32 %v3130_v13, %v2287_v12 }
  0xa1   :  { %1993 = vmatpush.bf16.msra.mxu1 %v3267_v24  ;;  %1980 = vmatmul.bf16.vlgmr.msra.gmra.mxu0 %v2256_v27 }
  0xa2   :  { %2028 = vmatpush.bf16.msrb.mxu0 %v3298_v15  ;;  %2008 = vmatmul.bf16.vlgmr.msra.gmra.mxu2 %v2264_v28  ;;  %v1757_v15 = vpop.f32.mrf.mxu0  ;;  %v3335_v28 = vld [vmem:[%s4143_s2] ss:$0 sm:$0xff] }
  0xa3   :  { %2056 = vmatpush.bf16.msrb.mxu2 %v3314_v16  ;;  %2022 = vmatmul.bf16.vlgmr.msra.gmra.mxu3 %v2268_v30  ;;  %v1771_v16 = vpop.f32.mrf.mxu1  ;;  %v1758_v30 = vadd.f32 %v3335_v28, %v1757_v15 }
  0xa4   :  { %2070 = vmatpush.bf16.msrb.mxu3 %v3322_v21  ;;  %1994 = vmatmul.bf16.vlgmr.msra.gmra.mxu1 %v2260_v31 }
  0xa5   :  { %2042 = vmatpush.bf16.msrb.mxu1 %v3306_v29  ;;  %v1785_v17 = vpop.f32.mrf.mxu2 }
  0xa6   :  { %2029 = vmatpush.bf16.msrb.mxu0 %v3297_v32  ;;  %v1799_v19 = vpop.f32.mrf.mxu3 }
  0xa7   :  { %2057 = vmatpush.bf16.msrb.mxu2 %v3313_v33  ;;  %v1772_v33 = vadd.f32 %v1771_v16, %v1758_v30  ;;  %v3329_v16 = vld [vmem:[%s4145_s3 + $0x10] sm:$0xff] }
  0xa8   :  { %2071 = vmatpush.bf16.msrb.mxu3 %v3321_v34 }
  0xa9   :  { %2043 = vmatpush.bf16.msrb.mxu1 %v3305_v35 }
  0xaa   :  { %2030 = vmatpush.bf16.msrb.mxu0 %v3296_v36  ;;  %v1759_v18 = vpop.f32.mrf.mxu0 }
  0xab   :  { %2058 = vmatpush.bf16.msrb.mxu2 %v3312_v37  ;;  %v1773_v20 = vpop.f32.mrf.mxu1  ;;  %v1760_v36 = vadd.f32 %v3335_v28, %v1759_v18  ;;  %v1786_v37 = vadd.f32 %v1785_v17, %v1772_v33 }
  0xac   :  { %2072 = vmatpush.bf16.msrb.mxu3 %v3320_v38 }
  0xad   :  { %2044 = vmatpush.bf16.msrb.mxu1 %v3304_v39  ;;  %v1787_v21 = vpop.f32.mrf.mxu2  ;;  %v1774_v39 = vadd.f32 %v1773_v20, %v1760_v36  ;;  %v3328_v20 = vld [vmem:[%s4145_s3 + $0x8] sm:$0xff] }
  0xae   :  { %2031 = vmatpush.bf16.msrb.mxu0 %v3295_v40  ;;  %v1801_v23 = vpop.f32.mrf.mxu3 }
  0xaf   :  { %2059 = vmatpush.bf16.msrb.mxu2 %v3311_v41  ;;  %v1800_v41 = vadd.f32 %v1799_v19, %v1786_v37 }
  0xb0   :  { %2073 = vmatpush.bf16.msrb.mxu3 %v3319_v42 }
  0xb1   :  { %2045 = vmatpush.bf16.msrb.mxu1 %v3303_v43  ;;  %v1788_v43 = vadd.f32 %v1787_v21, %v1774_v39 }
  0xb2   :  { %2032 = vmatpush.bf16.msrb.mxu0 %v3294_v44 }
  0xb3   :  { %2060 = vmatpush.bf16.msrb.mxu2 %v3310_v45 }
  0xb4   :  { %2074 = vmatpush.bf16.msrb.mxu3 %v3318_v46  ;;  %v1802_v46 = vadd.f32 %v1801_v23, %v1788_v43 }
  0xb5   :  { %2046 = vmatpush.bf16.msrb.mxu1 %v3302_v47 }
  0xb6   :  { %2033 = vmatpush.bf16.msrb.mxu0 %v3293_v48 }
  0xb7   :  { %2061 = vmatpush.bf16.msrb.mxu2 %v3309_v49 }
  0xb8   :  { %2075 = vmatpush.bf16.msrb.mxu3 %v3317_v50 }
  0xb9   :  { %2047 = vmatpush.bf16.msrb.mxu1 %v3301_v51  ;;  %v3334_v51 = vld [vmem:[%s4145_s3 + $0x38] sm:$0xff] }
  0xba   :  { %2034 = vmatpush.bf16.msrb.mxu0 %v3292_v52 }
  0xbb   :  { %2062 = vmatpush.bf16.msrb.mxu2 %v3308_v53 }
  0xbc   :  { %2076 = vmatpush.bf16.msrb.mxu3 %v3316_v54 }
  0xbd   :  { %2048 = vmatpush.bf16.msrb.mxu1 %v3300_v55 }
  0xbe   :  { %2035 = vmatpush.bf16.msrb.mxu0 %v3291_v56  ;;  %v1813_v22 = vpop.f32.mrf.mxu0 }
  0xbf   :  { %2063 = vmatpush.bf16.msrb.mxu2 %v3307_v57  ;;  %v1814_v45 = vadd.f32 %v1813_v22, %v1800_v41 }
  0xc0   :  { %2077 = vmatpush.bf16.msrb.mxu3 %v3315_v58  ;;  %v3333_v58 = vld [vmem:[%s4145_s3 + $0x30] sm:$0xff] }
  0xc1   :  { %2049 = vmatpush.bf16.msrb.mxu1 %v3299_v2  ;;  %2036 = vmatmul.bf16.vlgmr.msrb.gmra.mxu0 %v2272_v3  ;;  %v1827_v24 = vpop.f32.mrf.mxu1 }
  0xc2   :  { %2088 = vmatpush.bf16.msra.mxu0 %v3326_v1  ;;  %2064 = vmatmul.bf16.vlgmr.msrb.gmra.mxu2 %v2280_v6  ;;  %v1828_v49 = vadd.f32 %v1827_v24, %v1814_v45 }
  0xc3   :  { %2078 = vmatmul.bf16.vlgmr.msrb.gmra.mxu3 %v2284_v7 }
  0xc4   :  { %2050 = vmatmul.bf16.vlgmr.msrb.gmra.mxu1 %v2276_v8 }
  0xc5   :  { %v1841_v25 = vpop.f32.mrf.mxu2  ;;  %2169 = vmatpush.bf16.msra.mxu1 %v3334_v51 }
  0xc6   :  { %2089 = vmatpush.bf16.msra.mxu0 %v3325_v9  ;;  %v1815_v26 = vpop.f32.mrf.mxu0  ;;  %v1855_v27 = vpop.f32.mrf.mxu3  ;;  %v1842_v54 = vadd.f32 %v1841_v25, %v1828_v49 }
  0xc7   :  { %v1816_v50 = vadd.f32 %v1815_v26, %v1802_v46  ;;  %v3327_v26 = vld [vmem:[%s4145_s3] sm:$0xff] }
  0xc8   :  { %v1856_v59 = vadd.f32 %v1855_v27, %v1842_v54 }
  0xc9   :  { %v1829_v29 = vpop.f32.mrf.mxu1  ;;  %2170 = vmatpush.bf16.msra.mxu1 %v3333_v58 }
  0xca   :  { %2090 = vmatpush.bf16.msra.mxu0 %v3324_v10  ;;  %v1830_v55 = vadd.f32 %v1829_v29, %v1816_v50  ;;  %v3330_v10 = vld [vmem:[%s4145_s3 + $0x18] sm:$0xff] }
  0xcd   :  { %v1843_v31 = vpop.f32.mrf.mxu2  ;;  %2171 = vmatpush.bf16.msra.mxu1 %v3332_v63  ;;  %v3336_v63 = vld [vmem:[%s4144_s4] ss:$0 sm:$0xff] }
  0xce   :  { %2091 = vmatpush.bf16.msra.mxu0 %v3323_v11  ;;  %v1857_v34 = vpop.f32.mrf.mxu3  ;;  %v1844_v56 = vadd.f32 %v1843_v31, %v1830_v55 }
  0xd0   :  { %v1858_v61 = vadd.f32 %v1857_v34, %v1844_v56 }
  0xd1   :  { %3073 = vmatmul.msk.bf16.vlgmr.msra.gmra.mxu0 %vm1744_vm0, %v2288_v14  ;;  %2172 = vmatpush.bf16.msra.mxu1 %v3331_v4 }
  0xd5   :  { %2173 = vmatpush.bf16.msra.mxu1 %v3330_v10 }
  0xd9   :  { %2174 = vmatpush.bf16.msra.mxu1 %v3329_v16 }
  0xdd   :  { %2175 = vmatpush.bf16.msra.mxu1 %v3328_v20 }
  0xde   :  { %v1869_v32 = vpop.f32.mrf.mxu0 }
  0xdf   :  { %v1870_v62 = vadd.f32 %v1869_v32, %v1856_v59 }
  0xe1   :  { %v1883_v35 = vpop.f32.mrf.mxu1  ;;  %2176 = vmatpush.bf16.msra.mxu1 %v3327_v26 }
  0xe2   :  { %v1884_v3 = vadd.f32 %v1883_v35, %v1870_v62 }
  0xe5   :  { %v1897_v38 = vpop.f32.mrf.mxu2 }
  0xe6   :  { %v1871_v40 = vpop.f32.mrf.mxu0  ;;  %v1911_v42 = vpop.f32.mrf.mxu3  ;;  %v1898_v5 = vadd.f32 %v1897_v38, %v1884_v3 }
  0xe7   :  { %v1872_v1 = vadd.f32 %v1871_v40, %v1858_v61 }
  0xe8   :  { %v1912_v11 = vadd.f32 %v1911_v42, %v1898_v5 }
  0xe9   :  { %v1885_v44 = vpop.f32.mrf.mxu1 }
  0xea   :  { %v1886_v6 = vadd.f32 %v1885_v44, %v1872_v1 }
  0xed   :  { %v1899_v47 = vpop.f32.mrf.mxu2 }
  0xee   :  { %v1913_v52 = vpop.f32.mrf.mxu3  ;;  %v1900_v9 = vadd.f32 %v1899_v47, %v1886_v6 }
  0xf0   :  { %v1914_v14 = vadd.f32 %v1913_v52, %v1900_v9 }
  0xfe   :  { %v1925_v48 = vpop.f32.mrf.mxu0 }
  0xff   :  { %v1926_v15 = vadd.f32 %v1925_v48, %v1912_v11 }
 0x101   :  { %v1939_v53 = vpop.f32.mrf.mxu1 }
 0x102   :  { %v1940_v19 = vadd.f32 %v1939_v53, %v1926_v15 }
 0x105   :  { %v1953_v57 = vpop.f32.mrf.mxu2 }
 0x106   :  { %v1927_v60 = vpop.f32.mrf.mxu0  ;;  %v1967_v0 = vpop.f32.mrf.mxu3  ;;  %v1954_v22 = vadd.f32 %v1953_v57, %v1940_v19 }
 0x107   :  { %v1928_v17 = vadd.f32 %v1927_v60, %v1914_v14 }
 0x108   :  { %v1968_v28 = vadd.f32 %v1967_v0, %v1954_v22 }
 0x109   :  { %v1941_v2 = vpop.f32.mrf.mxu1 }
 0x10a   :  { %v1942_v23 = vadd.f32 %v1941_v2, %v1928_v17 }
 0x10d   :  { %v1955_v7 = vpop.f32.mrf.mxu2 }
 0x10e   :  { %v1969_v12 = vpop.f32.mrf.mxu3  ;;  %v1956_v25 = vadd.f32 %v1955_v7, %v1942_v23 }
 0x110   :  { %v1970_v29 = vadd.f32 %v1969_v12, %v1956_v25 }
 0x11e   :  { %v1981_v8 = vpop.f32.mrf.mxu0 }
 0x11f   :  { %v1982_v30 = vadd.f32 %v1981_v8, %v1968_v28 }
 0x121   :  { %v1995_v13 = vpop.f32.mrf.mxu1 }
 0x122   :  { %v1996_v34 = vadd.f32 %v1995_v13, %v1982_v30 }
 0x125   :  { %v2009_v18 = vpop.f32.mrf.mxu2 }
 0x126   :  { %v1983_v21 = vpop.f32.mrf.mxu0  ;;  %v2023_v24 = vpop.f32.mrf.mxu3  ;;  %v2010_v37 = vadd.f32 %v2009_v18, %v1996_v34 }
 0x127   :  { %v1984_v33 = vadd.f32 %v1983_v21, %v1970_v29 }
 0x128   :  { %v2024_v42 = vadd.f32 %v2023_v24, %v2010_v37 }
 0x129   :  { %v1997_v27 = vpop.f32.mrf.mxu1 }
 0x12a   :  { %v1998_v38 = vadd.f32 %v1997_v27, %v1984_v33 }
 0x12d   :  { %v2011_v31 = vpop.f32.mrf.mxu2 }
 0x12e   :  { %v2025_v35 = vpop.f32.mrf.mxu3  ;;  %v2012_v39 = vadd.f32 %v2011_v31, %v1998_v38 }
 0x130   :  { %v2026_v43 = vadd.f32 %v2025_v35, %v2012_v39 }
 0x13e   :  { %v2037_v32 = vpop.f32.mrf.mxu0 }
 0x13f   :  { %v2038_v44 = vadd.f32 %v2037_v32, %v2024_v42 }
 0x141   :  { %v2051_v36 = vpop.f32.mrf.mxu1 }
 0x142   :  { %v2052_v48 = vadd.f32 %v2051_v36, %v2038_v44 }
 0x145   :  { %v2065_v40 = vpop.f32.mrf.mxu2 }
 0x146   :  { %v2039_v41 = vpop.f32.mrf.mxu0  ;;  %v2079_v45 = vpop.f32.mrf.mxu3  ;;  %v2066_v51 = vadd.f32 %v2065_v40, %v2052_v48 }
 0x147   :  { %v2040_v46 = vadd.f32 %v2039_v41, %v2026_v43 }
 0x148   :  { %v2080_v54 = vadd.f32 %v2079_v45, %v2066_v51 }
 0x149   :  { %v2053_v47 = vpop.f32.mrf.mxu1 }
 0x14a   :  { %v2054_v52 = vadd.f32 %v2053_v47, %v2040_v46 }
 0x14d   :  { %v2067_v49 = vpop.f32.mrf.mxu2 }
 0x14e   :  { %v2093_v50 = vpop.f32.mrf.mxu0  ;;  %v2068_v53 = vadd.f32 %v2067_v49, %v2054_v52  ;;  %v2081_v55 = vpop.f32.mrf.mxu3 }
 0x14f   :  { %v2094_v57 = vadd.f32 %v2093_v50, %v2080_v54 }
 0x150   :  { %v2082_v56 = vadd.f32 %v2081_v55, %v2068_v53 }
 0x151   :  { %v2098_v60 = vmax.f32 %v2094_v57, 0.0 }
 0x156   :  { %v2095_v58 = vpop.f32.mrf.mxu0 }
 0x157   :  { %v2096_v59 = vadd.f32 %v2095_v58, %v2082_v56 }
 0x159   :  { %v2099_v61 = vmax.f32 %v2096_v59, 0.0 }
 0x15b   :  { %v2100_v62 = vpack.c.bf16 %v2099_v61, %v2098_v60 }
 0x15d   :  { %2177 = vmatmul.bf16.vlgmr.msra.gmra.mxu1 %v2100_v62 }
 0x1da   :  { %v2178_v0 = vpop.f32.mrf.mxu1 }
 0x1db   :  { %v2179_v1 = vadd.f32 %v3336_v63, %v2178_v0 }
 0x1dd   :  { %2183 = vst [vmem:[%s4146_s5] sm:$0xff] %v2179_v1 }
 0x1e2   :  { %v2180_v2 = vpop.f32.mrf.mxu1 }
 0x1e3   :  { %v2181_v3 = vadd.f32 %v3336_v63, %v2180_v2 }
 0x1e5   :  { %2184 = vst [vmem:[%s4146_s5 + $0x8] sm:$0xff] %v2181_v3 }

</bundles_post_ra>
